<compile_context>
chip_gen: v5e
topology: v5e:2x2
jax: 0.10.0
libtpu: 0.0.40
codegen_flags: <defaults>
</compile_context>

<pallas_src>
import jax
import jax.numpy as jnp
from jax.experimental import pallas as pl
from jax.experimental.pallas import tpu as pltpu


def _round_up(n, m):
    return ((n + m - 1) // m) * m


def _make_actor_kernel(obs_dim, obs_pad, h1p, h2p, act_pad):
    r1 = obs_pad
    r2 = obs_pad + h1p
    r3 = obs_pad + h1p + h2p

    def kernel(x_ref, wp_ref, bp_ref, o_ref):
        # Activations in bf16 feed the MXU natively; accumulate in f32.
        x = x_ref[...].astype(jnp.bfloat16)            # (TM, obs_dim)
        if obs_dim != obs_pad:
            # Pad K to match the (zero) padded rows of w1. Dead code when
            # obs_dim is already a multiple of 16 (as in the demo below).
            pad = jnp.zeros((x.shape[0], obs_pad - obs_dim), jnp.bfloat16)
            x = jnp.concatenate([x, pad], axis=-1)

        # Static, tile-aligned slices of the packed bf16 weight slab.
        w1 = wp_ref[0:r1, 0:h1p]          # (obs_pad, h1p)
        w2 = wp_ref[r1:r2, 0:h2p]         # (h1p,    h2p)
        w3 = wp_ref[r2:r3, 0:act_pad]     # (h2p,    act_pad)

        # Biases / action scale+bias live in one small f32 slab.
        bp = bp_ref[...]
        b1 = bp[0:1, 0:h1p]
        b2 = bp[1:2, 0:h2p]
        b3 = bp[2:3, 0:act_pad]
        scale = bp[3:4, 0:act_pad]
        bias = bp[4:5, 0:act_pad]

        h = jnp.dot(x, w1, preferred_element_type=jnp.float32) + b1
        h = jnp.maximum(h, 0.0).astype(jnp.bfloat16)
        h = jnp.dot(h, w2, preferred_element_type=jnp.float32) + b2
        h = jnp.maximum(h, 0.0).astype(jnp.bfloat16)
        a = jnp.dot(h, w3, preferred_element_type=jnp.float32) + b3
        a = jnp.tanh(a)

        # Lane-dense (TM, 128) store -> unmasked vst.
        o_ref[...] = a * scale + bias

    return kernel


def pack_params(params, obs_dim, hidden_dims, act_dim):
    """Pack all params into (bf16 weight slab, f32 bias/scale slab).

    Only lane (last) dims need 128-padding; the obs K-pad uses the bf16
    sublane tile (16) so w1 stays small.
    """
    w1, b1, w2, b2, w3, b3, scale, bias = params
    h1, h2 = hidden_dims
    obs_pad = _round_up(obs_dim, 16)      # bf16 sublane tile, not 128
    h1p = _round_up(h1, 128)
    h2p = _round_up(h2, 128)
    act_pad = _round_up(act_dim, 128)
    ncol = max(h1p, h2p, act_pad)

    wpack = jnp.zeros((obs_pad + h1p + h2p, ncol), jnp.float32)
    wpack = wpack.at[:obs_dim, :h1].set(w1)
    wpack = wpack.at[obs_pad:obs_pad + h1, :h2].set(w2)
    wpack = wpack.at[obs_pad + h1p:obs_pad + h1p + h2, :act_dim].set(w3)
    wpack = wpack.astype(jnp.bfloat16)

    bpack = jnp.zeros((8, ncol), jnp.float32)
    bpack = bpack.at[0, :h1].set(b1.reshape(-1))
    bpack = bpack.at[1, :h2].set(b2.reshape(-1))
    bpack = bpack.at[2, :act_dim].set(b3.reshape(-1))
    bpack = bpack.at[3, :act_dim].set(scale.reshape(-1))
    bpack = bpack.at[4, :act_dim].set(bias.reshape(-1))

    dims = (obs_dim, act_dim, obs_pad, h1p, h2p, act_pad)
    return wpack, bpack, dims


def actor_forward_padded(x, wpack, bpack, dims, tm=None):
    """x: [B, obs_dim] f32 -> padded [B_pad, act_pad] f32.

    tm=None -> one grid step over the whole (8-row-padded) batch: best for
    single-TC v5e/v6e at these sizes. On dual-TC v7x, pass
    tm = round_up(B, 8) // 2 to get exactly two "parallel" steps.
    Rows >= B and columns >= act_dim of the result are padding.
    """
    obs_dim, act_dim, obs_pad, h1p, h2p, act_pad = dims
    B = x.shape[0]

    bp = _round_up(B, 8)
    if tm is None:
        tm_eff = bp                         # single grid step
    else:
        tm_eff = min(_round_up(tm, 8), bp)
    bp_total = _round_up(bp, tm_eff)
    grid = (bp_total // tm_eff,)

    # Pad only the batch dim, only when needed (no-op for B=512, tm=None).
    if bp_total != B:
        x = jnp.pad(x, ((0, bp_total - B), (0, 0)))

    flops = 2 * bp_total * (obs_pad * h1p + h1p * h2p + h2p * act_pad)
    bytes_accessed = (x.size * 4 + wpack.size * 2 + bpack.size * 4
                      + bp_total * act_pad * 4)
    cost = pl.CostEstimate(flops=flops,
                           transcendentals=bp_total * act_pad,
                           bytes_accessed=bytes_accessed)

    kernel = _make_actor_kernel(obs_dim, obs_pad, h1p, h2p, act_pad)
    out_pad = pl.pallas_call(
        kernel,
        out_shape=jax.ShapeDtypeStruct((bp_total, act_pad), jnp.float32),
        grid=grid,
        in_specs=[
            # Unpadded x tile: last dim == full array dim, so legal.
            pl.BlockSpec((tm_eff, obs_dim), lambda i: (i, 0)),
            pl.BlockSpec(wpack.shape, lambda i: (0, 0)),   # weights resident
            pl.BlockSpec(bpack.shape, lambda i: (0, 0)),   # biases resident
        ],
        out_specs=pl.BlockSpec((tm_eff, act_pad), lambda i: (i, 0)),
        compiler_params=pltpu.CompilerParams(
            dimension_semantics=("parallel",)),
        cost_estimate=cost,
    )(x, wpack, bpack)
    return out_pad


def actor_forward(x, wpack, bpack, dims, tm=None):
    """Convenience wrapper returning the exact [B, act_dim] result.

    Consumers that can work on the padded (B_pad, 128) layout should call
    actor_forward_padded directly and slice lazily downstream.
    """
    obs_dim, act_dim = dims[0], dims[1]
    out_pad = actor_forward_padded(x, wpack, bpack, dims, tm=tm)
    return out_pad[:x.shape[0], :act_dim]


def init_params(key, obs_dim, hidden_dims, act_dim):
    """Deterministic init mimicking nn.Linear's U(-1/sqrt(fan_in), 1/sqrt(fan_in))."""
    dims = [obs_dim] + list(hidden_dims) + [act_dim]
    params = []
    for i in range(len(dims) - 1):
        key, kw, kb = jax.random.split(key, 3)
        fan_in, fan_out = dims[i], dims[i + 1]
        lim = 1.0 / jnp.sqrt(jnp.float32(fan_in))
        w = jax.random.uniform(kw, (fan_in, fan_out), jnp.float32, -lim, lim)
        b = jax.random.uniform(kb, (1, fan_out), jnp.float32, -lim, lim)
        params += [w, b]
    # action_scale / action_bias from a synthetic box action space [-2, 2].
    low = jnp.full((1, act_dim), -2.0, jnp.float32)
    high = jnp.full((1, act_dim), 2.0, jnp.float32)
    params += [(high - low) / 2.0, (high + low) / 2.0]
    return params


def actor_reference(x, params):
    """Pure-JAX reference with the same bf16-matmul / f32-accumulate numerics."""
    w1, b1, w2, b2, w3, b3, scale, bias = params
    bf = jnp.bfloat16
    h = jnp.dot(x.astype(bf), w1.astype(bf),
                preferred_element_type=jnp.float32) + b1
    h = jnp.maximum(h, 0.0)
    h = jnp.dot(h.astype(bf), w2.astype(bf),
                preferred_element_type=jnp.float32) + b2
    h = jnp.maximum(h, 0.0)
    a = jnp.tanh(jnp.dot(h.astype(bf), w3.astype(bf),
                         preferred_element_type=jnp.float32) + b3)
    return a * scale + bias


if __name__ == "__main__":
    # Spec default hidden_dims=[256, 256]; modest obs/action dims. Single grid
    # step (tm=None) over the whole batch — the right default on v5e/v6e; on
    # v7x pass tm=B//2 for two parallel steps.
    B, OBS_DIM, HIDDEN, ACT_DIM = 512, 16, [256, 256], 4

    key = jax.random.PRNGKey(0)
    key, kx = jax.random.split(key)
    x = jax.random.normal(kx, (B, OBS_DIM), jnp.float32)
    params = init_params(key, OBS_DIM, HIDDEN, ACT_DIM)
    wpack, bpack, dims = pack_params(params, OBS_DIM, HIDDEN, ACT_DIM)

    out = actor_forward(x, wpack, bpack, dims)
    out = jax.block_until_ready(out)

    ref = actor_reference(x, params)
    assert out.shape == (B, ACT_DIM)
    assert jnp.allclose(out, ref, atol=2e-3, rtol=1e-2), \
        float(jnp.max(jnp.abs(out - ref)))

    print("KERNEL_OK")
</pallas_src>

<mosaic_0001>
module attributes {stable_mosaic.version = 11 : i64} {
  func.func @kernel(%arg0: i32, %arg1: memref<512x16xf32, #tpu.memory_space<vmem>>, %arg2: memref<528x256xbf16, #tpu.memory_space<vmem>>, %arg3: memref<8x256xf32, #tpu.memory_space<vmem>>, %arg4: memref<512x128xf32, #tpu.memory_space<vmem>>) attributes {dimension_semantics = [#tpu.dimension_semantics<parallel>], iteration_bounds = array<i64: 1>, scalar_prefetch = 0 : i64, scratch_operands = 0 : i64, tpu.core_type = #tpu.core_type<tc>, window_params = [{transform_indices = @transform_0, window_bounds = array<i64: 512, 16>}, {pipeline_mode = #tpu.pipeline_mode<synchronous>, transform_indices = @transform_1, window_bounds = array<i64: 528, 256>}, {pipeline_mode = #tpu.pipeline_mode<synchronous>, transform_indices = @transform_2, window_bounds = array<i64: 8, 256>}, {transform_indices = @transform_3, window_bounds = array<i64: 512, 128>}]} {
    %c0 = arith.constant 0 : index
    %c0_0 = arith.constant 0 : index
    %0 = vector.load %arg1[%c0, %c0_0] : memref<512x16xf32, #tpu.memory_space<vmem>>, vector<512x16xf32>
    %1 = arith.truncf %0 : vector<512x16xf32> to vector<512x16xbf16>
    %c0_1 = arith.constant 0 : index
    %c0_2 = arith.constant 0 : index
    %2 = vector.load %arg2[%c0_1, %c0_2] : memref<528x256xbf16, #tpu.memory_space<vmem>>, vector<16x256xbf16>
    %c16 = arith.constant 16 : index
    %c0_3 = arith.constant 0 : index
    %3 = vector.load %arg2[%c16, %c0_3] : memref<528x256xbf16, #tpu.memory_space<vmem>>, vector<256x256xbf16>
    %c272 = arith.constant 272 : index
    %c0_4 = arith.constant 0 : index
    %4 = vector.load %arg2[%c272, %c0_4] : memref<528x256xbf16, #tpu.memory_space<vmem>>, vector<256x128xbf16>
    %c0_5 = arith.constant 0 : index
    %c0_6 = arith.constant 0 : index
    %5 = vector.load %arg3[%c0_5, %c0_6] : memref<8x256xf32, #tpu.memory_space<vmem>>, vector<8x256xf32>
    %6 = vector.extract_strided_slice %5 {offsets = [0, 0], sizes = [1, 256], strides = [1, 1]} : vector<8x256xf32> to vector<1x256xf32>
    %7 = vector.extract_strided_slice %5 {offsets = [1, 0], sizes = [1, 256], strides = [1, 1]} : vector<8x256xf32> to vector<1x256xf32>
    %8 = vector.extract_strided_slice %5 {offsets = [2, 0], sizes = [1, 128], strides = [1, 1]} : vector<8x256xf32> to vector<1x128xf32>
    %9 = vector.extract_strided_slice %5 {offsets = [3, 0], sizes = [1, 128], strides = [1, 1]} : vector<8x256xf32> to vector<1x128xf32>
    %10 = vector.extract_strided_slice %5 {offsets = [4, 0], sizes = [1, 128], strides = [1, 1]} : vector<8x256xf32> to vector<1x128xf32>
    %cst = arith.constant dense<0.000000e+00> : vector<512x256xf32>
    %11 = tpu.matmul %1, %2, %cst {dimension_numbers = #tpu.dot_dimension_numbers<[1], [0], [0], [1], [0, 0, 1, 1], [], []>} : vector<512x16xbf16>, vector<16x256xbf16>, vector<512x256xf32> -> vector<512x256xf32>
    %12 = vector.broadcast %6 : vector<1x256xf32> to vector<512x256xf32>
    %13 = arith.addf %11, %12 : vector<512x256xf32>
    %cst_7 = arith.constant 0.000000e+00 : f32
    %14 = vector.broadcast %cst_7 : f32 to vector<512x256xf32>
    %15 = arith.maximumf %13, %14 : vector<512x256xf32>
    %16 = arith.truncf %15 : vector<512x256xf32> to vector<512x256xbf16>
    %cst_8 = arith.constant dense<0.000000e+00> : vector<512x256xf32>
    %17 = tpu.matmul %16, %3, %cst_8 {dimension_numbers = #tpu.dot_dimension_numbers<[1], [0], [0], [1], [0, 0, 1, 1], [], []>} : vector<512x256xbf16>, vector<256x256xbf16>, vector<512x256xf32> -> vector<512x256xf32>
    %18 = vector.broadcast %7 : vector<1x256xf32> to vector<512x256xf32>
    %19 = arith.addf %17, %18 : vector<512x256xf32>
    %cst_9 = arith.constant 0.000000e+00 : f32
    %20 = vector.broadcast %cst_9 : f32 to vector<512x256xf32>
    %21 = arith.maximumf %19, %20 : vector<512x256xf32>
    %22 = arith.truncf %21 : vector<512x256xf32> to vector<512x256xbf16>
    %cst_10 = arith.constant dense<0.000000e+00> : vector<512x128xf32>
    %23 = tpu.matmul %22, %4, %cst_10 {dimension_numbers = #tpu.dot_dimension_numbers<[1], [0], [0], [1], [0, 0, 1, 1], [], []>} : vector<512x256xbf16>, vector<256x128xbf16>, vector<512x128xf32> -> vector<512x128xf32>
    %24 = vector.broadcast %8 : vector<1x128xf32> to vector<512x128xf32>
    %25 = arith.addf %23, %24 : vector<512x128xf32>
    %26 = math.tanh %25 : vector<512x128xf32>
    %27 = vector.broadcast %9 : vector<1x128xf32> to vector<512x128xf32>
    %28 = arith.mulf %26, %27 : vector<512x128xf32>
    %29 = vector.broadcast %10 : vector<1x128xf32> to vector<512x128xf32>
    %30 = arith.addf %28, %29 : vector<512x128xf32>
    %c0_11 = arith.constant 0 : index
    %c0_12 = arith.constant 0 : index
    %31 = vector.load %arg4[%c0_11, %c0_12] : memref<512x128xf32, #tpu.memory_space<vmem>>, vector<512x128xf32>
    tpu.vector_store %arg4[%c0_11, %c0_12], %30 {strides = array<i32>} : memref<512x128xf32, #tpu.memory_space<vmem>>, vector<512x128xf32>,
    return
  }
  func.func @transform_0(%arg0: i32) -> (i32, i32) {
    %c0_i32 = arith.constant 0 : i32
    %c0_i32_0 = arith.constant 0 : i32
    return %arg0, %c0_i32 : i32, i32
  }
  func.func @transform_1(%arg0: i32) -> (i32, i32) {
    %c0_i32 = arith.constant 0 : i32
    %c0_i32_0 = arith.constant 0 : i32
    %c0_i32_1 = arith.constant 0 : i32
    return %c0_i32, %c0_i32_0 : i32, i32
  }
  func.func @transform_2(%arg0: i32) -> (i32, i32) {
    %c0_i32 = arith.constant 0 : i32
    %c0_i32_0 = arith.constant 0 : i32
    %c0_i32_1 = arith.constant 0 : i32
    return %c0_i32, %c0_i32_0 : i32, i32
  }
  func.func @transform_3(%arg0: i32) -> (i32, i32) {
    %c0_i32 = arith.constant 0 : i32
    %c0_i32_0 = arith.constant 0 : i32
    return %arg0, %c0_i32 : i32, i32
  }
}

</mosaic_0001>

<bundles_post_ra>
// kernel: tpu_custom_call.1
= control target key start
LH: loop header
LB: loop body
LE: loop exit
PB: predicated region body
PF: predicated region fallthrough
CT: control target
= control target key end

     0   :  { %vm192_vm0 = vcmask 130048   ;;  %s4445_s0 = inlined_call_operand.vmem [shape: f32[512,16], index: 0, kind: input, shape index: {}]   ;;  %s4446_s1 = inlined_call_operand.vmem [shape: bf16[528,256], index: 1, kind: input, shape index: {}]   ;;  %s4447_s2 = inlined_call_operand.vmem [shape: f32[8,256], index: 2, kind: input, shape index: {}]   ;;  %s4448_s3 = inlined_call_operand.hbm [shape: f32[512,128], index: 3, kind: output, shape index: {}]  }
   0x1   :  { %v2562_v0 = vld [vmem:[%s4446_s1] sm:$0xf]  ;;  %v2825_v1 = vld [vmem:[%s4446_s1 + $0x4] sm:$0xf0]  ;;  %v2824_v2 = vld [vmem:[%s4446_s1 + $0x4] sm:$0xf] }
   0x2   :  { %v2563_v3 = vor.u32 %v2825_v1, %v2562_v0  ;;  %v2564_v4 = vld [vmem:[%s4446_s1 + $0x8] sm:$0xf0]  ;;  %v16_v5 = vld [vmem:[%s4445_s0] sm:$0xff] }
   0x3   :  { %v17_v6 = vld [vmem:[%s4445_s0 + $0x8] sm:$0xff]  ;;  %v2567_v7 = vor.u32 %v2824_v2, %v2564_v4  ;;  %v2840_v9 = vld [vmem:[%s4446_s1 + $0x84] sm:$0xf] }
   0x4   :  { %v80_v8 = vpack.c.bf16 %v17_v6, %v16_v5  ;;  %v2692_v10 = vld [vmem:[%s4446_s1 + $0x88] sm:$0xf0]  ;;  %v2856_v11 = vld [vmem:[%s4446_s1 + $0x104] sm:$0xf]  ;;  %296 = vmatpush.bf16.msra.mxu0 %v2563_v3 }
   0x5   :  { %v2695_v12 = vor.u32 %v2840_v9, %v2692_v10  ;;  %v2756_v13 = vld [vmem:[%s4446_s1 + $0x108] sm:$0xf0]  ;;  %465 = vmatpush.bf16.msra.mxu1 %v2567_v7 }
   0x6   :  { %v2759_v14 = vor.u32 %v2856_v11, %v2756_v13 }
   0x7   :  { %8 = vsyncpa [#allocation3], 0  ;;  %2568 = vmatmul.msk.bf16.vlgmr.msra.gmra.mxu0 %vm192_vm0, %v80_v8  ;;  %v18_v15 = vld [vmem:[%s4445_s0 + $0x10] sm:$0xff]  ;;  %v19_v16 = vld [vmem:[%s4445_s0 + $0x18] sm:$0xff]  ;;  %s2548_s25 = sshll.u32 %s4448_s3, 4  ;;  %s3034_s26 = smov 128   ;;  %s2549_s25 = int_to_ptr.hbm [resolvable:$true] %s2548_s25 }
   0x8   :  { %1319 = vmatpush.bf16.msrb.mxu0 %v2695_v12  ;;  %2600 = vmatmul.msk.bf16.vlgmr.msra.gmra.mxu1 %vm192_vm0, %v80_v8  ;;  %v81_v17 = vpack.c.bf16 %v19_v16, %v18_v15  ;;  %v20_v18 = vld [vmem:[%s4445_s0 + $0x20] sm:$0xff]  ;;  %v21_v19 = vld [vmem:[%s4445_s0 + $0x28] sm:$0xff]  ;;  %v2838_v21 = vld [vmem:[%s4446_s1 + $0x74] sm:$0xf]  ;;  %s3035_s27 = smov 8  }
   0x9   :  { %1488 = vmatpush.bf16.msrb.mxu1 %v2759_v14  ;;  %v82_v20 = vpack.c.bf16 %v21_v19, %v20_v18  ;;  %v2684_v22 = vld [vmem:[%s4446_s1 + $0x78] sm:$0xf0]  ;;  %v2854_v23 = vld [vmem:[%s4446_s1 + $0xf4] sm:$0xf]  ;;  %v24_v30 = vld [vmem:[%s4445_s0 + $0x40] sm:$0xff] }
   0xa   :  { %v2687_v24 = vor.u32 %v2838_v21, %v2684_v22  ;;  %v2748_v25 = vld [vmem:[%s4446_s1 + $0xf8] sm:$0xf0]  ;;  %v22_v27 = vld [vmem:[%s4445_s0 + $0x30] sm:$0xff]  ;;  %v25_v31 = vld [vmem:[%s4445_s0 + $0x48] sm:$0xff] }
   0xb   :  { %v2751_v26 = vor.u32 %v2854_v23, %v2748_v25  ;;  %v23_v28 = vld [vmem:[%s4445_s0 + $0x38] sm:$0xff]  ;;  %v84_v32 = vpack.c.bf16 %v25_v31, %v24_v30  ;;  %v2690_v33 = vld [vmem:[%s4446_s1 + $0x80] sm:$0xf]  ;;  %v2841_v34 = vld [vmem:[%s4446_s1 + $0x84] sm:$0xf0] }
   0xc   :  { %1320 = vmatpush.bf16.msrb.mxu0 %v2687_v24  ;;  %v83_v29 = vpack.c.bf16 %v23_v28, %v22_v27  ;;  %v2754_v35 = vld [vmem:[%s4446_s1 + $0x100] sm:$0xf]  ;;  %v2691_v36 = vor.u32 %v2841_v34, %v2690_v33  ;;  %v2857_v37 = vld [vmem:[%s4446_s1 + $0x104] sm:$0xf0]  ;;  %v26_v39 = vld [vmem:[%s4445_s0 + $0x50] sm:$0xff] }
   0xd   :  { %1489 = vmatpush.bf16.msrb.mxu1 %v2751_v26  ;;  %v2755_v38 = vor.u32 %v2857_v37, %v2754_v35  ;;  %v27_v40 = vld [vmem:[%s4445_s0 + $0x58] sm:$0xff]  ;;  %v2682_v42 = vld [vmem:[%s4446_s1 + $0x70] sm:$0xf]  ;;  %v2674_v48 = vld [vmem:[%s4446_s1 + $0x60] sm:$0xf] }
   0xe   :  { %981 = vmatpush.bf16.msra.mxu2 %v2691_v36  ;;  %v85_v41 = vpack.c.bf16 %v27_v40, %v26_v39  ;;  %v2839_v43 = vld [vmem:[%s4446_s1 + $0x74] sm:$0xf0]  ;;  %v2746_v44 = vld [vmem:[%s4446_s1 + $0xf0] sm:$0xf]  ;;  %v2837_v49 = vld [vmem:[%s4446_s1 + $0x64] sm:$0xf0] }
   0xf   :  { %1150 = vmatpush.bf16.msra.mxu3 %v2755_v38  ;;  %v2683_v45 = vor.u32 %v2839_v43, %v2682_v42  ;;  %v2855_v46 = vld [vmem:[%s4446_s1 + $0xf4] sm:$0xf0]  ;;  %v2738_v50 = vld [vmem:[%s4446_s1 + $0xe0] sm:$0xf]  ;;  %v2675_v51 = vor.u32 %v2837_v49, %v2674_v48  ;;  %v2853_v52 = vld [vmem:[%s4446_s1 + $0xe4] sm:$0xf0] }
  0x10   :  { %v2747_v47 = vor.u32 %v2855_v46, %v2746_v44  ;;  %v2739_v53 = vor.u32 %v2853_v52, %v2738_v50  ;;  %v2666_v54 = vld [vmem:[%s4446_s1 + $0x50] sm:$0xf]  ;;  %v2835_v55 = vld [vmem:[%s4446_s1 + $0x54] sm:$0xf0]  ;;  %v28_v60 = vld [vmem:[%s4445_s0 + $0x60] sm:$0xff] }
  0x11   :  { %v2730_v56 = vld [vmem:[%s4446_s1 + $0xd0] sm:$0xf]  ;;  %v2851_v57 = vld [vmem:[%s4446_s1 + $0xd4] sm:$0xf0]  ;;  %v2667_v58 = vor.u32 %v2835_v55, %v2666_v54  ;;  %v29_v61 = vld [vmem:[%s4445_s0 + $0x68] sm:$0xff] }
  0x12   :  { %982 = vmatpush.bf16.msra.mxu2 %v2683_v45  ;;  %v2731_v59 = vor.u32 %v2851_v57, %v2730_v56  ;;  %v2658_v62 = vld [vmem:[%s4446_s1 + $0x40] sm:$0xf]  ;;  %v2833_v63 = vld [vmem:[%s4446_s1 + $0x44] sm:$0xf0]  ;;  %v86_v1 = vpack.c.bf16 %v29_v61, %v28_v60  ;;  %v2650_v5 = vld [vmem:[%s4446_s1 + $0x30] sm:$0xf] }
  0x13   :  { %1151 = vmatpush.bf16.msra.mxu3 %v2747_v47  ;;  %v2722_v0 = vld [vmem:[%s4446_s1 + $0xc0] sm:$0xf]  ;;  %v2659_v2 = vor.u32 %v2833_v63, %v2658_v62  ;;  %v2849_v3 = vld [vmem:[%s4446_s1 + $0xc4] sm:$0xf0]  ;;  %v2831_v6 = vld [vmem:[%s4446_s1 + $0x34] sm:$0xf0] }
  0x14   :  { %v2723_v4 = vor.u32 %v2849_v3, %v2722_v0  ;;  %v2651_v7 = vor.u32 %v2831_v6, %v2650_v5  ;;  %v2714_v8 = vld [vmem:[%s4446_s1 + $0xb0] sm:$0xf]  ;;  %v2847_v9 = vld [vmem:[%s4446_s1 + $0xb4] sm:$0xf0]  ;;  %v2836_v10 = vld [vmem:[%s4446_s1 + $0x64] sm:$0xf] }
  0x15   :  { %v2676_v11 = vld [vmem:[%s4446_s1 + $0x68] sm:$0xf0]  ;;  %v2715_v12 = vor.u32 %v2847_v9, %v2714_v8  ;;  %v2852_v13 = vld [vmem:[%s4446_s1 + $0xe4] sm:$0xf]  ;;  %v2829_v18 = vld [vmem:[%s4446_s1 + $0x24] sm:$0xf0] }
  0x16   :  { %983 = vmatpush.bf16.msra.mxu2 %v2675_v51  ;;  %v2679_v14 = vor.u32 %v2836_v10, %v2676_v11  ;;  %v2740_v15 = vld [vmem:[%s4446_s1 + $0xe8] sm:$0xf0]  ;;  %v2706_v19 = vld [vmem:[%s4446_s1 + $0xa0] sm:$0xf]  ;;  %v2845_v21 = vld [vmem:[%s4446_s1 + $0xa4] sm:$0xf0] }
  0x17   :  { %2569 = vmatmul.msk.bf16.gmra.mxu0 %vm192_vm0, %v81_v17  ;;  %1152 = vmatpush.bf16.msra.mxu3 %v2739_v53  ;;  %v2743_v16 = vor.u32 %v2852_v13, %v2740_v15  ;;  %v2707_v22 = vor.u32 %v2845_v21, %v2706_v19  ;;  %v2634_v23 = vld [vmem:[%s4446_s1 + $0x10] sm:$0xf]  ;;  %v2827_v24 = vld [vmem:[%s4446_s1 + $0x14] sm:$0xf0]  ;;  %v2865_v33 = vld [vmem:[%s4446_s1 + $0x184] sm:$0xf0] }
  0x18   :  { %2601 = vmatmul.msk.bf16.gmra.mxu1 %vm192_vm0, %v81_v17  ;;  %v2642_v17 = vld [vmem:[%s4446_s1 + $0x20] sm:$0xf]  ;;  %1321 = vmatpush.bf16.msrb.mxu0 %v2679_v14  ;;  %v2698_v25 = vld [vmem:[%s4446_s1 + $0x90] sm:$0xf]  ;;  %v2635_v26 = vor.u32 %v2827_v24, %v2634_v23  ;;  %v2843_v27 = vld [vmem:[%s4446_s1 + $0x94] sm:$0xf0] }
  0x19   :  { %1490 = vmatpush.bf16.msrb.mxu1 %v2743_v16  ;;  %v30_v28 = vld [vmem:[%s4445_s0 + $0x70] sm:$0xff]  ;;  %v2699_v30 = vor.u32 %v2843_v27, %v2698_v25  ;;  %v2822_v35 = vld [vmem:[%s4446_s1 + $0x200] sm:$0xf]  ;;  %v2873_v36 = vld [vmem:[%s4446_s1 + $0x204] sm:$0xf0] }
  0x1a   :  { %984 = vmatpush.bf16.msra.mxu2 %v2667_v58  ;;  %v2823_v37 = vor.u32 %v2873_v36, %v2822_v35  ;;  %v32_v38 = vld [vmem:[%s4445_s0 + $0x80] sm:$0xff]  ;;  %v33_v39 = vld [vmem:[%s4445_s0 + $0x88] sm:$0xff]  ;;  %v34_v57 = vld [vmem:[%s4445_s0 + $0x90] sm:$0xff] }
  0x1b   :  { %1153 = vmatpush.bf16.msra.mxu3 %v2731_v59  ;;  %v88_v40 = vpack.c.bf16 %v33_v39, %v32_v38  ;;  %v179_v43 = vld [vmem:[%s4447_s2 + $0x8] sm:$0xff]  ;;  %v35_v58 = vld [vmem:[%s4445_s0 + $0x98] sm:$0xff]  ;;  %v36_v10 = vld [vmem:[%s4445_s0 + $0xa0] sm:$0xff] }
  0x1c   :  { %v3294_v46 = vperm.slane %v179_v43, 0  ;;  %v89_v61 = vpack.c.bf16 %v35_v58, %v34_v57  ;;  %v37_v11 = vld [vmem:[%s4445_s0 + $0xa8] sm:$0xff]  ;;  %v2732_v21 = vld [vmem:[%s4446_s1 + $0xd8] sm:$0xf0]  ;;  %v2786_v39 = vld [vmem:[%s4446_s1 + $0x170] sm:$0xf] }
  0x1d   :  { %v90_v14 = vpack.c.bf16 %v37_v11, %v36_v10 }
  0x1e   :  { %985 = vmatpush.bf16.msra.mxu2 %v2659_v2 }
  0x1f   :  { %1154 = vmatpush.bf16.msra.mxu3 %v2723_v4 }
  0x22   :  { %986 = vmatpush.bf16.msra.mxu2 %v2651_v7 }
  0x23   :  { %1155 = vmatpush.bf16.msra.mxu3 %v2715_v12 }
  0x27   :  { %2570 = vmatmul.msk.bf16.gmra.mxu0 %vm192_vm0, %v82_v20  ;;  %1156 = vmatpush.bf16.msra.mxu3 %v2707_v22 }
  0x28   :  { %2602 = vmatmul.msk.bf16.gmra.mxu1 %vm192_vm0, %v82_v20  ;;  %v2643_v20 = vor.u32 %v2829_v18, %v2642_v17  ;;  %v2834_v17 = vld [vmem:[%s4446_s1 + $0x54] sm:$0xf]  ;;  %v2668_v18 = vld [vmem:[%s4446_s1 + $0x58] sm:$0xf0] }
  0x29   :  { %v2671_v19 = vor.u32 %v2834_v17, %v2668_v18  ;;  %v43_v17 = vld [vmem:[%s4445_s0 + $0xd8] sm:$0xff] }
  0x2a   :  { %987 = vmatpush.bf16.msra.mxu2 %v2643_v20  ;;  %v2850_v20 = vld [vmem:[%s4446_s1 + $0xd4] sm:$0xf] }
  0x2b   :  { %1157 = vmatpush.bf16.msra.mxu3 %v2699_v30  ;;  %v2735_v22 = vor.u32 %v2850_v20, %v2732_v21  ;;  %1322 = vmatpush.bf16.msrb.mxu0 %v2671_v19 }
  0x2d   :  { %1491 = vmatpush.bf16.msrb.mxu1 %v2735_v22 }
  0x2e   :  { %988 = vmatpush.bf16.msra.mxu2 %v2635_v26 }
  0x2f   :  { %2115 = vmatpush.bf16.msrb.mxu3 %v2823_v37 }
  0x37   :  { %2571 = vmatmul.msk.bf16.gmra.mxu0 %vm192_vm0, %v83_v29 }
  0x38   :  { %2603 = vmatmul.msk.bf16.gmra.mxu1 %vm192_vm0, %v83_v29  ;;  %v31_v29 = vld [vmem:[%s4445_s0 + $0x78] sm:$0xff] }
  0x39   :  { %v87_v31 = vpack.c.bf16 %v31_v29, %v30_v28 }
  0x47   :  { %2572 = vmatmul.msk.bf16.gmra.mxu0 %vm192_vm0, %v84_v32 }
  0x48   :  { %2604 = vmatmul.msk.bf16.gmra.mxu1 %vm192_vm0, %v84_v32  ;;  %v2790_v32 = vld [vmem:[%s4446_s1 + $0x180] sm:$0xf] }
  0x49   :  { %v2791_v34 = vor.u32 %v2865_v33, %v2790_v32  ;;  %v38_v33 = vld [vmem:[%s4445_s0 + $0xb0] sm:$0xff] }
  0x4b   :  { %1946 = vmatpush.bf16.msrb.mxu2 %v2791_v34  ;;  %v39_v34 = vld [vmem:[%s4445_s0 + $0xb8] sm:$0xff] }
  0x4c   :  { %v91_v37 = vpack.c.bf16 %v39_v34, %v38_v33  ;;  %v44_v33 = vld [vmem:[%s4445_s0 + $0xe0] sm:$0xff]  ;;  %v45_v34 = vld [vmem:[%s4445_s0 + $0xe8] sm:$0xff] }
  0x57   :  { %2573 = vmatmul.msk.bf16.gmra.mxu0 %vm192_vm0, %v85_v41 }
  0x58   :  { %2605 = vmatmul.msk.bf16.gmra.mxu1 %vm192_vm0, %v85_v41  ;;  %v3285_v41 = vld [vmem:[%s4447_s2] sm:$0xff] }
  0x59   :  { %v3291_v45 = vperm.slane %v3285_v41, 0 }
  0x67   :  { %2574 = vmatmul.msk.bf16.gmra.mxu0 %vm192_vm0, %v86_v1 }
  0x68   :  { %2606 = vmatmul.msk.bf16.gmra.mxu1 %vm192_vm0, %v86_v1 }
  0x77   :  { %2575 = vmatmul.msk.bf16.gmra.mxu0 %vm192_vm0, %v87_v31 }
  0x78   :  { %2607 = vmatmul.msk.bf16.gmra.mxu1 %vm192_vm0, %v87_v31 }
  0x84   :  { %v298_v42 = vpop.f32.mrf.mxu0 }
  0x85   :  { %v467_v44 = vpop.f32.mrf.mxu1  ;;  %v299_v47 = vadd.f32 %v298_v42, %v3291_v45 }
  0x86   :  { %v468_v48 = vadd.f32 %v467_v44, %v3294_v46  ;;  %v2818_v44 = vld [vmem:[%s4446_s1 + $0x1f0] sm:$0xf] }
  0x87   :  { %2576 = vmatmul.msk.bf16.gmra.mxu0 %vm192_vm0, %v88_v40  ;;  %v627_v53 = vmax.f32 %v299_v47, 0.0  ;;  %v2872_v47 = vld [vmem:[%s4446_s1 + $0x1f4] sm:$0xf0] }
  0x88   :  { %2608 = vmatmul.msk.bf16.gmra.mxu1 %vm192_vm0, %v88_v40  ;;  %v628_v55 = vmax.f32 %v468_v48, 0.0  ;;  %v2864_v40 = vld [vmem:[%s4446_s1 + $0x174] sm:$0xf0]  ;;  %v2819_v48 = vor.u32 %v2872_v47, %v2818_v44  ;;  %v2660_v44 = vld [vmem:[%s4446_s1 + $0x48] sm:$0xf0] }
  0x89   :  { %v2787_v43 = vor.u32 %v2864_v40, %v2786_v39  ;;  %v94_v39 = vpack.c.bf16 %v45_v34, %v44_v33 }
  0x8a   :  { %2116 = vmatpush.bf16.msrb.mxu3 %v2819_v48  ;;  %v2848_v48 = vld [vmem:[%s4446_s1 + $0xc4] sm:$0xf] }
  0x8b   :  { %1947 = vmatpush.bf16.msrb.mxu2 %v2787_v43  ;;  %v2832_v43 = vld [vmem:[%s4446_s1 + $0x44] sm:$0xf] }
  0x8c   :  { %v300_v49 = vpop.f32.mrf.mxu0  ;;  %v2663_v47 = vor.u32 %v2832_v43, %v2660_v44 }
  0x8d   :  { %v301_v50 = vadd.f32 %v300_v49, %v3291_v45  ;;  %v469_v51 = vpop.f32.mrf.mxu1 }
  0x8e   :  { %v470_v52 = vadd.f32 %v469_v51, %v3294_v46  ;;  %1323 = vmatpush.bf16.msrb.mxu0 %v2663_v47 }
  0x8f   :  { %v629_v54 = vmax.f32 %v301_v50, 0.0 }
  0x90   :  { %v630_v56 = vmax.f32 %v470_v52, 0.0 }
  0x91   :  { %v3307_v59 = vpack.c.bf16 %v629_v54, %v627_v53 }
  0x92   :  { %v3309_v60 = vpack.c.bf16 %v630_v56, %v628_v55 }
  0x93   :  { %989 = vmatmul.bf16.vlgmr.msra.gmra.mxu2 %v3307_v59 }
  0x94   :  { %1158 = vmatmul.bf16.vlgmr.msra.gmra.mxu3 %v3309_v60  ;;  %v303_v62 = vpop.f32.mrf.mxu0 }
  0x95   :  { %v472_v63 = vpop.f32.mrf.mxu1  ;;  %v304_v0 = vadd.f32 %v303_v62, %v3291_v45  ;;  %v41_v62 = vld [vmem:[%s4445_s0 + $0xc8] sm:$0xff] }
  0x96   :  { %v473_v1 = vadd.f32 %v472_v63, %v3294_v46 }
  0x97   :  { %2577 = vmatmul.msk.bf16.gmra.mxu0 %vm192_vm0, %v89_v61  ;;  %v631_v6 = vmax.f32 %v304_v0, 0.0 }
  0x98   :  { %2609 = vmatmul.msk.bf16.gmra.mxu1 %vm192_vm0, %v89_v61  ;;  %v632_v8 = vmax.f32 %v473_v1, 0.0  ;;  %v40_v61 = vld [vmem:[%s4445_s0 + $0xc0] sm:$0xff] }
  0x99   :  { %v92_v1 = vpack.c.bf16 %v41_v62, %v40_v61 }
  0x9c   :  { %v305_v2 = vpop.f32.mrf.mxu0 }
  0x9d   :  { %v306_v3 = vadd.f32 %v305_v2, %v3291_v45  ;;  %v474_v4 = vpop.f32.mrf.mxu1 }
  0x9e   :  { %v475_v5 = vadd.f32 %v474_v4, %v3294_v46 }
  0x9f   :  { %v633_v7 = vmax.f32 %v306_v3, 0.0 }
  0xa0   :  { %v634_v9 = vmax.f32 %v475_v5, 0.0 }
  0xa1   :  { %v3325_v12 = vpack.c.bf16 %v633_v7, %v631_v6 }
  0xa2   :  { %v3327_v13 = vpack.c.bf16 %v634_v9, %v632_v8 }
  0xa3   :  { %994 = vmatmul.bf16.gmra.mxu2 %v3325_v12 }
  0xa4   :  { %1163 = vmatmul.bf16.gmra.mxu3 %v3327_v13  ;;  %v308_v15 = vpop.f32.mrf.mxu0 }
  0xa5   :  { %v477_v16 = vpop.f32.mrf.mxu1  ;;  %v309_v23 = vadd.f32 %v308_v15, %v3291_v45 }
  0xa6   :  { %v478_v24 = vadd.f32 %v477_v16, %v3294_v46  ;;  %v42_v16 = vld [vmem:[%s4445_s0 + $0xd0] sm:$0xff] }
  0xa7   :  { %2578 = vmatmul.msk.bf16.gmra.mxu0 %vm192_vm0, %v90_v14  ;;  %v635_v29 = vmax.f32 %v309_v23, 0.0  ;;  %v93_v20 = vpack.c.bf16 %v43_v17, %v42_v16 }
  0xa8   :  { %2610 = vmatmul.msk.bf16.gmra.mxu1 %vm192_vm0, %v90_v14  ;;  %v636_v31 = vmax.f32 %v478_v24, 0.0 }
  0xac   :  { %v310_v25 = vpop.f32.mrf.mxu0 }
  0xad   :  { %v311_v26 = vadd.f32 %v310_v25, %v3291_v45  ;;  %v479_v27 = vpop.f32.mrf.mxu1 }
  0xae   :  { %v480_v28 = vadd.f32 %v479_v27, %v3294_v46 }
  0xaf   :  { %v637_v30 = vmax.f32 %v311_v26, 0.0 }
  0xb0   :  { %v638_v32 = vmax.f32 %v480_v28, 0.0 }
  0xb1   :  { %v3355_v35 = vpack.c.bf16 %v637_v30, %v635_v29 }
  0xb2   :  { %v3357_v36 = vpack.c.bf16 %v638_v32, %v636_v31 }
  0xb3   :  { %999 = vmatmul.bf16.gmra.mxu2 %v3355_v35 }
  0xb4   :  { %1168 = vmatmul.bf16.gmra.mxu3 %v3357_v36  ;;  %v313_v38 = vpop.f32.mrf.mxu0 }
  0xb5   :  { %v482_v42 = vpop.f32.mrf.mxu1  ;;  %v314_v49 = vadd.f32 %v313_v38, %v3291_v45 }
  0xb6   :  { %v483_v50 = vadd.f32 %v482_v42, %v3294_v46 }
  0xb7   :  { %2579 = vmatmul.msk.bf16.gmra.mxu0 %vm192_vm0, %v91_v37  ;;  %v639_v55 = vmax.f32 %v314_v49, 0.0  ;;  %v2724_v49 = vld [vmem:[%s4446_s1 + $0xc8] sm:$0xf0] }
  0xb8   :  { %2611 = vmatmul.msk.bf16.gmra.mxu1 %vm192_vm0, %v91_v37  ;;  %v640_v57 = vmax.f32 %v483_v50, 0.0  ;;  %v2727_v50 = vor.u32 %v2848_v48, %v2724_v49 }
  0xba   :  { %1492 = vmatpush.bf16.msrb.mxu1 %v2727_v50 }
  0xbc   :  { %v315_v51 = vpop.f32.mrf.mxu0 }
  0xbd   :  { %v316_v52 = vadd.f32 %v315_v51, %v3291_v45  ;;  %v484_v53 = vpop.f32.mrf.mxu1 }
  0xbe   :  { %v485_v54 = vadd.f32 %v484_v53, %v3294_v46 }
  0xbf   :  { %v641_v56 = vmax.f32 %v316_v52, 0.0 }
  0xc0   :  { %v642_v58 = vmax.f32 %v485_v54, 0.0 }
  0xc1   :  { %v3385_v63 = vpack.c.bf16 %v641_v56, %v639_v55 }
  0xc2   :  { %v3387_v0 = vpack.c.bf16 %v642_v58, %v640_v57 }
  0xc3   :  { %1004 = vmatmul.bf16.gmra.mxu2 %v3385_v63 }
  0xc4   :  { %1173 = vmatmul.bf16.gmra.mxu3 %v3387_v0  ;;  %v318_v2 = vpop.f32.mrf.mxu0 }
  0xc5   :  { %v487_v3 = vpop.f32.mrf.mxu1  ;;  %v319_v4 = vadd.f32 %v318_v2, %v3291_v45  ;;  %v47_v2 = vld [vmem:[%s4445_s0 + $0xf8] sm:$0xff] }
  0xc6   :  { %v488_v5 = vadd.f32 %v487_v3, %v3294_v46 }
  0xc7   :  { %2580 = vmatmul.msk.bf16.gmra.mxu0 %vm192_vm0, %v92_v1  ;;  %v643_v10 = vmax.f32 %v319_v4, 0.0 }
  0xc8   :  { %2612 = vmatmul.msk.bf16.gmra.mxu1 %vm192_vm0, %v92_v1  ;;  %v644_v14 = vmax.f32 %v488_v5, 0.0  ;;  %v46_v1 = vld [vmem:[%s4445_s0 + $0xf0] sm:$0xff] }
  0xc9   :  { %v95_v5 = vpack.c.bf16 %v47_v2, %v46_v1 }
  0xcc   :  { %v320_v6 = vpop.f32.mrf.mxu0 }
  0xcd   :  { %v321_v7 = vadd.f32 %v320_v6, %v3291_v45  ;;  %v489_v8 = vpop.f32.mrf.mxu1 }
  0xce   :  { %v490_v9 = vadd.f32 %v489_v8, %v3294_v46  ;;  %v2863_v8 = vld [vmem:[%s4446_s1 + $0x164] sm:$0xf0] }
  0xcf   :  { %v645_v11 = vmax.f32 %v321_v7, 0.0  ;;  %v2782_v7 = vld [vmem:[%s4446_s1 + $0x160] sm:$0xf] }
  0xd0   :  { %v646_v15 = vmax.f32 %v490_v9, 0.0 }
  0xd1   :  { %v3403_v18 = vpack.c.bf16 %v645_v11, %v643_v10  ;;  %v2783_v10 = vor.u32 %v2863_v8, %v2782_v7  ;;  %v2814_v11 = vld [vmem:[%s4446_s1 + $0x1e0] sm:$0xf] }
  0xd2   :  { %v3405_v19 = vpack.c.bf16 %v646_v15, %v644_v14  ;;  %v2871_v14 = vld [vmem:[%s4446_s1 + $0x1e4] sm:$0xf0] }
  0xd3   :  { %1009 = vmatmul.bf16.gmra.mxu2 %v3403_v18  ;;  %v2815_v15 = vor.u32 %v2871_v14, %v2814_v11 }
  0xd4   :  { %1178 = vmatmul.bf16.gmra.mxu3 %v3405_v19  ;;  %v323_v21 = vpop.f32.mrf.mxu0  ;;  %1948 = vmatpush.bf16.msrb.mxu2 %v2783_v10 }
  0xd5   :  { %v492_v22 = vpop.f32.mrf.mxu1  ;;  %v324_v23 = vadd.f32 %v323_v21, %v3291_v45  ;;  %2117 = vmatpush.bf16.msrb.mxu3 %v2815_v15 }
  0xd6   :  { %v493_v24 = vadd.f32 %v492_v22, %v3294_v46 }
  0xd7   :  { %2581 = vmatmul.msk.bf16.gmra.mxu0 %vm192_vm0, %v93_v20  ;;  %v647_v29 = vmax.f32 %v324_v23, 0.0 }
  0xd8   :  { %2613 = vmatmul.msk.bf16.gmra.mxu1 %vm192_vm0, %v93_v20  ;;  %v648_v31 = vmax.f32 %v493_v24, 0.0 }
  0xdc   :  { %v325_v25 = vpop.f32.mrf.mxu0 }
  0xdd   :  { %v326_v26 = vadd.f32 %v325_v25, %v3291_v45  ;;  %v494_v27 = vpop.f32.mrf.mxu1 }
  0xde   :  { %v495_v28 = vadd.f32 %v494_v27, %v3294_v46 }
  0xdf   :  { %v649_v30 = vmax.f32 %v326_v26, 0.0 }
  0xe0   :  { %v650_v32 = vmax.f32 %v495_v28, 0.0  ;;  %v48_v28 = vld [vmem:[%s4445_s0 + $0x100] sm:$0xff] }
  0xe1   :  { %v3421_v37 = vpack.c.bf16 %v649_v30, %v647_v29  ;;  %v49_v29 = vld [vmem:[%s4445_s0 + $0x108] sm:$0xff] }
  0xe2   :  { %v3423_v38 = vpack.c.bf16 %v650_v32, %v648_v31  ;;  %v96_v32 = vpack.c.bf16 %v49_v29, %v48_v28 }
  0xe3   :  { %1014 = vmatmul.bf16.gmra.mxu2 %v3421_v37 }
  0xe4   :  { %1183 = vmatmul.bf16.gmra.mxu3 %v3423_v38  ;;  %v328_v40 = vpop.f32.mrf.mxu0 }
  0xe5   :  { %v497_v42 = vpop.f32.mrf.mxu1  ;;  %v329_v51 = vadd.f32 %v328_v40, %v3291_v45 }
  0xe6   :  { %v498_v52 = vadd.f32 %v497_v42, %v3294_v46 }
  0xe7   :  { %2582 = vmatmul.msk.bf16.gmra.mxu0 %vm192_vm0, %v94_v39  ;;  %v651_v57 = vmax.f32 %v329_v51, 0.0 }
  0xe8   :  { %2614 = vmatmul.msk.bf16.gmra.mxu1 %vm192_vm0, %v94_v39  ;;  %v652_v61 = vmax.f32 %v498_v52, 0.0  ;;  %v50_v52 = vld [vmem:[%s4445_s0 + $0x110] sm:$0xff] }
  0xec   :  { %v330_v53 = vpop.f32.mrf.mxu0 }
  0xed   :  { %v331_v54 = vadd.f32 %v330_v53, %v3291_v45  ;;  %v499_v55 = vpop.f32.mrf.mxu1  ;;  %v51_v53 = vld [vmem:[%s4445_s0 + $0x118] sm:$0xff] }
  0xee   :  { %v500_v56 = vadd.f32 %v499_v55, %v3294_v46 }
  0xef   :  { %v653_v58 = vmax.f32 %v331_v54, 0.0 }
  0xf0   :  { %v654_v62 = vmax.f32 %v500_v56, 0.0  ;;  %v3505_v56 = vperm.slane %v3285_v41, 1 }
  0xf1   :  { %v3451_v3 = vpack.c.bf16 %v653_v58, %v651_v57  ;;  %v97_v57 = vpack.c.bf16 %v51_v53, %v50_v52  ;;  %v2846_v52 = vld [vmem:[%s4446_s1 + $0xb4] sm:$0xf]  ;;  %v2716_v53 = vld [vmem:[%s4446_s1 + $0xb8] sm:$0xf0] }
  0xf2   :  { %v3453_v4 = vpack.c.bf16 %v654_v62, %v652_v61 }
  0xf3   :  { %1019 = vmatmul.bf16.gmra.mxu2 %v3451_v3 }
  0xf4   :  { %1188 = vmatmul.bf16.gmra.mxu3 %v3453_v4  ;;  %v333_v6 = vpop.f32.mrf.mxu0 }
  0xf5   :  { %v502_v9 = vpop.f32.mrf.mxu1  ;;  %v334_v16 = vadd.f32 %v333_v6, %v3291_v45 }
  0xf6   :  { %v503_v17 = vadd.f32 %v502_v9, %v3294_v46 }
  0xf7   :  { %2583 = vmatmul.msk.bf16.gmra.mxu0 %vm192_vm0, %v95_v5  ;;  %v655_v24 = vmax.f32 %v334_v16, 0.0 }
  0xf8   :  { %2615 = vmatmul.msk.bf16.gmra.mxu1 %vm192_vm0, %v95_v5  ;;  %v656_v26 = vmax.f32 %v503_v17, 0.0 }
  0xfc   :  { %v335_v20 = vpop.f32.mrf.mxu0 }
  0xfd   :  { %v336_v21 = vadd.f32 %v335_v20, %v3291_v45  ;;  %v504_v22 = vpop.f32.mrf.mxu1 }
  0xfe   :  { %v505_v23 = vadd.f32 %v504_v22, %v3294_v46  ;;  %v52_v22 = vld [vmem:[%s4445_s0 + $0x120] sm:$0xff] }
  0xff   :  { %v657_v25 = vmax.f32 %v336_v21, 0.0 }
 0x100   :  { %v658_v27 = vmax.f32 %v505_v23, 0.0  ;;  %v53_v23 = vld [vmem:[%s4445_s0 + $0x128] sm:$0xff] }
 0x101   :  { %v3481_v30 = vpack.c.bf16 %v657_v25, %v655_v24  ;;  %v98_v29 = vpack.c.bf16 %v53_v23, %v52_v22  ;;  %v2778_v22 = vld [vmem:[%s4446_s1 + $0x150] sm:$0xf]  ;;  %v2862_v23 = vld [vmem:[%s4446_s1 + $0x154] sm:$0xf0] }
 0x102   :  { %v3483_v31 = vpack.c.bf16 %v658_v27, %v656_v26 }
 0x103   :  { %1024 = vmatmul.bf16.gmra.mxu2 %v3481_v30 }
 0x104   :  { %1193 = vmatmul.bf16.gmra.mxu3 %v3483_v31  ;;  %v338_v33 = vpop.f32.mrf.mxu0 }
 0x105   :  { %v507_v34 = vpop.f32.mrf.mxu1  ;;  %v339_v39 = vadd.f32 %v338_v33, %v3291_v45 }
 0x106   :  { %v508_v40 = vadd.f32 %v507_v34, %v3294_v46 }
 0x107   :  { %2584 = vmatmul.msk.bf16.gmra.mxu0 %vm192_vm0, %v96_v32  ;;  %v659_v48 = vmax.f32 %v339_v39, 0.0 }
 0x108   :  { %2616 = vmatmul.msk.bf16.gmra.mxu1 %vm192_vm0, %v96_v32  ;;  %v660_v50 = vmax.f32 %v508_v40, 0.0 }
 0x10c   :  { %v340_v42 = vpop.f32.mrf.mxu0 }
 0x10d   :  { %v341_v43 = vadd.f32 %v340_v42, %v3291_v45  ;;  %v509_v44 = vpop.f32.mrf.mxu1 }
 0x10e   :  { %v510_v47 = vadd.f32 %v509_v44, %v3294_v46 }
 0x10f   :  { %v661_v49 = vmax.f32 %v341_v43, 0.0 }
 0x110   :  { %v662_v51 = vmax.f32 %v510_v47, 0.0  ;;  %v2830_v47 = vld [vmem:[%s4446_s1 + $0x34] sm:$0xf] }
 0x111   :  { %v3499_v54 = vpack.c.bf16 %v661_v49, %v659_v48  ;;  %v2652_v48 = vld [vmem:[%s4446_s1 + $0x38] sm:$0xf0] }
 0x112   :  { %v3501_v55 = vpack.c.bf16 %v662_v51, %v660_v50  ;;  %v2655_v51 = vor.u32 %v2830_v47, %v2652_v48 }
 0x113   :  { %1029 = vmatmul.bf16.gmra.mxu2 %v3499_v54 }
 0x114   :  { %1198 = vmatmul.bf16.gmra.mxu3 %v3501_v55  ;;  %v343_v58 = vpop.f32.mrf.mxu0  ;;  %1324 = vmatpush.bf16.msrb.mxu0 %v2655_v51 }
 0x115   :  { %v512_v61 = vpop.f32.mrf.mxu1  ;;  %v344_v6 = vadd.f32 %v343_v58, %v3291_v45 }
 0x116   :  { %v990_v62 = vpop.f32.mrf.mxu2  ;;  %v513_v7 = vadd.f32 %v512_v61, %v3294_v46  ;;  %v2719_v61 = vor.u32 %v2846_v52, %v2716_v53 }
 0x117   :  { %v991_v1 = vadd.f32 %v990_v62, %v3505_v56  ;;  %v1159_v2 = vpop.f32.mrf.mxu3  ;;  %2585 = vmatmul.msk.bf16.gmra.mxu0 %vm192_vm0, %v97_v57  ;;  %v663_v14 = vmax.f32 %v344_v6, 0.0 }
 0x118   :  { %2617 = vmatmul.msk.bf16.gmra.mxu1 %vm192_vm0, %v97_v57  ;;  %v664_v20 = vmax.f32 %v513_v7, 0.0 }
 0x119   :  { %v1160_v5 = vadd.f32 %v1159_v2, %v991_v1  ;;  %1493 = vmatpush.bf16.msrb.mxu1 %v2719_v61 }
 0x11b   :  { %v1657_v27 = vmax.f32 %v1160_v5, 0.0 }
 0x11c   :  { %v345_v41 = vpop.f32.mrf.mxu0 }
 0x11d   :  { %v346_v8 = vadd.f32 %v345_v41, %v3291_v45  ;;  %v514_v9 = vpop.f32.mrf.mxu1 }
 0x11e   :  { %v515_v10 = vadd.f32 %v514_v9, %v3294_v46  ;;  %v992_v11 = vpop.f32.mrf.mxu2  ;;  %v54_v9 = vld [vmem:[%s4445_s0 + $0x130] sm:$0xff] }
 0x11f   :  { %v665_v15 = vmax.f32 %v346_v8, 0.0  ;;  %v993_v16 = vadd.f32 %v992_v11, %v3505_v56  ;;  %v1161_v17 = vpop.f32.mrf.mxu3 }
 0x120   :  { %v666_v21 = vmax.f32 %v515_v10, 0.0  ;;  %v55_v10 = vld [vmem:[%s4445_s0 + $0x138] sm:$0xff] }
 0x121   :  { %v1162_v24 = vadd.f32 %v1161_v17, %v993_v16  ;;  %v3522_v25 = vpack.c.bf16 %v665_v15, %v663_v14 }
 0x122   :  { %v3524_v26 = vpack.c.bf16 %v666_v21, %v664_v20  ;;  %v99_v20 = vpack.c.bf16 %v55_v10, %v54_v9 }
 0x123   :  { %v1659_v28 = vmax.f32 %v1162_v24, 0.0  ;;  %1034 = vmatmul.bf16.gmra.mxu2 %v3522_v25 }
 0x124   :  { %1203 = vmatmul.bf16.gmra.mxu3 %v3524_v26  ;;  %v348_v32 = vpop.f32.mrf.mxu0 }
 0x125   :  { %v3528_v33 = vpack.c.bf16 %v1659_v28, %v1657_v27  ;;  %v517_v34 = vpop.f32.mrf.mxu1  ;;  %v349_v44 = vadd.f32 %v348_v32, %v3291_v45  ;;  %v2779_v27 = vor.u32 %v2862_v23, %v2778_v22 }
 0x126   :  { %v995_v39 = vpop.f32.mrf.mxu2  ;;  %v518_v49 = vadd.f32 %v517_v34, %v3294_v46 }
 0x127   :  { %v996_v40 = vadd.f32 %v995_v39, %v3505_v56  ;;  %v1164_v42 = vpop.f32.mrf.mxu3  ;;  %2586 = vmatmul.msk.bf16.gmra.mxu0 %vm192_vm0, %v98_v29  ;;  %v667_v2 = vmax.f32 %v349_v44, 0.0  ;;  %1949 = vmatpush.bf16.msrb.mxu2 %v2779_v27  ;;  %v2810_v39 = vld [vmem:[%s4446_s1 + $0x1d0] sm:$0xf] }
 0x128   :  { %2618 = vmatmul.msk.bf16.gmra.mxu1 %vm192_vm0, %v98_v29  ;;  %v668_v41 = vmax.f32 %v518_v49, 0.0 }
 0x129   :  { %v1165_v43 = vadd.f32 %v1164_v42, %v996_v40  ;;  %v2870_v40 = vld [vmem:[%s4446_s1 + $0x1d4] sm:$0xf0] }
 0x12b   :  { %v1661_v16 = vmax.f32 %v1165_v43, 0.0  ;;  %v2811_v43 = vor.u32 %v2870_v40, %v2810_v39 }
 0x12c   :  { %v350_v50 = vpop.f32.mrf.mxu0 }
 0x12d   :  { %v351_v57 = vadd.f32 %v350_v50, %v3291_v45  ;;  %v519_v58 = vpop.f32.mrf.mxu1  ;;  %2118 = vmatpush.bf16.msrb.mxu3 %v2811_v43 }
 0x12e   :  { %v520_v62 = vadd.f32 %v519_v58, %v3294_v46  ;;  %v997_v1 = vpop.f32.mrf.mxu2 }
 0x12f   :  { %v669_v5 = vmax.f32 %v351_v57, 0.0  ;;  %v998_v6 = vadd.f32 %v997_v1, %v3505_v56  ;;  %v1166_v7 = vpop.f32.mrf.mxu3 }
 0x130   :  { %v670_v8 = vmax.f32 %v520_v62, 0.0 }
 0x131   :  { %v1167_v11 = vadd.f32 %v1166_v7, %v998_v6  ;;  %v3556_v14 = vpack.c.bf16 %v669_v5, %v667_v2  ;;  %v56_v2 = vld [vmem:[%s4445_s0 + $0x140] sm:$0xff]  ;;  %v57_v5 = vld [vmem:[%s4445_s0 + $0x148] sm:$0xff] }
 0x132   :  { %v3558_v15 = vpack.c.bf16 %v670_v8, %v668_v41  ;;  %v100_v10 = vpack.c.bf16 %v57_v5, %v56_v2 }
 0x133   :  { %v1663_v17 = vmax.f32 %v1167_v11, 0.0  ;;  %1039 = vmatmul.bf16.gmra.mxu2 %v3556_v14 }
 0x134   :  { %1208 = vmatmul.bf16.gmra.mxu3 %v3558_v15  ;;  %v353_v21 = vpop.f32.mrf.mxu0 }
 0x135   :  { %v522_v24 = vpop.f32.mrf.mxu1  ;;  %v3568_v28 = vpack.c.bf16 %v1663_v17, %v1661_v16  ;;  %v354_v44 = vadd.f32 %v353_v21, %v3291_v45 }
 0x136   :  { %v1000_v29 = vpop.f32.mrf.mxu2  ;;  %v523_v47 = vadd.f32 %v522_v24, %v3294_v46 }
 0x137   :  { %v1001_v32 = vadd.f32 %v1000_v29, %v3505_v56  ;;  %v1169_v34 = vpop.f32.mrf.mxu3  ;;  %2587 = vmatmul.msk.bf16.gmra.mxu0 %vm192_vm0, %v99_v20  ;;  %v671_v53 = vmax.f32 %v354_v44, 0.0 }
 0x138   :  { %2619 = vmatmul.msk.bf16.gmra.mxu1 %vm192_vm0, %v99_v20  ;;  %v672_v62 = vmax.f32 %v523_v47, 0.0 }
 0x139   :  { %v1170_v42 = vadd.f32 %v1169_v34, %v1001_v32 }
 0x13b   :  { %v1665_v8 = vmax.f32 %v1170_v42, 0.0 }
 0x13c   :  { %v355_v48 = vpop.f32.mrf.mxu0 }
 0x13d   :  { %v356_v49 = vadd.f32 %v355_v48, %v3291_v45  ;;  %v524_v50 = vpop.f32.mrf.mxu1 }
 0x13e   :  { %v525_v51 = vadd.f32 %v524_v50, %v3294_v46  ;;  %v1002_v52 = vpop.f32.mrf.mxu2  ;;  %v58_v50 = vld [vmem:[%s4445_s0 + $0x150] sm:$0xff] }
 0x13f   :  { %v673_v57 = vmax.f32 %v356_v49, 0.0  ;;  %v1003_v58 = vadd.f32 %v1002_v52, %v3505_v56  ;;  %v1171_v61 = vpop.f32.mrf.mxu3 }
 0x140   :  { %v674_v1 = vmax.f32 %v525_v51, 0.0  ;;  %v59_v51 = vld [vmem:[%s4445_s0 + $0x158] sm:$0xff] }
 0x141   :  { %v1172_v6 = vadd.f32 %v1171_v61, %v1003_v58  ;;  %v3590_v7 = vpack.c.bf16 %v673_v57, %v671_v53 }
 0x142   :  { %v3592_v41 = vpack.c.bf16 %v674_v1, %v672_v62  ;;  %v101_v62 = vpack.c.bf16 %v59_v51, %v58_v50 }
 0x143   :  { %v1667_v9 = vmax.f32 %v1172_v6, 0.0  ;;  %1044 = vmatmul.bf16.gmra.mxu2 %v3590_v7 }
 0x144   :  { %1213 = vmatmul.bf16.gmra.mxu3 %v3592_v41  ;;  %v358_v11 = vpop.f32.mrf.mxu0 }
 0x145   :  { %v527_v16 = vpop.f32.mrf.mxu1  ;;  %v3596_v17 = vpack.c.bf16 %v1667_v9, %v1665_v8  ;;  %v359_v24 = vadd.f32 %v358_v11, %v3291_v45 }
 0x146   :  { %v1005_v20 = vpop.f32.mrf.mxu2  ;;  %v528_v27 = vadd.f32 %v527_v16, %v3294_v46 }
 0x147   :  { %v1006_v21 = vadd.f32 %v1005_v20, %v3505_v56  ;;  %v1174_v22 = vpop.f32.mrf.mxu3  ;;  %2588 = vmatmul.msk.bf16.gmra.mxu0 %vm192_vm0, %v100_v10  ;;  %v675_v42 = vmax.f32 %v359_v24, 0.0 }
 0x148   :  { %2620 = vmatmul.msk.bf16.gmra.mxu1 %vm192_vm0, %v100_v10  ;;  %v676_v48 = vmax.f32 %v528_v27, 0.0 }
 0x149   :  { %v1175_v23 = vadd.f32 %v1174_v22, %v1006_v21 }
 0x14b   :  { %v1669_v58 = vmax.f32 %v1175_v23, 0.0 }
 0x14c   :  { %v360_v29 = vpop.f32.mrf.mxu0 }
 0x14d   :  { %v361_v32 = vadd.f32 %v360_v29, %v3291_v45  ;;  %v529_v34 = vpop.f32.mrf.mxu1 }
 0x14e   :  { %v530_v39 = vadd.f32 %v529_v34, %v3294_v46  ;;  %v1007_v40 = vpop.f32.mrf.mxu2 }
 0x14f   :  { %v677_v43 = vmax.f32 %v361_v32, 0.0  ;;  %v1008_v44 = vadd.f32 %v1007_v40, %v3505_v56  ;;  %v1176_v47 = vpop.f32.mrf.mxu3 }
 0x150   :  { %v678_v49 = vmax.f32 %v530_v39, 0.0 }
 0x151   :  { %v1177_v52 = vadd.f32 %v1176_v47, %v1008_v44  ;;  %v3612_v53 = vpack.c.bf16 %v677_v43, %v675_v42  ;;  %v60_v42 = vld [vmem:[%s4445_s0 + $0x160] sm:$0xff]  ;;  %v61_v43 = vld [vmem:[%s4445_s0 + $0x168] sm:$0xff] }
 0x152   :  { %v3614_v57 = vpack.c.bf16 %v678_v49, %v676_v48  ;;  %v102_v51 = vpack.c.bf16 %v61_v43, %v60_v42 }
 0x153   :  { %v1671_v61 = vmax.f32 %v1177_v52, 0.0  ;;  %1049 = vmatmul.bf16.gmra.mxu2 %v3612_v53 }
 0x154   :  { %1218 = vmatmul.bf16.gmra.mxu3 %v3614_v57  ;;  %v363_v1 = vpop.f32.mrf.mxu0 }
 0x155   :  { %v532_v2 = vpop.f32.mrf.mxu1  ;;  %v3618_v5 = vpack.c.bf16 %v1671_v61, %v1669_v58  ;;  %v364_v11 = vadd.f32 %v363_v1, %v3291_v45 }
 0x156   :  { %v1010_v6 = vpop.f32.mrf.mxu2  ;;  %v533_v16 = vadd.f32 %v532_v2, %v3294_v46 }
 0x157   :  { %v1011_v8 = vadd.f32 %v1010_v6, %v3505_v56  ;;  %v1179_v9 = vpop.f32.mrf.mxu3  ;;  %2589 = vmatmul.msk.bf16.gmra.mxu0 %vm192_vm0, %v101_v62  ;;  %v679_v27 = vmax.f32 %v364_v11, 0.0 }
 0x158   :  { %2621 = vmatmul.msk.bf16.gmra.mxu1 %vm192_vm0, %v101_v62  ;;  %v680_v39 = vmax.f32 %v533_v16, 0.0 }
 0x159   :  { %v1180_v10 = vadd.f32 %v1179_v9, %v1011_v8  ;;  %v2828_v9 = vld [vmem:[%s4446_s1 + $0x24] sm:$0xf] }
 0x15b   :  { %v1673_v49 = vmax.f32 %v1180_v10, 0.0  ;;  %v2644_v10 = vld [vmem:[%s4446_s1 + $0x28] sm:$0xf0] }
 0x15c   :  { %v365_v20 = vpop.f32.mrf.mxu0 }
 0x15d   :  { %v366_v21 = vadd.f32 %v365_v20, %v3291_v45  ;;  %v534_v22 = vpop.f32.mrf.mxu1  ;;  %v2647_v20 = vor.u32 %v2828_v9, %v2644_v10  ;;  %v2774_v9 = vld [vmem:[%s4446_s1 + $0x140] sm:$0xf]  ;;  %v2861_v10 = vld [vmem:[%s4446_s1 + $0x144] sm:$0xf0] }
 0x15e   :  { %v535_v23 = vadd.f32 %v534_v22, %v3294_v46  ;;  %v1012_v24 = vpop.f32.mrf.mxu2  ;;  %v2708_v22 = vld [vmem:[%s4446_s1 + $0xa8] sm:$0xf0] }
 0x15f   :  { %v681_v29 = vmax.f32 %v366_v21, 0.0  ;;  %v1013_v32 = vadd.f32 %v1012_v24, %v3505_v56  ;;  %v1181_v34 = vpop.f32.mrf.mxu3  ;;  %v2844_v21 = vld [vmem:[%s4446_s1 + $0xa4] sm:$0xf]  ;;  %1325 = vmatpush.bf16.msrb.mxu0 %v2647_v20 }
 0x160   :  { %v682_v40 = vmax.f32 %v535_v23, 0.0 }
 0x161   :  { %v1182_v44 = vadd.f32 %v1181_v34, %v1013_v32  ;;  %v3634_v47 = vpack.c.bf16 %v681_v29, %v679_v27  ;;  %v2711_v27 = vor.u32 %v2844_v21, %v2708_v22 }
 0x162   :  { %v3636_v48 = vpack.c.bf16 %v682_v40, %v680_v39 }
 0x163   :  { %v1675_v50 = vmax.f32 %v1182_v44, 0.0  ;;  %1054 = vmatmul.bf16.gmra.mxu2 %v3634_v47  ;;  %1494 = vmatpush.bf16.msrb.mxu1 %v2711_v27 }
 0x164   :  { %1223 = vmatmul.bf16.gmra.mxu3 %v3636_v48  ;;  %v368_v52 = vpop.f32.mrf.mxu0 }
 0x165   :  { %v537_v58 = vpop.f32.mrf.mxu1  ;;  %v3640_v61 = vpack.c.bf16 %v1675_v50, %v1673_v49  ;;  %v369_v8 = vadd.f32 %v368_v52, %v3291_v45  ;;  %v62_v49 = vld [vmem:[%s4445_s0 + $0x170] sm:$0xff]  ;;  %v63_v50 = vld [vmem:[%s4445_s0 + $0x178] sm:$0xff] }
 0x166   :  { %v1015_v62 = vpop.f32.mrf.mxu2  ;;  %v538_v11 = vadd.f32 %v537_v58, %v3294_v46 }
 0x167   :  { %v1016_v1 = vadd.f32 %v1015_v62, %v3505_v56  ;;  %v1184_v2 = vpop.f32.mrf.mxu3  ;;  %2590 = vmatmul.msk.bf16.gmra.mxu0 %vm192_vm0, %v102_v51  ;;  %v683_v34 = vmax.f32 %v369_v8, 0.0 }
 0x168   :  { %2622 = vmatmul.msk.bf16.gmra.mxu1 %vm192_vm0, %v102_v51  ;;  %v684_v43 = vmax.f32 %v538_v11, 0.0 }
 0x169   :  { %v1185_v6 = vadd.f32 %v1184_v2, %v1016_v1  ;;  %v103_v2 = vpack.c.bf16 %v63_v50, %v62_v49 }
 0x16b   :  { %v1677_v62 = vmax.f32 %v1185_v6, 0.0 }
 0x16c   :  { %v370_v16 = vpop.f32.mrf.mxu0 }
 0x16d   :  { %v371_v23 = vadd.f32 %v370_v16, %v3291_v45  ;;  %v539_v24 = vpop.f32.mrf.mxu1  ;;  %v2775_v16 = vor.u32 %v2861_v10, %v2774_v9  ;;  %v65_v9 = vld [vmem:[%s4445_s0 + $0x188] sm:$0xff] }
 0x16e   :  { %v540_v29 = vadd.f32 %v539_v24, %v3294_v46  ;;  %v1017_v32 = vpop.f32.mrf.mxu2  ;;  %v2869_v24 = vld [vmem:[%s4446_s1 + $0x1c4] sm:$0xf0] }
 0x16f   :  { %v685_v39 = vmax.f32 %v371_v23, 0.0  ;;  %v1018_v40 = vadd.f32 %v1017_v32, %v3505_v56  ;;  %v1186_v42 = vpop.f32.mrf.mxu3  ;;  %1950 = vmatpush.bf16.msrb.mxu2 %v2775_v16  ;;  %v2806_v23 = vld [vmem:[%s4446_s1 + $0x1c0] sm:$0xf] }
 0x170   :  { %v686_v44 = vmax.f32 %v540_v29, 0.0  ;;  %v2807_v29 = vor.u32 %v2869_v24, %v2806_v23 }
 0x171   :  { %v1187_v51 = vadd.f32 %v1186_v42, %v1018_v40  ;;  %v3668_v52 = vpack.c.bf16 %v685_v39, %v683_v34 }
 0x172   :  { %v3670_v58 = vpack.c.bf16 %v686_v44, %v684_v43  ;;  %2119 = vmatpush.bf16.msrb.mxu3 %v2807_v29 }
 0x173   :  { %v1679_v1 = vmax.f32 %v1187_v51, 0.0  ;;  %1059 = vmatmul.bf16.gmra.mxu2 %v3668_v52 }
 0x174   :  { %1228 = vmatmul.bf16.gmra.mxu3 %v3670_v58  ;;  %v373_v8 = vpop.f32.mrf.mxu0 }
 0x175   :  { %v542_v11 = vpop.f32.mrf.mxu1  ;;  %v3680_v20 = vpack.c.bf16 %v1679_v1, %v1677_v62  ;;  %v374_v32 = vadd.f32 %v373_v8, %v3291_v45  ;;  %v64_v8 = vld [vmem:[%s4445_s0 + $0x180] sm:$0xff] }
 0x176   :  { %v1020_v6 = vpop.f32.mrf.mxu2  ;;  %v543_v34 = vadd.f32 %v542_v11, %v3294_v46 }
 0x177   :  { %v1021_v21 = vadd.f32 %v1020_v6, %v3505_v56  ;;  %v1189_v22 = vpop.f32.mrf.mxu3  ;;  %2591 = vmatmul.msk.bf16.gmra.mxu0 %vm192_vm0, %v103_v2  ;;  %v687_v49 = vmax.f32 %v374_v32, 0.0 }
 0x178   :  { %2623 = vmatmul.msk.bf16.gmra.mxu1 %vm192_vm0, %v103_v2  ;;  %v688_v1 = vmax.f32 %v543_v34, 0.0 }
 0x179   :  { %v1190_v27 = vadd.f32 %v1189_v22, %v1021_v21  ;;  %v104_v22 = vpack.c.bf16 %v65_v9, %v64_v8 }
 0x17b   :  { %v1681_v6 = vmax.f32 %v1190_v27, 0.0 }
 0x17c   :  { %v375_v39 = vpop.f32.mrf.mxu0 }
 0x17d   :  { %v376_v40 = vadd.f32 %v375_v39, %v3291_v45  ;;  %v544_v42 = vpop.f32.mrf.mxu1 }
 0x17e   :  { %v545_v43 = vadd.f32 %v544_v42, %v3294_v46  ;;  %v1022_v44 = vpop.f32.mrf.mxu2 }
 0x17f   :  { %v689_v50 = vmax.f32 %v376_v40, 0.0  ;;  %v1023_v51 = vadd.f32 %v1022_v44, %v3505_v56  ;;  %v1191_v62 = vpop.f32.mrf.mxu3 }
 0x180   :  { %v690_v2 = vmax.f32 %v545_v43, 0.0 }
 0x181   :  { %v1192_v10 = vadd.f32 %v1191_v62, %v1023_v51  ;;  %v3702_v11 = vpack.c.bf16 %v689_v50, %v687_v49 }
 0x182   :  { %v3704_v16 = vpack.c.bf16 %v690_v2, %v688_v1 }
 0x183   :  { %v1683_v21 = vmax.f32 %v1192_v10, 0.0  ;;  %1064 = vmatmul.bf16.gmra.mxu2 %v3702_v11 }
 0x184   :  { %1233 = vmatmul.bf16.gmra.mxu3 %v3704_v16  ;;  %v378_v23 = vpop.f32.mrf.mxu0 }
 0x185   :  { %v547_v24 = vpop.f32.mrf.mxu1  ;;  %v3708_v29 = vpack.c.bf16 %v1683_v21, %v1681_v6  ;;  %v379_v27 = vadd.f32 %v378_v23, %v3291_v45  ;;  %v66_v6 = vld [vmem:[%s4445_s0 + $0x190] sm:$0xff]  ;;  %v67_v21 = vld [vmem:[%s4445_s0 + $0x198] sm:$0xff] }
 0x186   :  { %v1025_v32 = vpop.f32.mrf.mxu2  ;;  %v548_v42 = vadd.f32 %v547_v24, %v3294_v46 }
 0x187   :  { %v1026_v34 = vadd.f32 %v1025_v32, %v3505_v56  ;;  %v1194_v39 = vpop.f32.mrf.mxu3  ;;  %2592 = vmatmul.msk.bf16.gmra.mxu0 %vm192_vm0, %v104_v22  ;;  %v691_v62 = vmax.f32 %v379_v27, 0.0 }
 0x188   :  { %2624 = vmatmul.msk.bf16.gmra.mxu1 %vm192_vm0, %v104_v22  ;;  %v692_v9 = vmax.f32 %v548_v42, 0.0 }
 0x189   :  { %v1195_v40 = vadd.f32 %v1194_v39, %v1026_v34  ;;  %v105_v39 = vpack.c.bf16 %v67_v21, %v66_v6 }
 0x18b   :  { %v1685_v32 = vmax.f32 %v1195_v40, 0.0 }
 0x18c   :  { %v380_v43 = vpop.f32.mrf.mxu0 }
 0x18d   :  { %v381_v44 = vadd.f32 %v380_v43, %v3291_v45  ;;  %v549_v49 = vpop.f32.mrf.mxu1 }
 0x18e   :  { %v550_v50 = vadd.f32 %v549_v49, %v3294_v46  ;;  %v1027_v51 = vpop.f32.mrf.mxu2 }
 0x18f   :  { %v693_v1 = vmax.f32 %v381_v44, 0.0  ;;  %v1028_v2 = vadd.f32 %v1027_v51, %v3505_v56  ;;  %v1196_v8 = vpop.f32.mrf.mxu3 }
 0x190   :  { %v694_v10 = vmax.f32 %v550_v50, 0.0 }
 0x191   :  { %v1197_v22 = vadd.f32 %v1196_v8, %v1028_v2  ;;  %v3724_v23 = vpack.c.bf16 %v693_v1, %v691_v62 }
 0x192   :  { %v3726_v24 = vpack.c.bf16 %v694_v10, %v692_v9 }
 0x193   :  { %4472 = vst [vmem:[#allocation5_spill] sm:$0xff] %v3724_v23  ;;  %v1687_v34 = vmax.f32 %v1197_v22, 0.0  ;;  %1069 = vmatmul.bf16.gmra.mxu2 %v3724_v23 }
 0x194   :  { %4473 = vst [vmem:[#allocation6_spill] sm:$0xff] %v3726_v24  ;;  %1238 = vmatmul.bf16.gmra.mxu3 %v3726_v24  ;;  %v383_v27 = vpop.f32.mrf.mxu0 }
 0x195   :  { %v552_v42 = vpop.f32.mrf.mxu1  ;;  %v3730_v43 = vpack.c.bf16 %v1687_v34, %v1685_v32  ;;  %v384_v40 = vadd.f32 %v383_v27, %v3291_v45  ;;  %v69_v27 = vld [vmem:[%s4445_s0 + $0x1a8] sm:$0xff] }
 0x196   :  { %v1030_v44 = vpop.f32.mrf.mxu2  ;;  %v553_v62 = vadd.f32 %v552_v42, %v3294_v46 }
 0x197   :  { %v1031_v49 = vadd.f32 %v1030_v44, %v3505_v56  ;;  %v1199_v50 = vpop.f32.mrf.mxu3  ;;  %2593 = vmatmul.msk.bf16.gmra.mxu0 %vm192_vm0, %v105_v39  ;;  %v695_v6 = vmax.f32 %v384_v40, 0.0 }
 0x198   :  { %2625 = vmatmul.msk.bf16.gmra.mxu1 %vm192_vm0, %v105_v39  ;;  %v696_v34 = vmax.f32 %v553_v62, 0.0  ;;  %v68_v39 = vld [vmem:[%s4445_s0 + $0x1a0] sm:$0xff] }
 0x199   :  { %v1200_v51 = vadd.f32 %v1199_v50, %v1031_v49 }
 0x19b   :  { %v1689_v40 = vmax.f32 %v1200_v51, 0.0 }
 0x19c   :  { %v385_v1 = vpop.f32.mrf.mxu0 }
 0x19d   :  { %v386_v2 = vadd.f32 %v385_v1, %v3291_v45  ;;  %v554_v8 = vpop.f32.mrf.mxu1 }
 0x19e   :  { %v555_v9 = vadd.f32 %v554_v8, %v3294_v46  ;;  %v1032_v10 = vpop.f32.mrf.mxu2 }
 0x19f   :  { %v697_v21 = vmax.f32 %v386_v2, 0.0  ;;  %v1033_v22 = vadd.f32 %v1032_v10, %v3505_v56  ;;  %v1201_v32 = vpop.f32.mrf.mxu3  ;;  %v106_v2 = vpack.c.bf16 %v69_v27, %v68_v39  ;;  %v2842_v39 = vld [vmem:[%s4446_s1 + $0x94] sm:$0xf] }
 0x1a0   :  { %v698_v44 = vmax.f32 %v555_v9, 0.0 }
 0x1a1   :  { %v1202_v42 = vadd.f32 %v1201_v32, %v1033_v22  ;;  %v3746_v49 = vpack.c.bf16 %v697_v21, %v695_v6  ;;  %v2826_v21 = vld [vmem:[%s4446_s1 + $0x14] sm:$0xf]  ;;  %v2636_v22 = vld [vmem:[%s4446_s1 + $0x18] sm:$0xf0] }
 0x1a2   :  { %v3748_v50 = vpack.c.bf16 %v698_v44, %v696_v34  ;;  %v2639_v44 = vor.u32 %v2826_v21, %v2636_v22 }
 0x1a3   :  { %4474 = vst [vmem:[#allocation7_spill] sm:$0xff] %v3746_v49  ;;  %v1691_v1 = vmax.f32 %v1202_v42, 0.0  ;;  %1074 = vmatmul.bf16.gmra.mxu2 %v3746_v49 }
 0x1a4   :  { %4475 = vst [vmem:[#allocation8_spill] sm:$0xff] %v3748_v50  ;;  %1243 = vmatmul.bf16.gmra.mxu3 %v3748_v50  ;;  %v388_v62 = vpop.f32.mrf.mxu0  ;;  %1326 = vmatpush.bf16.msrb.mxu0 %v2639_v44  ;;  %v70_v50 = vld [vmem:[%s4445_s0 + $0x1b0] sm:$0xff] }
 0x1a5   :  { %v557_v8 = vpop.f32.mrf.mxu1  ;;  %v3752_v9 = vpack.c.bf16 %v1691_v1, %v1689_v40  ;;  %v389_v51 = vadd.f32 %v388_v62, %v3291_v45 }
 0x1a6   :  { %v1035_v10 = vpop.f32.mrf.mxu2  ;;  %v558_v32 = vadd.f32 %v557_v8, %v3294_v46 }
 0x1a7   :  { %4476 = vst [vmem:[#allocation9_spill] sm:$0xff] %v3752_v9  ;;  %v1036_v24 = vadd.f32 %v1035_v10, %v3505_v56  ;;  %v1204_v23 = vpop.f32.mrf.mxu3  ;;  %2594 = vmatmul.msk.bf16.gmra.mxu0 %vm192_vm0, %v106_v2 }
 0x1a8   :  { %2626 = vmatmul.msk.bf16.gmra.mxu1 %vm192_vm0, %v106_v2  ;;  %v699_v2 = vmax.f32 %v389_v51, 0.0  ;;  %v700_v21 = vmax.f32 %v558_v32, 0.0 }
 0x1a9   :  { %v1205_v6 = vadd.f32 %v1204_v23, %v1036_v24  ;;  %v2700_v23 = vld [vmem:[%s4446_s1 + $0x98] sm:$0xf0] }
 0x1aa   :  { %v2703_v42 = vor.u32 %v2842_v39, %v2700_v23 }
 0x1ab   :  { %v1693_v51 = vmax.f32 %v1205_v6, 0.0 }
 0x1ac   :  { %v390_v34 = vpop.f32.mrf.mxu0  ;;  %1495 = vmatpush.bf16.msrb.mxu1 %v2703_v42  ;;  %v2770_v42 = vld [vmem:[%s4446_s1 + $0x130] sm:$0xf] }
 0x1ad   :  { %v391_v24 = vadd.f32 %v390_v34, %v3291_v45  ;;  %v559_v27 = vpop.f32.mrf.mxu1  ;;  %v71_v34 = vld [vmem:[%s4445_s0 + $0x1b8] sm:$0xff] }
 0x1ae   :  { %v560_v40 = vadd.f32 %v559_v27, %v3294_v46  ;;  %v1037_v1 = vpop.f32.mrf.mxu2  ;;  %v107_v27 = vpack.c.bf16 %v71_v34, %v70_v50  ;;  %v2802_v50 = vld [vmem:[%s4446_s1 + $0x1b0] sm:$0xf] }
 0x1af   :  { %v701_v62 = vmax.f32 %v391_v24, 0.0  ;;  %v1038_v8 = vadd.f32 %v1037_v1, %v3505_v56  ;;  %v1206_v10 = vpop.f32.mrf.mxu3 }
 0x1b0   :  { %v702_v22 = vmax.f32 %v560_v40, 0.0  ;;  %v2860_v40 = vld [vmem:[%s4446_s1 + $0x134] sm:$0xf0] }
 0x1b1   :  { %v1207_v39 = vadd.f32 %v1206_v10, %v1038_v8  ;;  %v3780_v23 = vpack.c.bf16 %v701_v62, %v699_v2  ;;  %v2771_v2 = vor.u32 %v2860_v40, %v2770_v42 }
 0x1b2   :  { %v3782_v44 = vpack.c.bf16 %v702_v22, %v700_v21  ;;  %v2868_v21 = vld [vmem:[%s4446_s1 + $0x1b4] sm:$0xf0] }
 0x1b3   :  { %4477 = vst [vmem:[#allocation10_spill] sm:$0xff] %v3780_v23  ;;  %v1695_v24 = vmax.f32 %v1207_v39, 0.0  ;;  %1079 = vmatmul.bf16.gmra.mxu2 %v3780_v23  ;;  %v2803_v34 = vor.u32 %v2868_v21, %v2802_v50 }
 0x1b4   :  { %4478 = vst [vmem:[#allocation11_spill] sm:$0xff] %v3782_v44  ;;  %1248 = vmatmul.bf16.gmra.mxu3 %v3782_v44  ;;  %v393_v32 = vpop.f32.mrf.mxu0  ;;  %1951 = vmatpush.bf16.msrb.mxu2 %v2771_v2 }
 0x1b5   :  { %v562_v1 = vpop.f32.mrf.mxu1  ;;  %v3792_v62 = vpack.c.bf16 %v1695_v24, %v1693_v51  ;;  %v394_v39 = vadd.f32 %v393_v32, %v3291_v45  ;;  %2120 = vmatpush.bf16.msrb.mxu3 %v2803_v34  ;;  %v72_v32 = vld [vmem:[%s4445_s0 + $0x1c0] sm:$0xff] }
 0x1b6   :  { %v1040_v6 = vpop.f32.mrf.mxu2  ;;  %v563_v51 = vadd.f32 %v562_v1, %v3294_v46  ;;  %v73_v1 = vld [vmem:[%s4445_s0 + $0x1c8] sm:$0xff] }
 0x1b7   :  { %4479 = vst [vmem:[#allocation12_spill] sm:$0xff] %v3792_v62  ;;  %v1041_v8 = vadd.f32 %v1040_v6, %v3505_v56  ;;  %v1209_v10 = vpop.f32.mrf.mxu3  ;;  %2595 = vmatmul.msk.bf16.gmra.mxu0 %vm192_vm0, %v107_v27  ;;  %v703_v6 = vmax.f32 %v394_v39, 0.0 }
 0x1b8   :  { %2627 = vmatmul.msk.bf16.gmra.mxu1 %vm192_vm0, %v107_v27  ;;  %v704_v49 = vmax.f32 %v563_v51, 0.0 }
 0x1b9   :  { %v1210_v22 = vadd.f32 %v1209_v10, %v1041_v8 }
 0x1bb   :  { %v1697_v34 = vmax.f32 %v1210_v22, 0.0 }
 0x1bc   :  { %v395_v24 = vpop.f32.mrf.mxu0 }
 0x1bd   :  { %v396_v42 = vadd.f32 %v395_v24, %v3291_v45  ;;  %v564_v40 = vpop.f32.mrf.mxu1  ;;  %v108_v24 = vpack.c.bf16 %v73_v1, %v72_v32 }
 0x1be   :  { %v565_v27 = vadd.f32 %v564_v40, %v3294_v46  ;;  %v1042_v2 = vpop.f32.mrf.mxu2 }
 0x1bf   :  { %v705_v44 = vmax.f32 %v396_v42, 0.0  ;;  %v1043_v23 = vadd.f32 %v1042_v2, %v3505_v56  ;;  %v1211_v62 = vpop.f32.mrf.mxu3 }
 0x1c0   :  { %v706_v8 = vmax.f32 %v565_v27, 0.0 }
 0x1c1   :  { %v1212_v10 = vadd.f32 %v1211_v62, %v1043_v23  ;;  %v3814_v50 = vpack.c.bf16 %v705_v44, %v703_v6 }
 0x1c2   :  { %v3816_v21 = vpack.c.bf16 %v706_v8, %v704_v49 }
 0x1c3   :  { %4480 = vst [vmem:[#allocation13_spill] sm:$0xff] %v3814_v50  ;;  %v1699_v39 = vmax.f32 %v1212_v10, 0.0  ;;  %1084 = vmatmul.bf16.gmra.mxu2 %v3814_v50 }
 0x1c4   :  { %4481 = vst [vmem:[#allocation14_spill] sm:$0xff] %v3816_v21  ;;  %1253 = vmatmul.bf16.gmra.mxu3 %v3816_v21  ;;  %v398_v51 = vpop.f32.mrf.mxu0 }
 0x1c5   :  { %v567_v42 = vpop.f32.mrf.mxu1  ;;  %v3820_v40 = vpack.c.bf16 %v1699_v39, %v1697_v34  ;;  %v399_v23 = vadd.f32 %v398_v51, %v3291_v45 }
 0x1c6   :  { %v1045_v27 = vpop.f32.mrf.mxu2  ;;  %v568_v44 = vadd.f32 %v567_v42, %v3294_v46 }
 0x1c7   :  { %4482 = vst [vmem:[#allocation15_spill] sm:$0xff] %v3820_v40  ;;  %v1046_v2 = vadd.f32 %v1045_v27, %v3505_v56  ;;  %v1214_v9 = vpop.f32.mrf.mxu3  ;;  %2596 = vmatmul.msk.bf16.gmra.mxu0 %vm192_vm0, %v108_v24  ;;  %v707_v1 = vmax.f32 %v399_v23, 0.0 }
 0x1c8   :  { %2628 = vmatmul.msk.bf16.gmra.mxu1 %vm192_vm0, %v108_v24  ;;  %v708_v27 = vmax.f32 %v568_v44, 0.0  ;;  %v75_v24 = vld [vmem:[%s4445_s0 + $0x1d8] sm:$0xff] }
 0x1c9   :  { %v1215_v49 = vadd.f32 %v1214_v9, %v1046_v2  ;;  %v74_v9 = vld [vmem:[%s4445_s0 + $0x1d0] sm:$0xff] }
 0x1cb   :  { %v1701_v23 = vmax.f32 %v1215_v49, 0.0 }
 0x1cc   :  { %v400_v62 = vpop.f32.mrf.mxu0 }
 0x1cd   :  { %v401_v22 = vadd.f32 %v400_v62, %v3291_v45  ;;  %v569_v6 = vpop.f32.mrf.mxu1 }
 0x1ce   :  { %v570_v8 = vadd.f32 %v569_v6, %v3294_v46  ;;  %v1047_v32 = vpop.f32.mrf.mxu2 }
 0x1cf   :  { %v709_v10 = vmax.f32 %v401_v22, 0.0  ;;  %v1048_v34 = vadd.f32 %v1047_v32, %v3505_v56  ;;  %v1216_v39 = vpop.f32.mrf.mxu3  ;;  %v109_v22 = vpack.c.bf16 %v75_v24, %v74_v9 }
 0x1d0   :  { %v710_v21 = vmax.f32 %v570_v8, 0.0 }
 0x1d1   :  { %v1217_v51 = vadd.f32 %v1216_v39, %v1048_v34  ;;  %v3836_v42 = vpack.c.bf16 %v709_v10, %v707_v1 }
 0x1d2   :  { %v3838_v2 = vpack.c.bf16 %v710_v21, %v708_v27 }
 0x1d3   :  { %4483 = vst [vmem:[#allocation16_spill] sm:$0xff] %v3836_v42  ;;  %v1703_v62 = vmax.f32 %v1217_v51, 0.0  ;;  %1089 = vmatmul.bf16.gmra.mxu2 %v3836_v42 }
 0x1d4   :  { %4484 = vst [vmem:[#allocation17_spill] sm:$0xff] %v3838_v2  ;;  %1258 = vmatmul.bf16.gmra.mxu3 %v3838_v2  ;;  %v403_v44 = vpop.f32.mrf.mxu0 }
 0x1d5   :  { %v572_v6 = vpop.f32.mrf.mxu1  ;;  %v3842_v8 = vpack.c.bf16 %v1703_v62, %v1701_v23  ;;  %v404_v49 = vadd.f32 %v403_v44, %v3291_v45 }
 0x1d6   :  { %v1050_v32 = vpop.f32.mrf.mxu2  ;;  %v573_v1 = vadd.f32 %v572_v6, %v3294_v46 }
 0x1d7   :  { %4485 = vst [vmem:[#allocation18_spill] sm:$0xff] %v3842_v8  ;;  %v1051_v50 = vadd.f32 %v1050_v32, %v3505_v56  ;;  %v1219_v40 = vpop.f32.mrf.mxu3  ;;  %2597 = vmatmul.msk.bf16.gmra.mxu0 %vm192_vm0, %v109_v22  ;;  %v711_v24 = vmax.f32 %v404_v49, 0.0 }
 0x1d8   :  { %2629 = vmatmul.msk.bf16.gmra.mxu1 %vm192_vm0, %v109_v22  ;;  %v712_v32 = vmax.f32 %v573_v1, 0.0 }
 0x1d9   :  { %v1220_v21 = vadd.f32 %v1219_v40, %v1051_v50  ;;  %v76_v50 = vld [vmem:[%s4445_s0 + $0x1e0] sm:$0xff]  ;;  %v77_v40 = vld [vmem:[%s4445_s0 + $0x1e8] sm:$0xff] }
 0x1db   :  { %v1705_v49 = vmax.f32 %v1220_v21, 0.0 }
 0x1dc   :  { %v405_v10 = vpop.f32.mrf.mxu0 }
 0x1dd   :  { %v406_v34 = vadd.f32 %v405_v10, %v3291_v45  ;;  %v574_v39 = vpop.f32.mrf.mxu1 }
 0x1de   :  { %v575_v27 = vadd.f32 %v574_v39, %v3294_v46  ;;  %v1052_v9 = vpop.f32.mrf.mxu2 }
 0x1df   :  { %v713_v51 = vmax.f32 %v406_v34, 0.0  ;;  %v1053_v23 = vadd.f32 %v1052_v9, %v3505_v56  ;;  %v1221_v62 = vpop.f32.mrf.mxu3  ;;  %v110_v34 = vpack.c.bf16 %v77_v40, %v76_v50 }
 0x1e0   :  { %v714_v2 = vmax.f32 %v575_v27, 0.0 }
 0x1e1   :  { %v1222_v22 = vadd.f32 %v1221_v62, %v1053_v23  ;;  %v3858_v44 = vpack.c.bf16 %v713_v51, %v711_v24 }
 0x1e2   :  { %v3860_v6 = vpack.c.bf16 %v714_v2, %v712_v32 }
 0x1e3   :  { %4486 = vst [vmem:[#allocation19_spill] sm:$0xff] %v3858_v44  ;;  %v1707_v10 = vmax.f32 %v1222_v22, 0.0  ;;  %1094 = vmatmul.bf16.gmra.mxu2 %v3858_v44 }
 0x1e4   :  { %4487 = vst [vmem:[#allocation20_spill] sm:$0xff] %v3860_v6  ;;  %1263 = vmatmul.bf16.gmra.mxu3 %v3860_v6  ;;  %v408_v1 = vpop.f32.mrf.mxu0 }
 0x1e5   :  { %v577_v39 = vpop.f32.mrf.mxu1  ;;  %v3864_v27 = vpack.c.bf16 %v1707_v10, %v1705_v49  ;;  %v409_v21 = vadd.f32 %v408_v1, %v3291_v45 }
 0x1e6   :  { %v1055_v9 = vpop.f32.mrf.mxu2  ;;  %v578_v24 = vadd.f32 %v577_v39, %v3294_v46 }
 0x1e7   :  { %v1056_v42 = vadd.f32 %v1055_v9, %v3505_v56  ;;  %v1224_v8 = vpop.f32.mrf.mxu3  ;;  %2598 = vmatmul.msk.bf16.gmra.mxu0 %vm192_vm0, %v110_v34  ;;  %v715_v40 = vmax.f32 %v409_v21, 0.0 }
 0x1e8   :  { %2630 = vmatmul.msk.bf16.gmra.mxu1 %vm192_vm0, %v110_v34  ;;  %v716_v9 = vmax.f32 %v578_v24, 0.0 }
 0x1e9   :  { %v1225_v2 = vadd.f32 %v1224_v8, %v1056_v42  ;;  %v78_v42 = vld [vmem:[%s4445_s0 + $0x1f0] sm:$0xff]  ;;  %v79_v8 = vld [vmem:[%s4445_s0 + $0x1f8] sm:$0xff] }
 0x1eb   :  { %v1709_v21 = vmax.f32 %v1225_v2, 0.0 }
 0x1ec   :  { %v410_v51 = vpop.f32.mrf.mxu0 }
 0x1ed   :  { %v411_v23 = vadd.f32 %v410_v51, %v3291_v45  ;;  %v579_v62 = vpop.f32.mrf.mxu1 }
 0x1ee   :  { %v580_v32 = vadd.f32 %v579_v62, %v3294_v46  ;;  %v1057_v50 = vpop.f32.mrf.mxu2  ;;  %v2766_v62 = vld [vmem:[%s4446_s1 + $0x120] sm:$0xf] }
 0x1ef   :  { %v717_v22 = vmax.f32 %v411_v23, 0.0  ;;  %v1058_v49 = vadd.f32 %v1057_v50, %v3505_v56  ;;  %v1226_v10 = vpop.f32.mrf.mxu3  ;;  %v111_v23 = vpack.c.bf16 %v79_v8, %v78_v42 }
 0x1f0   :  { %v718_v6 = vmax.f32 %v580_v32, 0.0  ;;  %v2859_v32 = vld [vmem:[%s4446_s1 + $0x124] sm:$0xf0] }
 0x1f1   :  { %v1227_v34 = vadd.f32 %v1226_v10, %v1058_v49  ;;  %v3880_v1 = vpack.c.bf16 %v717_v22, %v715_v40  ;;  %v2767_v40 = vor.u32 %v2859_v32, %v2766_v62  ;;  %v2798_v10 = vld [vmem:[%s4446_s1 + $0x1a0] sm:$0xf] }
 0x1f2   :  { %v3882_v39 = vpack.c.bf16 %v718_v6, %v716_v9  ;;  %v2867_v9 = vld [vmem:[%s4446_s1 + $0x1a4] sm:$0xf0] }
 0x1f3   :  { %4488 = vst [vmem:[#allocation21_spill] sm:$0xff] %v3880_v1  ;;  %v1711_v51 = vmax.f32 %v1227_v34, 0.0  ;;  %1099 = vmatmul.bf16.gmra.mxu2 %v3880_v1  ;;  %v2799_v8 = vor.u32 %v2867_v9, %v2798_v10 }
 0x1f4   :  { %4489 = vst [vmem:[#allocation22_spill] sm:$0xff] %v3882_v39  ;;  %1268 = vmatmul.bf16.gmra.mxu3 %v3882_v39  ;;  %v413_v24 = vpop.f32.mrf.mxu0  ;;  %1952 = vmatpush.bf16.msrb.mxu2 %v2767_v40 }
 0x1f5   :  { %v582_v50 = vpop.f32.mrf.mxu1  ;;  %v3892_v6 = vpack.c.bf16 %v1711_v51, %v1709_v21  ;;  %v414_v34 = vadd.f32 %v413_v24, %v3291_v45  ;;  %2121 = vmatpush.bf16.msrb.mxu3 %v2799_v8 }
 0x1f6   :  { %v1060_v2 = vpop.f32.mrf.mxu2  ;;  %v583_v21 = vadd.f32 %v582_v50, %v3294_v46 }
 0x1f7   :  { %4490 = vst [vmem:[#allocation23_spill] sm:$0xff] %v3892_v6  ;;  %v1061_v22 = vadd.f32 %v1060_v2, %v3505_v56  ;;  %v1229_v49 = vpop.f32.mrf.mxu3  ;;  %2599 = vmatmul.msk.bf16.gmra.mxu0 %vm192_vm0, %v111_v23  ;;  %v719_v2 = vmax.f32 %v414_v34, 0.0 }
 0x1f8   :  { %2631 = vmatmul.msk.bf16.gmra.mxu1 %vm192_vm0, %v111_v23  ;;  %v720_v44 = vmax.f32 %v583_v21, 0.0 }
 0x1f9   :  { %v1230_v42 = vadd.f32 %v1229_v49, %v1061_v22 }
 0x1fb   :  { %v1713_v50 = vmax.f32 %v1230_v42, 0.0 }
 0x1fc   :  { %v415_v51 = vpop.f32.mrf.mxu0 }
 0x1fd   :  { %v416_v62 = vadd.f32 %v415_v51, %v3291_v45  ;;  %v584_v32 = vpop.f32.mrf.mxu1 }
 0x1fe   :  { %v585_v23 = vadd.f32 %v584_v32, %v3294_v46  ;;  %v1062_v40 = vpop.f32.mrf.mxu2 }
 0x1ff   :  { %v721_v39 = vmax.f32 %v416_v62, 0.0  ;;  %v1063_v1 = vadd.f32 %v1062_v40, %v3505_v56  ;;  %v1231_v6 = vpop.f32.mrf.mxu3 }
 0x200   :  { %v722_v22 = vmax.f32 %v585_v23, 0.0 }
 0x201   :  { %v1232_v49 = vadd.f32 %v1231_v6, %v1063_v1  ;;  %v3908_v10 = vpack.c.bf16 %v721_v39, %v719_v2 }
 0x202   :  { %v3910_v24 = vpack.c.bf16 %v722_v22, %v720_v44 }
 0x203   :  { %v1715_v9 = vmax.f32 %v1232_v49, 0.0  ;;  %1104 = vmatmul.bf16.gmra.mxu2 %v3908_v10 }
 0x204   :  { %1273 = vmatmul.bf16.gmra.mxu3 %v3910_v24  ;;  %v418_v8 = vpop.f32.mrf.mxu0 }
 0x205   :  { %v587_v51 = vpop.f32.mrf.mxu1  ;;  %v3914_v34 = vpack.c.bf16 %v1715_v9, %v1713_v50  ;;  %v419_v1 = vadd.f32 %v418_v8, %v3291_v45 }
 0x206   :  { %v1065_v62 = vpop.f32.mrf.mxu2  ;;  %v588_v39 = vadd.f32 %v587_v51, %v3294_v46 }
 0x207   :  { %v1066_v32 = vadd.f32 %v1065_v62, %v3505_v56  ;;  %v1234_v21 = vpop.f32.mrf.mxu3  ;;  %1327 = vmatmul.bf16.vlgmr.msrb.gmra.mxu0 %v3307_v59  ;;  %v723_v22 = vmax.f32 %v419_v1, 0.0 }
 0x208   :  { %1496 = vmatmul.bf16.vlgmr.msrb.gmra.mxu1 %v3309_v60  ;;  %v724_v59 = vmax.f32 %v588_v39, 0.0 }
 0x209   :  { %v1235_v44 = vadd.f32 %v1234_v21, %v1066_v32 }
 0x20b   :  { %v1717_v51 = vmax.f32 %v1235_v44, 0.0 }
 0x20c   :  { %v420_v6 = vpop.f32.mrf.mxu0 }
 0x20d   :  { %v421_v42 = vadd.f32 %v420_v6, %v3291_v45  ;;  %v589_v23 = vpop.f32.mrf.mxu1 }
 0x20e   :  { %v590_v40 = vadd.f32 %v589_v23, %v3294_v46  ;;  %v1067_v2 = vpop.f32.mrf.mxu2 }
 0x20f   :  { %v725_v49 = vmax.f32 %v421_v42, 0.0  ;;  %v1068_v50 = vadd.f32 %v1067_v2, %v3505_v56  ;;  %v1236_v9 = vpop.f32.mrf.mxu3 }
 0x210   :  { %v726_v62 = vmax.f32 %v590_v40, 0.0 }
 0x211   :  { %v1237_v60 = vadd.f32 %v1236_v9, %v1068_v50  ;;  %v3924_v32 = vpack.c.bf16 %v725_v49, %v723_v22 }
 0x212   :  { %v3926_v8 = vpack.c.bf16 %v726_v62, %v724_v59 }
 0x213   :  { %v1719_v21 = vmax.f32 %v1237_v60, 0.0  ;;  %1109 = vmatmul.bf16.gmra.mxu2 %v3924_v32 }
 0x214   :  { %4491 = vst [vmem:[#allocation24_spill] sm:$0xff] %v3926_v8  ;;  %1278 = vmatmul.bf16.gmra.mxu3 %v3926_v8  ;;  %v423_v6 = vpop.f32.mrf.mxu0 }
 0x215   :  { %v592_v23 = vpop.f32.mrf.mxu1  ;;  %v3930_v1 = vpack.c.bf16 %v1719_v21, %v1717_v51  ;;  %v424_v44 = vadd.f32 %v423_v6, %v3291_v45 }
 0x216   :  { %v1070_v42 = vpop.f32.mrf.mxu2  ;;  %v593_v22 = vadd.f32 %v592_v23, %v3294_v46 }
 0x217   :  { %v1071_v2 = vadd.f32 %v1070_v42, %v3505_v56  ;;  %v1239_v39 = vpop.f32.mrf.mxu3  ;;  %1332 = vmatmul.bf16.gmra.mxu0 %v3325_v12  ;;  %v727_v60 = vmax.f32 %v424_v44, 0.0 }
 0x218   :  { %1501 = vmatmul.bf16.gmra.mxu1 %v3327_v13  ;;  %v728_v12 = vmax.f32 %v593_v22, 0.0 }
 0x219   :  { %v1240_v40 = vadd.f32 %v1239_v39, %v1071_v2 }
 0x21b   :  { %v1721_v23 = vmax.f32 %v1240_v40, 0.0 }
 0x21c   :  { %v425_v49 = vpop.f32.mrf.mxu0 }
 0x21d   :  { %v426_v50 = vadd.f32 %v425_v49, %v3291_v45  ;;  %v594_v9 = vpop.f32.mrf.mxu1 }
 0x21e   :  { %v595_v59 = vadd.f32 %v594_v9, %v3294_v46  ;;  %v1072_v62 = vpop.f32.mrf.mxu2 }
 0x21f   :  { %v729_v51 = vmax.f32 %v426_v50, 0.0  ;;  %v1073_v21 = vadd.f32 %v1072_v62, %v3505_v56  ;;  %v1241_v42 = vpop.f32.mrf.mxu3 }
 0x220   :  { %v730_v8 = vmax.f32 %v595_v59, 0.0 }
 0x221   :  { %v1242_v13 = vadd.f32 %v1241_v42, %v1073_v21  ;;  %v3940_v2 = vpack.c.bf16 %v729_v51, %v727_v60 }
 0x222   :  { %v3942_v6 = vpack.c.bf16 %v730_v8, %v728_v12 }
 0x223   :  { %v1723_v39 = vmax.f32 %v1242_v13, 0.0  ;;  %1114 = vmatmul.bf16.gmra.mxu2 %v3940_v2 }
 0x224   :  { %4492 = vst [vmem:[#allocation25_spill] sm:$0xff] %v3942_v6  ;;  %1283 = vmatmul.bf16.gmra.mxu3 %v3942_v6  ;;  %v428_v49 = vpop.f32.mrf.mxu0 }
 0x225   :  { %v597_v9 = vpop.f32.mrf.mxu1  ;;  %v3946_v44 = vpack.c.bf16 %v1723_v39, %v1721_v23  ;;  %v429_v40 = vadd.f32 %v428_v49, %v3291_v45 }
 0x226   :  { %v1075_v50 = vpop.f32.mrf.mxu2  ;;  %v598_v59 = vadd.f32 %v597_v9, %v3294_v46 }
 0x227   :  { %v1076_v62 = vadd.f32 %v1075_v50, %v3505_v56  ;;  %v1244_v22 = vpop.f32.mrf.mxu3  ;;  %1337 = vmatmul.bf16.gmra.mxu0 %v3355_v35  ;;  %v731_v13 = vmax.f32 %v429_v40, 0.0  ;;  %v2762_v40 = vld [vmem:[%s4446_s1 + $0x110] sm:$0xf] }
 0x228   :  { %1506 = vmatmul.bf16.gmra.mxu1 %v3357_v36  ;;  %v732_v35 = vmax.f32 %v598_v59, 0.0  ;;  %v2858_v59 = vld [vmem:[%s4446_s1 + $0x114] sm:$0xf0] }
 0x229   :  { %v1245_v8 = vadd.f32 %v1244_v22, %v1076_v62 }
 0x22b   :  { %v1725_v9 = vmax.f32 %v1245_v8, 0.0 }
 0x22c   :  { %v430_v60 = vpop.f32.mrf.mxu0 }
 0x22d   :  { %v431_v51 = vadd.f32 %v430_v60, %v3291_v45  ;;  %v599_v21 = vpop.f32.mrf.mxu1 }
 0x22e   :  { %v600_v42 = vadd.f32 %v599_v21, %v3294_v46  ;;  %v1077_v12 = vpop.f32.mrf.mxu2  ;;  %v2763_v21 = vor.u32 %v2858_v59, %v2762_v40 }
 0x22f   :  { %v733_v23 = vmax.f32 %v431_v51, 0.0  ;;  %v1078_v39 = vadd.f32 %v1077_v12, %v3505_v56  ;;  %v1246_v50 = vpop.f32.mrf.mxu3 }
 0x230   :  { %v734_v6 = vmax.f32 %v600_v42, 0.0  ;;  %1953 = vmatpush.bf16.msrb.mxu2 %v2763_v21 }
 0x231   :  { %v1247_v36 = vadd.f32 %v1246_v50, %v1078_v39  ;;  %v3956_v62 = vpack.c.bf16 %v733_v23, %v731_v13  ;;  %v2794_v13 = vld [vmem:[%s4446_s1 + $0x190] sm:$0xf]  ;;  %v2866_v23 = vld [vmem:[%s4446_s1 + $0x194] sm:$0xf0] }
 0x232   :  { %v3958_v49 = vpack.c.bf16 %v734_v6, %v732_v35  ;;  %v2795_v50 = vor.u32 %v2866_v23, %v2794_v13 }
 0x233   :  { %4493 = vst [vmem:[#allocation26_spill] sm:$0xff] %v3956_v62  ;;  %v1727_v22 = vmax.f32 %v1247_v36, 0.0  ;;  %1119 = vmatmul.bf16.gmra.mxu2 %v3956_v62 }
 0x234   :  { %4494 = vst [vmem:[#allocation27_spill] sm:$0xff] %v3958_v49  ;;  %1288 = vmatmul.bf16.gmra.mxu3 %v3958_v49  ;;  %v433_v60 = vpop.f32.mrf.mxu0 }
 0x235   :  { %v602_v51 = vpop.f32.mrf.mxu1  ;;  %v3968_v42 = vpack.c.bf16 %v1727_v22, %v1725_v9  ;;  %v434_v35 = vadd.f32 %v433_v60, %v3291_v45  ;;  %2122 = vmatpush.bf16.msrb.mxu3 %v2795_v50 }
 0x236   :  { %v1080_v6 = vpop.f32.mrf.mxu2  ;;  %v603_v36 = vadd.f32 %v602_v51, %v3294_v46 }
 0x237   :  { %v1081_v8 = vadd.f32 %v1080_v6, %v3505_v56  ;;  %v1249_v12 = vpop.f32.mrf.mxu3  ;;  %1342 = vmatmul.bf16.gmra.mxu0 %v3385_v63  ;;  %v735_v59 = vmax.f32 %v434_v35, 0.0 }
 0x238   :  { %1511 = vmatmul.bf16.gmra.mxu1 %v3387_v0  ;;  %v736_v62 = vmax.f32 %v603_v36, 0.0 }
 0x239   :  { %v1250_v39 = vadd.f32 %v1249_v12, %v1081_v8 }
 0x23b   :  { %v1729_v51 = vmax.f32 %v1250_v39, 0.0 }
 0x23c   :  { %v435_v9 = vpop.f32.mrf.mxu0 }
 0x23d   :  { %v436_v63 = vadd.f32 %v435_v9, %v3291_v45  ;;  %v604_v22 = vpop.f32.mrf.mxu1 }
 0x23e   :  { %v605_v0 = vadd.f32 %v604_v22, %v3294_v46  ;;  %v1082_v40 = vpop.f32.mrf.mxu2 }
 0x23f   :  { %v737_v21 = vmax.f32 %v436_v63, 0.0  ;;  %v1083_v6 = vadd.f32 %v1082_v40, %v3505_v56  ;;  %v1251_v49 = vpop.f32.mrf.mxu3 }
 0x240   :  { %v738_v8 = vmax.f32 %v605_v0, 0.0 }
 0x241   :  { %v1252_v12 = vadd.f32 %v1251_v49, %v1083_v6  ;;  %v3984_v13 = vpack.c.bf16 %v737_v21, %v735_v59 }
 0x242   :  { %v3986_v60 = vpack.c.bf16 %v738_v8, %v736_v62 }
 0x243   :  { %v1731_v23 = vmax.f32 %v1252_v12, 0.0  ;;  %1124 = vmatmul.bf16.gmra.mxu2 %v3984_v13 }
 0x244   :  { %1293 = vmatmul.bf16.gmra.mxu3 %v3986_v60  ;;  %v438_v50 = vpop.f32.mrf.mxu0 }
 0x245   :  { %v607_v9 = vpop.f32.mrf.mxu1  ;;  %v3990_v35 = vpack.c.bf16 %v1731_v23, %v1729_v51  ;;  %v439_v49 = vadd.f32 %v438_v50, %v3291_v45 }
 0x246   :  { %v1085_v63 = vpop.f32.mrf.mxu2  ;;  %v608_v39 = vadd.f32 %v607_v9, %v3294_v46 }
 0x247   :  { %v1086_v22 = vadd.f32 %v1085_v63, %v3505_v56  ;;  %v1254_v36 = vpop.f32.mrf.mxu3  ;;  %1347 = vmatmul.bf16.gmra.mxu0 %v3403_v18  ;;  %v739_v8 = vmax.f32 %v439_v49, 0.0 }
 0x248   :  { %1516 = vmatmul.bf16.gmra.mxu1 %v3405_v19  ;;  %v740_v18 = vmax.f32 %v608_v39, 0.0 }
 0x249   :  { %v1255_v62 = vadd.f32 %v1254_v36, %v1086_v22 }
 0x24b   :  { %v1733_v9 = vmax.f32 %v1255_v62, 0.0 }
 0x24c   :  { %v440_v0 = vpop.f32.mrf.mxu0 }
 0x24d   :  { %v441_v40 = vadd.f32 %v440_v0, %v3291_v45  ;;  %v609_v59 = vpop.f32.mrf.mxu1 }
 0x24e   :  { %v610_v21 = vadd.f32 %v609_v59, %v3294_v46  ;;  %v1087_v6 = vpop.f32.mrf.mxu2 }
 0x24f   :  { %v741_v12 = vmax.f32 %v441_v40, 0.0  ;;  %v1088_v51 = vadd.f32 %v1087_v6, %v3505_v56  ;;  %v1256_v23 = vpop.f32.mrf.mxu3 }
 0x250   :  { %v742_v63 = vmax.f32 %v610_v21, 0.0 }
 0x251   :  { %v1257_v19 = vadd.f32 %v1256_v23, %v1088_v51  ;;  %v4000_v22 = vpack.c.bf16 %v741_v12, %v739_v8 }
 0x252   :  { %v4002_v50 = vpack.c.bf16 %v742_v63, %v740_v18 }
 0x253   :  { %v1735_v36 = vmax.f32 %v1257_v19, 0.0  ;;  %1129 = vmatmul.bf16.gmra.mxu2 %v4000_v22 }
 0x254   :  { %4495 = vst [vmem:[#allocation28_spill] sm:$0xff] %v4002_v50  ;;  %1298 = vmatmul.bf16.gmra.mxu3 %v4002_v50  ;;  %v443_v0 = vpop.f32.mrf.mxu0 }
 0x255   :  { %v612_v59 = vpop.f32.mrf.mxu1  ;;  %v4006_v49 = vpack.c.bf16 %v1735_v36, %v1733_v9  ;;  %v444_v62 = vadd.f32 %v443_v0, %v3291_v45 }
 0x256   :  { %v1090_v40 = vpop.f32.mrf.mxu2  ;;  %v613_v8 = vadd.f32 %v612_v59, %v3294_v46 }
 0x257   :  { %v1091_v6 = vadd.f32 %v1090_v40, %v3505_v56  ;;  %v1259_v39 = vpop.f32.mrf.mxu3  ;;  %1352 = vmatmul.bf16.gmra.mxu0 %v3421_v37  ;;  %v743_v19 = vmax.f32 %v444_v62, 0.0 }
 0x258   :  { %1521 = vmatmul.bf16.gmra.mxu1 %v3423_v38  ;;  %v744_v37 = vmax.f32 %v613_v8, 0.0 }
 0x259   :  { %v1260_v21 = vadd.f32 %v1259_v39, %v1091_v6 }
 0x25b   :  { %v1737_v59 = vmax.f32 %v1260_v21, 0.0 }
 0x25c   :  { %v445_v12 = vpop.f32.mrf.mxu0 }
 0x25d   :  { %v446_v51 = vadd.f32 %v445_v12, %v3291_v45  ;;  %v614_v23 = vpop.f32.mrf.mxu1 }
 0x25e   :  { %v615_v18 = vadd.f32 %v614_v23, %v3294_v46  ;;  %v1092_v63 = vpop.f32.mrf.mxu2 }
 0x25f   :  { %v745_v9 = vmax.f32 %v446_v51, 0.0  ;;  %v1093_v36 = vadd.f32 %v1092_v63, %v3505_v56  ;;  %v1261_v40 = vpop.f32.mrf.mxu3 }
 0x260   :  { %v746_v50 = vmax.f32 %v615_v18, 0.0 }
 0x261   :  { %v1262_v38 = vadd.f32 %v1261_v40, %v1093_v36  ;;  %v4016_v6 = vpack.c.bf16 %v745_v9, %v743_v19 }
 0x262   :  { %v4018_v0 = vpack.c.bf16 %v746_v50, %v744_v37 }
 0x263   :  { %v1739_v39 = vmax.f32 %v1262_v38, 0.0  ;;  %1134 = vmatmul.bf16.gmra.mxu2 %v4016_v6 }
 0x264   :  { %4496 = vst [vmem:[#allocation29_spill] sm:$0xff] %v4018_v0  ;;  %1303 = vmatmul.bf16.gmra.mxu3 %v4018_v0  ;;  %v448_v12 = vpop.f32.mrf.mxu0 }
 0x265   :  { %v617_v23 = vpop.f32.mrf.mxu1  ;;  %v4022_v62 = vpack.c.bf16 %v1739_v39, %v1737_v59  ;;  %v449_v21 = vadd.f32 %v448_v12, %v3291_v45 }
 0x266   :  { %v1095_v51 = vpop.f32.mrf.mxu2  ;;  %v618_v18 = vadd.f32 %v617_v23, %v3294_v46 }
 0x267   :  { %v1096_v63 = vadd.f32 %v1095_v51, %v3505_v56  ;;  %v1264_v8 = vpop.f32.mrf.mxu3  ;;  %1357 = vmatmul.bf16.gmra.mxu0 %v3451_v3  ;;  %v747_v38 = vmax.f32 %v449_v21, 0.0 }
 0x268   :  { %1526 = vmatmul.bf16.gmra.mxu1 %v3453_v4  ;;  %v748_v3 = vmax.f32 %v618_v18, 0.0 }
 0x269   :  { %v1265_v50 = vadd.f32 %v1264_v8, %v1096_v63 }
 0x26b   :  { %v1741_v23 = vmax.f32 %v1265_v50, 0.0 }
 0x26c   :  { %v450_v19 = vpop.f32.mrf.mxu0 }
 0x26d   :  { %v451_v9 = vadd.f32 %v450_v19, %v3291_v45  ;;  %v619_v36 = vpop.f32.mrf.mxu1 }
 0x26e   :  { %v620_v40 = vadd.f32 %v619_v36, %v3294_v46  ;;  %v1097_v37 = vpop.f32.mrf.mxu2 }
 0x26f   :  { %v749_v59 = vmax.f32 %v451_v9, 0.0  ;;  %v1098_v39 = vadd.f32 %v1097_v37, %v3505_v56  ;;  %v1266_v51 = vpop.f32.mrf.mxu3 }
 0x270   :  { %v750_v0 = vmax.f32 %v620_v40, 0.0 }
 0x271   :  { %v1267_v4 = vadd.f32 %v1266_v51, %v1098_v39  ;;  %v4032_v63 = vpack.c.bf16 %v749_v59, %v747_v38 }
 0x272   :  { %v4034_v12 = vpack.c.bf16 %v750_v0, %v748_v3 }
 0x273   :  { %v1743_v8 = vmax.f32 %v1267_v4, 0.0  ;;  %1139 = vmatmul.bf16.gmra.mxu2 %v4032_v63 }
 0x274   :  { %4497 = vst [vmem:[#allocation30_spill] sm:$0xff] %v4034_v12  ;;  %1308 = vmatmul.bf16.gmra.mxu3 %v4034_v12  ;;  %v453_v19 = vpop.f32.mrf.mxu0 }
 0x275   :  { %v622_v36 = vpop.f32.mrf.mxu1  ;;  %v4038_v21 = vpack.c.bf16 %v1743_v8, %v1741_v23  ;;  %v454_v50 = vadd.f32 %v453_v19, %v3291_v45 }
 0x276   :  { %v1100_v9 = vpop.f32.mrf.mxu2  ;;  %v623_v40 = vadd.f32 %v622_v36, %v3294_v46 }
 0x277   :  { %v1101_v37 = vadd.f32 %v1100_v9, %v3505_v56  ;;  %v1269_v18 = vpop.f32.mrf.mxu3  ;;  %1362 = vmatmul.bf16.gmra.mxu0 %v3481_v30  ;;  %v751_v4 = vmax.f32 %v454_v50, 0.0 }
 0x278   :  { %1531 = vmatmul.bf16.gmra.mxu1 %v3483_v31  ;;  %v752_v30 = vmax.f32 %v623_v40, 0.0 }
 0x279   :  { %v1270_v0 = vadd.f32 %v1269_v18, %v1101_v37 }
 0x27b   :  { %v1745_v36 = vmax.f32 %v1270_v0, 0.0 }
 0x27c   :  { %v455_v38 = vpop.f32.mrf.mxu0 }
 0x27d   :  { %v456_v59 = vadd.f32 %v455_v38, %v3291_v45  ;;  %v624_v39 = vpop.f32.mrf.mxu1 }
 0x27e   :  { %v625_v51 = vadd.f32 %v624_v39, %v3294_v46  ;;  %v1102_v3 = vpop.f32.mrf.mxu2  ;;  %v3005_v46 = vld [vmem:[%s4447_s2 + $0x8] sm:$0xff] }
 0x27f   :  { %v753_v23 = vmax.f32 %v456_v59, 0.0  ;;  %v1103_v8 = vadd.f32 %v1102_v3, %v3505_v56  ;;  %v1271_v9 = vpop.f32.mrf.mxu3  ;;  %v4057_v50 = vperm.slane %v3005_v46, 1 }
 0x280   :  { %v754_v12 = vmax.f32 %v625_v51, 0.0 }
 0x281   :  { %v1272_v31 = vadd.f32 %v1271_v9, %v1103_v8  ;;  %v4048_v37 = vpack.c.bf16 %v753_v23, %v751_v4 }
 0x282   :  { %v4050_v19 = vpack.c.bf16 %v754_v12, %v752_v30 }
 0x283   :  { %4498 = vst [vmem:[#allocation31_spill] sm:$0xff] %v4048_v37  ;;  %v1747_v18 = vmax.f32 %v1272_v31, 0.0  ;;  %1144 = vmatmul.bf16.gmra.mxu2 %v4048_v37 }
 0x284   :  { %4499 = vst [vmem:[#allocation32_spill] sm:$0xff] %v4050_v19  ;;  %1313 = vmatmul.bf16.gmra.mxu3 %v4050_v19  ;;  %v1328_v45 = vpop.f32.mrf.mxu0 }
 0x285   :  { %v1497_v40 = vpop.f32.mrf.mxu1  ;;  %v4059_v38 = vpack.c.bf16 %v1747_v18, %v1745_v36  ;;  %v1329_v0 = vadd.f32 %v1328_v45, %v4057_v50 }
 0x286   :  { %v1105_v59 = vpop.f32.mrf.mxu2 }
 0x287   :  { %v1106_v12 = vadd.f32 %v1105_v59, %v3505_v56  ;;  %v1274_v39 = vpop.f32.mrf.mxu3  ;;  %1367 = vmatmul.bf16.gmra.mxu0 %v3499_v54  ;;  %v1498_v4 = vadd.f32 %v1497_v40, %v1329_v0 }
 0x288   :  { %1536 = vmatmul.bf16.gmra.mxu1 %v3501_v55 }
 0x289   :  { %v1275_v51 = vadd.f32 %v1274_v39, %v1106_v12  ;;  %v1658_v18 = vmax.f32 %v1498_v4, 0.0 }
 0x28b   :  { %v1749_v19 = vmax.f32 %v1275_v51, 0.0 }
 0x28c   :  { %v1330_v3 = vpop.f32.mrf.mxu0 }
 0x28d   :  { %v1331_v23 = vadd.f32 %v1330_v3, %v4057_v50  ;;  %v1499_v8 = vpop.f32.mrf.mxu1 }
 0x28e   :  { %v1107_v9 = vpop.f32.mrf.mxu2 }
 0x28f   :  { %v1500_v30 = vadd.f32 %v1499_v8, %v1331_v23  ;;  %v1108_v31 = vadd.f32 %v1107_v9, %v3505_v56  ;;  %v1276_v36 = vpop.f32.mrf.mxu3 }
 0x291   :  { %v1660_v46 = vmax.f32 %v1500_v30, 0.0  ;;  %v1277_v59 = vadd.f32 %v1276_v36, %v1108_v31 }
 0x293   :  { %v1786_v54 = vpack.c.bf16 %v1660_v46, %v1658_v18  ;;  %v1751_v37 = vmax.f32 %v1277_v59, 0.0  ;;  %1954 = vmatmul.bf16.vlgmr.msrb.gmra.mxu2 %v3528_v33 }
 0x294   :  { %v1333_v55 = vpop.f32.mrf.mxu0 }
 0x295   :  { %v1502_v45 = vpop.f32.mrf.mxu1  ;;  %2123 = vmatmul.bf16.vlgmr.msrb.gmra.mxu3 %v1786_v54  ;;  %v4068_v40 = vpack.c.bf16 %v1751_v37, %v1749_v19  ;;  %v1334_v3 = vadd.f32 %v1333_v55, %v4057_v50 }
 0x296   :  { %v1110_v12 = vpop.f32.mrf.mxu2 }
 0x297   :  { %v1111_v39 = vadd.f32 %v1110_v12, %v3505_v56  ;;  %v1279_v0 = vpop.f32.mrf.mxu3  ;;  %1372 = vmatmul.bf16.gmra.mxu0 %v3522_v25  ;;  %v1503_v23 = vadd.f32 %v1502_v45, %v1334_v3 }
 0x298   :  { %1541 = vmatmul.bf16.gmra.mxu1 %v3524_v26 }
 0x299   :  { %v1280_v51 = vadd.f32 %v1279_v0, %v1111_v39  ;;  %v1662_v31 = vmax.f32 %v1503_v23, 0.0 }
 0x29b   :  { %v1753_v46 = vmax.f32 %v1280_v51, 0.0 }
 0x29c   :  { %v1335_v4 = vpop.f32.mrf.mxu0 }
 0x29d   :  { %v1336_v33 = vadd.f32 %v1335_v4, %v4057_v50  ;;  %v1504_v8 = vpop.f32.mrf.mxu1 }
 0x29e   :  { %v1112_v9 = vpop.f32.mrf.mxu2 }
 0x29f   :  { %v1505_v30 = vadd.f32 %v1504_v8, %v1336_v33  ;;  %v1113_v37 = vadd.f32 %v1112_v9, %v3505_v56  ;;  %v1281_v19 = vpop.f32.mrf.mxu3 }
 0x2a1   :  { %v1664_v36 = vmax.f32 %v1505_v30, 0.0  ;;  %v1282_v18 = vadd.f32 %v1281_v19, %v1113_v37 }
 0x2a3   :  { %v1755_v25 = vmax.f32 %v1282_v18, 0.0  ;;  %1959 = vmatmul.bf16.gmra.mxu2 %v3568_v28  ;;  %v1788_v26 = vpack.c.bf16 %v1664_v36, %v1662_v31 }
 0x2a4   :  { %v1338_v59 = vpop.f32.mrf.mxu0 }
 0x2a5   :  { %v1507_v54 = vpop.f32.mrf.mxu1  ;;  %2128 = vmatmul.bf16.gmra.mxu3 %v1788_v26  ;;  %v4077_v55 = vpack.c.bf16 %v1755_v25, %v1753_v46  ;;  %v1339_v0 = vadd.f32 %v1338_v59, %v4057_v50 }
 0x2a6   :  { %v1115_v45 = vpop.f32.mrf.mxu2 }
 0x2a7   :  { %v1116_v12 = vadd.f32 %v1115_v45, %v3505_v56  ;;  %v1284_v39 = vpop.f32.mrf.mxu3  ;;  %1377 = vmatmul.bf16.gmra.mxu0 %v3556_v14  ;;  %v1508_v4 = vadd.f32 %v1507_v54, %v1339_v0 }
 0x2a8   :  { %1546 = vmatmul.bf16.gmra.mxu1 %v3558_v15 }
 0x2a9   :  { %v1285_v3 = vadd.f32 %v1284_v39, %v1116_v12  ;;  %v1666_v37 = vmax.f32 %v1508_v4, 0.0 }
 0x2ab   :  { %v1757_v36 = vmax.f32 %v1285_v3, 0.0 }
 0x2ac   :  { %v1340_v51 = vpop.f32.mrf.mxu0 }
 0x2ad   :  { %v1341_v28 = vadd.f32 %v1340_v51, %v4057_v50  ;;  %v1509_v23 = vpop.f32.mrf.mxu1 }
 0x2ae   :  { %v1117_v33 = vpop.f32.mrf.mxu2 }
 0x2af   :  { %v1510_v8 = vadd.f32 %v1509_v23, %v1341_v28  ;;  %v1118_v9 = vadd.f32 %v1117_v33, %v3505_v56  ;;  %v1286_v30 = vpop.f32.mrf.mxu3 }
 0x2b1   :  { %v1668_v19 = vmax.f32 %v1510_v8, 0.0  ;;  %v1287_v31 = vadd.f32 %v1286_v30, %v1118_v9 }
 0x2b3   :  { %v1759_v14 = vmax.f32 %v1287_v31, 0.0  ;;  %1964 = vmatmul.bf16.gmra.mxu2 %v3596_v17  ;;  %v1790_v15 = vpack.c.bf16 %v1668_v19, %v1666_v37 }
 0x2b4   :  { %v1343_v18 = vpop.f32.mrf.mxu0 }
 0x2b5   :  { %v1512_v46 = vpop.f32.mrf.mxu1  ;;  %2133 = vmatmul.bf16.gmra.mxu3 %v1790_v15  ;;  %v4086_v25 = vpack.c.bf16 %v1759_v14, %v1757_v36  ;;  %v1344_v45 = vadd.f32 %v1343_v18, %v4057_v50 }
 0x2b6   :  { %v1120_v26 = vpop.f32.mrf.mxu2 }
 0x2b7   :  { %v1121_v59 = vadd.f32 %v1120_v26, %v3505_v56  ;;  %v1289_v54 = vpop.f32.mrf.mxu3  ;;  %1382 = vmatmul.bf16.gmra.mxu0 %v3590_v7  ;;  %v1513_v0 = vadd.f32 %v1512_v46, %v1344_v45 }
 0x2b8   :  { %1551 = vmatmul.bf16.gmra.mxu1 %v3592_v41 }
 0x2b9   :  { %v1290_v12 = vadd.f32 %v1289_v54, %v1121_v59  ;;  %v1670_v33 = vmax.f32 %v1513_v0, 0.0 }
 0x2bb   :  { %v1761_v30 = vmax.f32 %v1290_v12, 0.0 }
 0x2bc   :  { %v1345_v39 = vpop.f32.mrf.mxu0 }
 0x2bd   :  { %v1346_v17 = vadd.f32 %v1345_v39, %v4057_v50  ;;  %v1514_v3 = vpop.f32.mrf.mxu1 }
 0x2be   :  { %v1122_v51 = vpop.f32.mrf.mxu2 }
 0x2bf   :  { %v1515_v4 = vadd.f32 %v1514_v3, %v1346_v17  ;;  %v1123_v28 = vadd.f32 %v1122_v51, %v3505_v56  ;;  %v1291_v23 = vpop.f32.mrf.mxu3 }
 0x2c1   :  { %v1672_v8 = vmax.f32 %v1515_v4, 0.0  ;;  %v1292_v9 = vadd.f32 %v1291_v23, %v1123_v28 }
 0x2c3   :  { %v1763_v7 = vmax.f32 %v1292_v9, 0.0  ;;  %1969 = vmatmul.bf16.gmra.mxu2 %v3618_v5  ;;  %v1792_v41 = vpack.c.bf16 %v1672_v8, %v1670_v33 }
 0x2c4   :  { %v1348_v37 = vpop.f32.mrf.mxu0 }
 0x2c5   :  { %v1517_v19 = vpop.f32.mrf.mxu1  ;;  %2138 = vmatmul.bf16.gmra.mxu3 %v1792_v41  ;;  %v4095_v31 = vpack.c.bf16 %v1763_v7, %v1761_v30  ;;  %v1349_v18 = vadd.f32 %v1348_v37, %v4057_v50 }
 0x2c6   :  { %v1125_v36 = vpop.f32.mrf.mxu2 }
 0x2c7   :  { %v1126_v14 = vadd.f32 %v1125_v36, %v3505_v56  ;;  %v1294_v15 = vpop.f32.mrf.mxu3  ;;  %1387 = vmatmul.bf16.gmra.mxu0 %v3612_v53  ;;  %v1518_v59 = vadd.f32 %v1517_v19, %v1349_v18 }
 0x2c8   :  { %1556 = vmatmul.bf16.gmra.mxu1 %v3614_v57 }
 0x2c9   :  { %v1295_v46 = vadd.f32 %v1294_v15, %v1126_v14  ;;  %v1674_v17 = vmax.f32 %v1518_v59, 0.0 }
 0x2cb   :  { %v1765_v4 = vmax.f32 %v1295_v46, 0.0 }
 0x2cc   :  { %v1350_v26 = vpop.f32.mrf.mxu0 }
 0x2cd   :  { %v1351_v5 = vadd.f32 %v1350_v26, %v4057_v50  ;;  %v1519_v54 = vpop.f32.mrf.mxu1 }
 0x2ce   :  { %v1127_v45 = vpop.f32.mrf.mxu2 }
 0x2cf   :  { %v1520_v12 = vadd.f32 %v1519_v54, %v1351_v5  ;;  %v1128_v39 = vadd.f32 %v1127_v45, %v3505_v56  ;;  %v1296_v0 = vpop.f32.mrf.mxu3 }
 0x2d1   :  { %v1676_v3 = vmax.f32 %v1520_v12, 0.0  ;;  %v1297_v51 = vadd.f32 %v1296_v0, %v1128_v39 }
 0x2d3   :  { %v1767_v53 = vmax.f32 %v1297_v51, 0.0  ;;  %1974 = vmatmul.bf16.gmra.mxu2 %v3640_v61  ;;  %v1794_v57 = vpack.c.bf16 %v1676_v3, %v1674_v17 }
 0x2d4   :  { %v1353_v28 = vpop.f32.mrf.mxu0 }
 0x2d5   :  { %v1522_v23 = vpop.f32.mrf.mxu1  ;;  %2143 = vmatmul.bf16.gmra.mxu3 %v1794_v57  ;;  %v4104_v33 = vpack.c.bf16 %v1767_v53, %v1765_v4  ;;  %v1354_v7 = vadd.f32 %v1353_v28, %v4057_v50 }
 0x2d6   :  { %v1130_v8 = vpop.f32.mrf.mxu2 }
 0x2d7   :  { %v1131_v9 = vadd.f32 %v1130_v8, %v3505_v56  ;;  %v1299_v30 = vpop.f32.mrf.mxu3  ;;  %1392 = vmatmul.bf16.gmra.mxu0 %v3634_v47  ;;  %v1523_v19 = vadd.f32 %v1522_v23, %v1354_v7 }
 0x2d8   :  { %1561 = vmatmul.bf16.gmra.mxu1 %v3636_v48 }
 0x2d9   :  { %v1300_v41 = vadd.f32 %v1299_v30, %v1131_v9  ;;  %v1678_v26 = vmax.f32 %v1523_v19, 0.0 }
 0x2db   :  { %v1769_v54 = vmax.f32 %v1300_v41, 0.0 }
 0x2dc   :  { %v1355_v37 = vpop.f32.mrf.mxu0 }
 0x2dd   :  { %v1356_v61 = vadd.f32 %v1355_v37, %v4057_v50  ;;  %v1524_v36 = vpop.f32.mrf.mxu1 }
 0x2de   :  { %v1132_v14 = vpop.f32.mrf.mxu2 }
 0x2df   :  { %v1525_v15 = vadd.f32 %v1524_v36, %v1356_v61  ;;  %v1133_v18 = vadd.f32 %v1132_v14, %v3505_v56  ;;  %v1301_v46 = vpop.f32.mrf.mxu3 }
 0x2e1   :  { %v1680_v59 = vmax.f32 %v1525_v15, 0.0  ;;  %v1302_v5 = vadd.f32 %v1301_v46, %v1133_v18 }
 0x2e3   :  { %v1771_v47 = vmax.f32 %v1302_v5, 0.0  ;;  %1979 = vmatmul.bf16.gmra.mxu2 %v3680_v20  ;;  %v1796_v48 = vpack.c.bf16 %v1680_v59, %v1678_v26 }
 0x2e4   :  { %v1358_v45 = vpop.f32.mrf.mxu0 }
 0x2e5   :  { %v1527_v12 = vpop.f32.mrf.mxu1  ;;  %2148 = vmatmul.bf16.gmra.mxu3 %v1796_v48  ;;  %v4113_v39 = vpack.c.bf16 %v1771_v47, %v1769_v54  ;;  %v1359_v51 = vadd.f32 %v1358_v45, %v4057_v50 }
 0x2e6   :  { %v1135_v0 = vpop.f32.mrf.mxu2 }
 0x2e7   :  { %v1136_v17 = vadd.f32 %v1135_v0, %v3505_v56  ;;  %v1304_v3 = vpop.f32.mrf.mxu3  ;;  %1397 = vmatmul.bf16.gmra.mxu0 %v3668_v52  ;;  %v1528_v57 = vadd.f32 %v1527_v12, %v1359_v51 }
 0x2e8   :  { %1566 = vmatmul.bf16.gmra.mxu1 %v3670_v58 }
 0x2e9   :  { %v1305_v4 = vadd.f32 %v1304_v3, %v1136_v17  ;;  %v1682_v7 = vmax.f32 %v1528_v57, 0.0 }
 0x2eb   :  { %v1773_v19 = vmax.f32 %v1305_v4, 0.0 }
 0x2ec   :  { %v1360_v53 = vpop.f32.mrf.mxu0 }
 0x2ed   :  { %v1361_v20 = vadd.f32 %v1360_v53, %v4057_v50  ;;  %v1529_v28 = vpop.f32.mrf.mxu1 }
 0x2ee   :  { %v1137_v23 = vpop.f32.mrf.mxu2 }
 0x2ef   :  { %v1530_v8 = vadd.f32 %v1529_v28, %v1361_v20  ;;  %v1138_v9 = vadd.f32 %v1137_v23, %v3505_v56  ;;  %v1306_v30 = vpop.f32.mrf.mxu3 }
 0x2f1   :  { %v1684_v41 = vmax.f32 %v1530_v8, 0.0  ;;  %v1307_v37 = vadd.f32 %v1306_v30, %v1138_v9  ;;  %v4500_v9 = vld [vmem:[#allocation5_spill] sm:$0xff]  ;;  %v4501_v30 = vld [vmem:[#allocation6_spill] sm:$0xff] }
 0x2f3   :  { %v1775_v52 = vmax.f32 %v1307_v37, 0.0  ;;  %1984 = vmatmul.bf16.gmra.mxu2 %v3708_v29  ;;  %v1798_v58 = vpack.c.bf16 %v1684_v41, %v1682_v7 }
 0x2f4   :  { %v1363_v61 = vpop.f32.mrf.mxu0 }
 0x2f5   :  { %v1532_v36 = vpop.f32.mrf.mxu1  ;;  %2153 = vmatmul.bf16.gmra.mxu3 %v1798_v58  ;;  %v4122_v14 = vpack.c.bf16 %v1775_v52, %v1773_v19  ;;  %v1364_v26 = vadd.f32 %v1363_v61, %v4057_v50 }
 0x2f6   :  { %v1140_v15 = vpop.f32.mrf.mxu2 }
 0x2f7   :  { %v1141_v18 = vadd.f32 %v1140_v15, %v3505_v56  ;;  %v1309_v46 = vpop.f32.mrf.mxu3  ;;  %1402 = vmatmul.bf16.gmra.mxu0 %v3702_v11  ;;  %v1533_v54 = vadd.f32 %v1532_v36, %v1364_v26 }
 0x2f8   :  { %1571 = vmatmul.bf16.gmra.mxu1 %v3704_v16 }
 0x2f9   :  { %v1310_v59 = vadd.f32 %v1309_v46, %v1141_v18  ;;  %v1686_v17 = vmax.f32 %v1533_v54, 0.0  ;;  %v4502_v54 = vld [vmem:[#allocation9_spill] sm:$0xff] }
 0x2fb   :  { %v1777_v4 = vmax.f32 %v1310_v59, 0.0 }
 0x2fc   :  { %v1365_v5 = vpop.f32.mrf.mxu0 }
 0x2fd   :  { %v1366_v29 = vadd.f32 %v1365_v5, %v4057_v50  ;;  %v1534_v47 = vpop.f32.mrf.mxu1 }
 0x2fe   :  { %v1142_v48 = vpop.f32.mrf.mxu2 }
 0x2ff   :  { %v1535_v45 = vadd.f32 %v1534_v47, %v1366_v29  ;;  %v1143_v12 = vadd.f32 %v1142_v48, %v3505_v56  ;;  %v1311_v0 = vpop.f32.mrf.mxu3  ;;  %v3006_v47 = vld [vmem:[%s4447_s2] sm:$0xff]  ;;  %s3033_s2 = smov [#allocation2]  }
 0x300   :  { %v4143_v48 = vperm.slane %v3006_v47, 2  ;;  %s2546_s22 = sshll.u32 %s3033_s2, 4  ;;  %s2547_s22 = int_to_ptr.vmem [resolvable:$true] %s2546_s22 }
 0x301   :  { %v1688_v3 = vmax.f32 %v1535_v45, 0.0  ;;  %v1312_v51 = vadd.f32 %v1311_v0, %v1143_v12 }
 0x303   :  { %v1779_v11 = vmax.f32 %v1312_v51, 0.0  ;;  %1989 = vmatmul.bf16.gmra.mxu2 %v3730_v43  ;;  %v1800_v16 = vpack.c.bf16 %v1688_v3, %v1686_v17  ;;  %v4503_v3 = vld [vmem:[#allocation7_spill] sm:$0xff]  ;;  %v4504_v51 = vld [vmem:[#allocation8_spill] sm:$0xff] }
 0x304   :  { %v1368_v53 = vpop.f32.mrf.mxu0 }
 0x305   :  { %v1537_v57 = vpop.f32.mrf.mxu1  ;;  %2158 = vmatmul.bf16.gmra.mxu3 %v1800_v16  ;;  %v4131_v20 = vpack.c.bf16 %v1779_v11, %v1777_v4  ;;  %v1369_v7 = vadd.f32 %v1368_v53, %v4057_v50 }
 0x306   :  { %v1145_v28 = vpop.f32.mrf.mxu2 }
 0x307   :  { %v1146_v23 = vadd.f32 %v1145_v28, %v3505_v56  ;;  %v1314_v8 = vpop.f32.mrf.mxu3  ;;  %1407 = vmatmul.bf16.gmra.mxu0 %v4500_v9  ;;  %v1538_v19 = vadd.f32 %v1537_v57, %v1369_v7 }
 0x308   :  { %1576 = vmatmul.bf16.gmra.mxu1 %v4501_v30 }
 0x309   :  { %v1315_v41 = vadd.f32 %v1314_v8, %v1146_v23  ;;  %v1690_v18 = vmax.f32 %v1538_v19, 0.0  ;;  %v4152_v8 = vperm.slane %v3006_v47, 3 }
 0x30b   :  { %v1781_v59 = vmax.f32 %v1315_v41, 0.0  ;;  %v4155_v41 = vperm.slane %v3006_v47, 4 }
 0x30c   :  { %v1370_v37 = vpop.f32.mrf.mxu0 }
 0x30d   :  { %v1371_v43 = vadd.f32 %v1370_v37, %v4057_v50  ;;  %v1539_v52 = vpop.f32.mrf.mxu1 }
 0x30e   :  { %v1147_v58 = vpop.f32.mrf.mxu2 }
 0x30f   :  { %v1540_v61 = vadd.f32 %v1539_v52, %v1371_v43  ;;  %v1148_v36 = vadd.f32 %v1147_v58, %v3505_v56  ;;  %v1316_v15 = vpop.f32.mrf.mxu3 }
 0x311   :  { %v1692_v46 = vmax.f32 %v1540_v61, 0.0  ;;  %v1317_v26 = vadd.f32 %v1316_v15, %v1148_v36  ;;  %v4505_v36 = vld [vmem:[#allocation12_spill] sm:$0xff] }
 0x313   :  { %v1783_v5 = vmax.f32 %v1317_v26, 0.0  ;;  %1994 = vmatmul.bf16.gmra.mxu2 %v4502_v54  ;;  %v1802_v29 = vpack.c.bf16 %v1692_v46, %v1690_v18  ;;  %v4506_v54 = vld [vmem:[#allocation10_spill] sm:$0xff] }
 0x314   :  { %v1373_v45 = vpop.f32.mrf.mxu0 }
 0x315   :  { %v1542_v12 = vpop.f32.mrf.mxu1  ;;  %2163 = vmatmul.bf16.gmra.mxu3 %v1802_v29  ;;  %v4145_v0 = vpack.c.bf16 %v1783_v5, %v1781_v59  ;;  %v1374_v11 = vadd.f32 %v1373_v45, %v4057_v50  ;;  %v4507_v29 = vld [vmem:[#allocation11_spill] sm:$0xff] }
 0x316   :  { %v1955_v56 = vpop.f32.mrf.mxu2 }
 0x317   :  { %v1956_v17 = vadd.f32 %v1955_v56, %v4143_v48  ;;  %1412 = vmatmul.bf16.gmra.mxu0 %v4503_v3  ;;  %v1543_v57 = vadd.f32 %v1542_v12, %v1374_v11 }
 0x318   :  { %1581 = vmatmul.bf16.gmra.mxu1 %v4504_v51  ;;  %v2124_v4 = vpop.f32.mrf.mxu3 }
 0x319   :  { %v2125_v16 = vadd.f32 %v2124_v4, %v1956_v17  ;;  %v1694_v43 = vmax.f32 %v1543_v57, 0.0 }
 0x31b   :  { %2877 = vtanh.f32 %v2125_v16 }
 0x31c   :  { %v1375_v53 = vpop.f32.mrf.mxu0 }
 0x31d   :  { %v1376_v28 = vadd.f32 %v1375_v53, %v4057_v50  ;;  %v1544_v23 = vpop.f32.mrf.mxu1 }
 0x31e   :  { %v1957_v9 = vpop.f32.mrf.mxu2 }
 0x31f   :  { %v1545_v30 = vadd.f32 %v1544_v23, %v1376_v28  ;;  %v1958_v7 = vadd.f32 %v1957_v9, %v4143_v48 }
 0x320   :  { %v2126_v37 = vpop.f32.mrf.mxu3 }
 0x321   :  { %v2878_v19 = vpop.eup %2877  ;;  %v1696_v52 = vmax.f32 %v1545_v30, 0.0  ;;  %v2127_v58 = vadd.f32 %v2126_v37, %v1958_v7 }
 0x322   :  { %v2349_v61 = vmul.f32 %v2878_v19, %v4152_v8 }
 0x323   :  { %2879 = vtanh.f32 %v2127_v58  ;;  %1999 = vmatmul.bf16.gmra.mxu2 %v4505_v36  ;;  %v1804_v15 = vpack.c.bf16 %v1696_v52, %v1694_v43  ;;  %v4508_v43 = vld [vmem:[#allocation15_spill] sm:$0xff] }
 0x324   :  { %v2414_v18 = vadd.f32 %v4155_v41, %v2349_v61  ;;  %v1378_v46 = vpop.f32.mrf.mxu0 }
 0x325   :  { %v1547_v26 = vpop.f32.mrf.mxu1  ;;  %2168 = vmatmul.bf16.gmra.mxu3 %v1804_v15  ;;  %v1379_v12 = vadd.f32 %v1378_v46, %v4057_v50  ;;  %v4509_v46 = vld [vmem:[#allocation13_spill] sm:$0xff] }
 0x326   :  { %2478 = vst [vmem:[#allocation2] sm:$0xff] %v2414_v18  ;;  %v1960_v59 = vpop.f32.mrf.mxu2 }
 0x327   :  { %v1961_v5 = vadd.f32 %v1960_v59, %v4143_v48  ;;  %1417 = vmatmul.bf16.gmra.mxu0 %v4506_v54  ;;  %v1548_v4 = vadd.f32 %v1547_v26, %v1379_v12  ;;  %v4510_v26 = vld [vmem:[#allocation14_spill] sm:$0xff] }
 0x328   :  { %1586 = vmatmul.bf16.gmra.mxu1 %v4507_v29  ;;  %v2129_v47 = vpop.f32.mrf.mxu3 }
 0x329   :  { %v2880_v45 = vpop.eup %2879  ;;  %v2130_v56 = vadd.f32 %v2129_v47, %v1961_v5  ;;  %v1698_v30 = vmax.f32 %v1548_v4, 0.0 }
 0x32a   :  { %v2350_v17 = vmul.f32 %v2880_v45, %v4152_v8 }
 0x32b   :  { %2881 = vtanh.f32 %v2130_v56 }
 0x32c   :  { %v2415_v3 = vadd.f32 %v4155_v41, %v2350_v17  ;;  %v1380_v51 = vpop.f32.mrf.mxu0 }
 0x32d   :  { %v1381_v11 = vadd.f32 %v1380_v51, %v4057_v50  ;;  %v1549_v16 = vpop.f32.mrf.mxu1 }
 0x32e   :  { %2479 = vst [vmem:[#allocation2 + $0x8] sm:$0xff] %v2415_v3  ;;  %v1962_v53 = vpop.f32.mrf.mxu2 }
 0x32f   :  { %v1550_v57 = vadd.f32 %v1549_v16, %v1381_v11  ;;  %v1963_v28 = vadd.f32 %v1962_v53, %v4143_v48 }
 0x330   :  { %v2131_v23 = vpop.f32.mrf.mxu3 }
 0x331   :  { %v2882_v9 = vpop.eup %2881  ;;  %v1700_v7 = vmax.f32 %v1550_v57, 0.0  ;;  %v2132_v37 = vadd.f32 %v2131_v23, %v1963_v28 }
 0x332   :  { %v2351_v19 = vmul.f32 %v2882_v9, %v4152_v8 }
 0x333   :  { %2883 = vtanh.f32 %v2132_v37  ;;  %2004 = vmatmul.bf16.gmra.mxu2 %v4508_v43  ;;  %v1806_v52 = vpack.c.bf16 %v1700_v7, %v1698_v30  ;;  %v4511_v30 = vld [vmem:[#allocation18_spill] sm:$0xff] }
 0x334   :  { %v2416_v58 = vadd.f32 %v4155_v41, %v2351_v19  ;;  %v1383_v61 = vpop.f32.mrf.mxu0 }
 0x335   :  { %v1552_v36 = vpop.f32.mrf.mxu1  ;;  %2173 = vmatmul.bf16.gmra.mxu3 %v1806_v52  ;;  %v1384_v54 = vadd.f32 %v1383_v61, %v4057_v50  ;;  %v4512_v61 = vld [vmem:[#allocation16_spill] sm:$0xff] }
 0x336   :  { %2480 = vst [vmem:[#allocation2 + $0x10] sm:$0xff] %v2416_v58  ;;  %v1965_v15 = vpop.f32.mrf.mxu2 }
 0x337   :  { %v1966_v18 = vadd.f32 %v1965_v15, %v4143_v48  ;;  %1422 = vmatmul.bf16.gmra.mxu0 %v4509_v46  ;;  %v1553_v56 = vadd.f32 %v1552_v36, %v1384_v54  ;;  %v4513_v36 = vld [vmem:[#allocation17_spill] sm:$0xff] }
 0x338   :  { %1591 = vmatmul.bf16.gmra.mxu1 %v4510_v26  ;;  %v2134_v59 = vpop.f32.mrf.mxu3 }
 0x339   :  { %v2884_v5 = vpop.eup %2883  ;;  %v2135_v29 = vadd.f32 %v2134_v59, %v1966_v18  ;;  %v1702_v57 = vmax.f32 %v1553_v56, 0.0 }
 0x33a   :  { %v2352_v47 = vmul.f32 %v2884_v5, %v4152_v8 }
 0x33b   :  { %2885 = vtanh.f32 %v2135_v29 }
 0x33c   :  { %v2417_v45 = vadd.f32 %v4155_v41, %v2352_v47  ;;  %v1385_v12 = vpop.f32.mrf.mxu0 }
 0x33d   :  { %v1386_v17 = vadd.f32 %v1385_v12, %v4057_v50  ;;  %v1554_v3 = vpop.f32.mrf.mxu1 }
 0x33e   :  { %2481 = vst [vmem:[#allocation2 + $0x18] sm:$0xff] %v2417_v45  ;;  %v1967_v51 = vpop.f32.mrf.mxu2 }
 0x33f   :  { %v1555_v4 = vadd.f32 %v1554_v3, %v1386_v17  ;;  %v1968_v11 = vadd.f32 %v1967_v51, %v4143_v48 }
 0x340   :  { %v2136_v16 = vpop.f32.mrf.mxu3 }
 0x341   :  { %v2886_v53 = vpop.eup %2885  ;;  %v1704_v28 = vmax.f32 %v1555_v4, 0.0  ;;  %v2137_v23 = vadd.f32 %v2136_v16, %v1968_v11 }
 0x342   :  { %v2353_v9 = vmul.f32 %v2886_v53, %v4152_v8 }
 0x343   :  { %2887 = vtanh.f32 %v2137_v23  ;;  %2009 = vmatmul.bf16.gmra.mxu2 %v4511_v30  ;;  %v1808_v7 = vpack.c.bf16 %v1704_v28, %v1702_v57 }
 0x344   :  { %v2418_v37 = vadd.f32 %v4155_v41, %v2353_v9  ;;  %v1388_v19 = vpop.f32.mrf.mxu0 }
 0x345   :  { %v1557_v43 = vpop.f32.mrf.mxu1  ;;  %2178 = vmatmul.bf16.gmra.mxu3 %v1808_v7  ;;  %v1389_v46 = vadd.f32 %v1388_v19, %v4057_v50  ;;  %v4515_v19 = vld [vmem:[#allocation20_spill] sm:$0xff] }
 0x346   :  { %2482 = vst [vmem:[#allocation2 + $0x20] sm:$0xff] %v2418_v37  ;;  %v1970_v52 = vpop.f32.mrf.mxu2  ;;  %v4514_v37 = vld [vmem:[#allocation19_spill] sm:$0xff] }
 0x347   :  { %v1971_v58 = vadd.f32 %v1970_v52, %v4143_v48  ;;  %1427 = vmatmul.bf16.gmra.mxu0 %v4512_v61  ;;  %v1558_v29 = vadd.f32 %v1557_v43, %v1389_v46 }
 0x348   :  { %1596 = vmatmul.bf16.gmra.mxu1 %v4513_v36  ;;  %v2139_v15 = vpop.f32.mrf.mxu3 }
 0x349   :  { %v2888_v18 = vpop.eup %2887  ;;  %v2140_v26 = vadd.f32 %v2139_v15, %v1971_v58  ;;  %v1706_v4 = vmax.f32 %v1558_v29, 0.0 }
 0x34a   :  { %v2354_v59 = vmul.f32 %v2888_v18, %v4152_v8 }
 0x34b   :  { %2889 = vtanh.f32 %v2140_v26 }
 0x34c   :  { %v2419_v5 = vadd.f32 %v4155_v41, %v2354_v59  ;;  %v1390_v54 = vpop.f32.mrf.mxu0 }
 0x34d   :  { %v1391_v47 = vadd.f32 %v1390_v54, %v4057_v50  ;;  %v1559_v45 = vpop.f32.mrf.mxu1 }
 0x34e   :  { %2483 = vst [vmem:[#allocation2 + $0x28] sm:$0xff] %v2419_v5  ;;  %v1972_v12 = vpop.f32.mrf.mxu2 }
 0x34f   :  { %v1560_v56 = vadd.f32 %v1559_v45, %v1391_v47  ;;  %v1973_v17 = vadd.f32 %v1972_v12, %v4143_v48 }
 0x350   :  { %v2141_v3 = vpop.f32.mrf.mxu3 }
 0x351   :  { %v2890_v51 = vpop.eup %2889  ;;  %v1708_v11 = vmax.f32 %v1560_v56, 0.0  ;;  %v2142_v16 = vadd.f32 %v2141_v3, %v1973_v17  ;;  %v4516_v3 = vld [vmem:[#allocation23_spill] sm:$0xff] }
 0x352   :  { %v2355_v53 = vmul.f32 %v2890_v51, %v4152_v8 }
 0x353   :  { %2891 = vtanh.f32 %v2142_v16  ;;  %2014 = vmatmul.bf16.gmra.mxu2 %v3864_v27  ;;  %v1810_v57 = vpack.c.bf16 %v1708_v11, %v1706_v4 }
 0x354   :  { %v2420_v28 = vadd.f32 %v4155_v41, %v2355_v53  ;;  %v1393_v23 = vpop.f32.mrf.mxu0 }
 0x355   :  { %v1562_v9 = vpop.f32.mrf.mxu1  ;;  %2183 = vmatmul.bf16.gmra.mxu3 %v1810_v57  ;;  %v1394_v58 = vadd.f32 %v1393_v23, %v4057_v50  ;;  %v4518_v23 = vld [vmem:[#allocation22_spill] sm:$0xff] }
 0x356   :  { %2484 = vst [vmem:[#allocation2 + $0x30] sm:$0xff] %v2420_v28  ;;  %v1975_v30 = vpop.f32.mrf.mxu2  ;;  %v4517_v28 = vld [vmem:[#allocation21_spill] sm:$0xff] }
 0x357   :  { %v1976_v7 = vadd.f32 %v1975_v30, %v4143_v48  ;;  %1432 = vmatmul.bf16.gmra.mxu0 %v4514_v37  ;;  %v1563_v18 = vadd.f32 %v1562_v9, %v1394_v58 }
 0x358   :  { %1601 = vmatmul.bf16.gmra.mxu1 %v4515_v19  ;;  %v2144_v43 = vpop.f32.mrf.mxu3 }
 0x359   :  { %v2892_v52 = vpop.eup %2891  ;;  %v2145_v61 = vadd.f32 %v2144_v43, %v1976_v7  ;;  %v1710_v45 = vmax.f32 %v1563_v18, 0.0 }
 0x35a   :  { %v2356_v27 = vmul.f32 %v2892_v52, %v4152_v8 }
 0x35b   :  { %2893 = vtanh.f32 %v2145_v61 }
 0x35c   :  { %v2421_v36 = vadd.f32 %v4155_v41, %v2356_v27  ;;  %v1395_v15 = vpop.f32.mrf.mxu0 }
 0x35d   :  { %v1396_v46 = vadd.f32 %v1395_v15, %v4057_v50  ;;  %v1564_v26 = vpop.f32.mrf.mxu1 }
 0x35e   :  { %2485 = vst [vmem:[#allocation2 + $0x38] sm:$0xff] %v2421_v36  ;;  %v1977_v59 = vpop.f32.mrf.mxu2 }
 0x35f   :  { %v1565_v5 = vadd.f32 %v1564_v26, %v1396_v46  ;;  %v1978_v54 = vadd.f32 %v1977_v59, %v4143_v48 }
 0x360   :  { %v2146_v29 = vpop.f32.mrf.mxu3 }
 0x361   :  { %v2894_v47 = vpop.eup %2893  ;;  %v1712_v12 = vmax.f32 %v1565_v5, 0.0  ;;  %v2147_v56 = vadd.f32 %v2146_v29, %v1978_v54 }
 0x362   :  { %v2357_v17 = vmul.f32 %v2894_v47, %v4152_v8 }
 0x363   :  { %2895 = vtanh.f32 %v2147_v56  ;;  %2019 = vmatmul.bf16.gmra.mxu2 %v4516_v3  ;;  %v1812_v51 = vpack.c.bf16 %v1712_v12, %v1710_v45 }
 0x364   :  { %v2422_v4 = vadd.f32 %v4155_v41, %v2357_v17  ;;  %v1398_v11 = vpop.f32.mrf.mxu0 }
 0x365   :  { %v1567_v16 = vpop.f32.mrf.mxu1  ;;  %2188 = vmatmul.bf16.gmra.mxu3 %v1812_v51  ;;  %v1399_v7 = vadd.f32 %v1398_v11, %v4057_v50 }
 0x366   :  { %2486 = vst [vmem:[#allocation2 + $0x40] sm:$0xff] %v2422_v4  ;;  %v1980_v53 = vpop.f32.mrf.mxu2 }
 0x367   :  { %v1981_v57 = vadd.f32 %v1980_v53, %v4143_v48  ;;  %1437 = vmatmul.bf16.gmra.mxu0 %v4517_v28  ;;  %v1568_v58 = vadd.f32 %v1567_v16, %v1399_v7 }
 0x368   :  { %1606 = vmatmul.bf16.gmra.mxu1 %v4518_v23  ;;  %v2149_v9 = vpop.f32.mrf.mxu3 }
 0x369   :  { %v2896_v30 = vpop.eup %2895  ;;  %v2150_v37 = vadd.f32 %v2149_v9, %v1981_v57  ;;  %v1714_v59 = vmax.f32 %v1568_v58, 0.0 }
 0x36a   :  { %v2358_v19 = vmul.f32 %v2896_v30, %v4152_v8 }
 0x36b   :  { %2897 = vtanh.f32 %v2150_v37 }
 0x36c   :  { %v2423_v43 = vadd.f32 %v4155_v41, %v2358_v19  ;;  %v1400_v52 = vpop.f32.mrf.mxu0 }
 0x36d   :  { %v1401_v61 = vadd.f32 %v1400_v52, %v4057_v50  ;;  %v1569_v27 = vpop.f32.mrf.mxu1 }
 0x36e   :  { %2487 = vst [vmem:[#allocation2 + $0x48] sm:$0xff] %v2423_v43  ;;  %v1982_v36 = vpop.f32.mrf.mxu2 }
 0x36f   :  { %v1570_v15 = vadd.f32 %v1569_v27, %v1401_v61  ;;  %v1983_v18 = vadd.f32 %v1982_v36, %v4143_v48 }
 0x370   :  { %v2151_v46 = vpop.f32.mrf.mxu3 }
 0x371   :  { %v2898_v26 = vpop.eup %2897  ;;  %v1716_v5 = vmax.f32 %v1570_v15, 0.0  ;;  %v2152_v54 = vadd.f32 %v2151_v46, %v1983_v18 }
 0x372   :  { %v2359_v29 = vmul.f32 %v2898_v26, %v4152_v8  ;;  %v4519_v26 = vld [vmem:[#allocation24_spill] sm:$0xff] }
 0x373   :  { %2899 = vtanh.f32 %v2152_v54  ;;  %2024 = vmatmul.bf16.gmra.mxu2 %v3914_v34  ;;  %v1814_v47 = vpack.c.bf16 %v1716_v5, %v1714_v59 }
 0x374   :  { %v2424_v45 = vadd.f32 %v4155_v41, %v2359_v29  ;;  %v1403_v12 = vpop.f32.mrf.mxu0 }
 0x375   :  { %v1572_v56 = vpop.f32.mrf.mxu1  ;;  %2193 = vmatmul.bf16.gmra.mxu3 %v1814_v47  ;;  %v1404_v11 = vadd.f32 %v1403_v12, %v4057_v50 }
 0x376   :  { %2488 = vst [vmem:[#allocation2 + $0x50] sm:$0xff] %v2424_v45  ;;  %v1985_v17 = vpop.f32.mrf.mxu2 }
 0x377   :  { %v1986_v3 = vadd.f32 %v1985_v17, %v4143_v48  ;;  %1442 = vmatmul.bf16.gmra.mxu0 %v3908_v10  ;;  %v1573_v28 = vadd.f32 %v1572_v56, %v1404_v11 }
 0x378   :  { %1611 = vmatmul.bf16.gmra.mxu1 %v3910_v24  ;;  %v2154_v51 = vpop.f32.mrf.mxu3 }
 0x379   :  { %v2900_v4 = vpop.eup %2899  ;;  %v2155_v16 = vadd.f32 %v2154_v51, %v1986_v3  ;;  %v1718_v19 = vmax.f32 %v1573_v28, 0.0 }
 0x37a   :  { %v2360_v34 = vmul.f32 %v2900_v4, %v4152_v8 }
 0x37b   :  { %2901 = vtanh.f32 %v2155_v16 }
 0x37c   :  { %v2425_v53 = vadd.f32 %v4155_v41, %v2360_v34  ;;  %v1405_v57 = vpop.f32.mrf.mxu0 }
 0x37d   :  { %v1406_v23 = vadd.f32 %v1405_v57, %v4057_v50  ;;  %v1574_v9 = vpop.f32.mrf.mxu1 }
 0x37e   :  { %2489 = vst [vmem:[#allocation2 + $0x58] sm:$0xff] %v2425_v53  ;;  %v1987_v30 = vpop.f32.mrf.mxu2 }
 0x37f   :  { %v1575_v10 = vadd.f32 %v1574_v9, %v1406_v23  ;;  %v1988_v24 = vadd.f32 %v1987_v30, %v4143_v48 }
 0x380   :  { %v2156_v7 = vpop.f32.mrf.mxu3 }
 0x381   :  { %v2902_v37 = vpop.eup %2901  ;;  %v1720_v43 = vmax.f32 %v1575_v10, 0.0  ;;  %v2157_v52 = vadd.f32 %v2156_v7, %v1988_v24  ;;  %v4520_v7 = vld [vmem:[#allocation25_spill] sm:$0xff] }
 0x382   :  { %v2361_v58 = vmul.f32 %v2902_v37, %v4152_v8 }
 0x383   :  { %2903 = vtanh.f32 %v2157_v52  ;;  %2029 = vmatmul.bf16.gmra.mxu2 %v3930_v1  ;;  %v1816_v61 = vpack.c.bf16 %v1720_v43, %v1718_v19 }
 0x384   :  { %v2426_v27 = vadd.f32 %v4155_v41, %v2361_v58  ;;  %v1408_v36 = vpop.f32.mrf.mxu0 }
 0x385   :  { %v1577_v15 = vpop.f32.mrf.mxu1  ;;  %2198 = vmatmul.bf16.gmra.mxu3 %v1816_v61  ;;  %v1409_v54 = vadd.f32 %v1408_v36, %v4057_v50 }
 0x386   :  { %2490 = vst [vmem:[#allocation2 + $0x60] sm:$0xff] %v2426_v27  ;;  %v1990_v18 = vpop.f32.mrf.mxu2 }
 0x387   :  { %v1991_v46 = vadd.f32 %v1990_v18, %v4143_v48  ;;  %1447 = vmatmul.bf16.gmra.mxu0 %v3924_v32  ;;  %v1578_v12 = vadd.f32 %v1577_v15, %v1409_v54 }
 0x388   :  { %1616 = vmatmul.bf16.gmra.mxu1 %v4519_v26  ;;  %v2159_v59 = vpop.f32.mrf.mxu3 }
 0x389   :  { %v2904_v5 = vpop.eup %2903  ;;  %v2160_v29 = vadd.f32 %v2159_v59, %v1991_v46  ;;  %v1722_v16 = vmax.f32 %v1578_v12, 0.0 }
 0x38a   :  { %v2362_v1 = vmul.f32 %v2904_v5, %v4152_v8 }
 0x38b   :  { %2905 = vtanh.f32 %v2160_v29 }
 0x38c   :  { %v2427_v47 = vadd.f32 %v4155_v41, %v2362_v1  ;;  %v1410_v45 = vpop.f32.mrf.mxu0 }
 0x38d   :  { %v1411_v56 = vadd.f32 %v1410_v45, %v4057_v50  ;;  %v1579_v17 = vpop.f32.mrf.mxu1 }
 0x38e   :  { %2491 = vst [vmem:[#allocation2 + $0x68] sm:$0xff] %v2427_v47  ;;  %v1992_v3 = vpop.f32.mrf.mxu2 }
 0x38f   :  { %v1580_v32 = vadd.f32 %v1579_v17, %v1411_v56  ;;  %v1993_v51 = vadd.f32 %v1992_v3, %v4143_v48 }
 0x390   :  { %v2161_v4 = vpop.f32.mrf.mxu3 }
 0x391   :  { %v2906_v11 = vpop.eup %2905  ;;  %v1724_v34 = vmax.f32 %v1580_v32, 0.0  ;;  %v2162_v53 = vadd.f32 %v2161_v4, %v1993_v51  ;;  %v4521_v32 = vld [vmem:[#allocation26_spill] sm:$0xff]  ;;  %v4522_v51 = vld [vmem:[#allocation27_spill] sm:$0xff] }
 0x392   :  { %v2363_v57 = vmul.f32 %v2906_v11, %v4152_v8 }
 0x393   :  { %2907 = vtanh.f32 %v2162_v53  ;;  %2034 = vmatmul.bf16.gmra.mxu2 %v3946_v44  ;;  %v1818_v28 = vpack.c.bf16 %v1724_v34, %v1722_v16 }
 0x394   :  { %v2428_v23 = vadd.f32 %v4155_v41, %v2363_v57  ;;  %v1413_v9 = vpop.f32.mrf.mxu0 }
 0x395   :  { %v1582_v30 = vpop.f32.mrf.mxu1  ;;  %2203 = vmatmul.bf16.gmra.mxu3 %v1818_v28  ;;  %v1414_v43 = vadd.f32 %v1413_v9, %v4057_v50 }
 0x396   :  { %2492 = vst [vmem:[#allocation2 + $0x70] sm:$0xff] %v2428_v23  ;;  %v1995_v10 = vpop.f32.mrf.mxu2 }
 0x397   :  { %v1996_v24 = vadd.f32 %v1995_v10, %v4143_v48  ;;  %1452 = vmatmul.bf16.gmra.mxu0 %v3940_v2  ;;  %v1583_v27 = vadd.f32 %v1582_v30, %v1414_v43 }
 0x398   :  { %1621 = vmatmul.bf16.gmra.mxu1 %v4520_v7  ;;  %v2164_v37 = vpop.f32.mrf.mxu3 }
 0x399   :  { %v2908_v19 = vpop.eup %2907  ;;  %v2165_v52 = vadd.f32 %v2164_v37, %v1996_v24  ;;  %v1726_v5 = vmax.f32 %v1583_v27, 0.0 }
 0x39a   :  { %v2364_v44 = vmul.f32 %v2908_v19, %v4152_v8 }
 0x39b   :  { %2909 = vtanh.f32 %v2165_v52 }
 0x39c   :  { %v2429_v58 = vadd.f32 %v4155_v41, %v2364_v44  ;;  %v1415_v61 = vpop.f32.mrf.mxu0 }
 0x39d   :  { %v1416_v36 = vadd.f32 %v1415_v61, %v4057_v50  ;;  %v1584_v15 = vpop.f32.mrf.mxu1 }
 0x39e   :  { %2493 = vst [vmem:[#allocation2 + $0x78] sm:$0xff] %v2429_v58  ;;  %v1997_v18 = vpop.f32.mrf.mxu2 }
 0x39f   :  { %v1585_v2 = vadd.f32 %v1584_v15, %v1416_v36  ;;  %v1998_v46 = vadd.f32 %v1997_v18, %v4143_v48 }
 0x3a0   :  { %v2166_v26 = vpop.f32.mrf.mxu3 }
 0x3a1   :  { %v2910_v59 = vpop.eup %2909  ;;  %v1728_v54 = vmax.f32 %v1585_v2, 0.0  ;;  %v2167_v29 = vadd.f32 %v2166_v26, %v1998_v46 }
 0x3a2   :  { %v2365_v1 = vmul.f32 %v2910_v59, %v4152_v8 }
 0x3a3   :  { %2911 = vtanh.f32 %v2167_v29  ;;  %2039 = vmatmul.bf16.gmra.mxu2 %v3968_v42  ;;  %v1820_v47 = vpack.c.bf16 %v1728_v54, %v1726_v5 }
 0x3a4   :  { %v2430_v45 = vadd.f32 %v4155_v41, %v2365_v1  ;;  %v1418_v12 = vpop.f32.mrf.mxu0 }
 0x3a5   :  { %v1587_v56 = vpop.f32.mrf.mxu1  ;;  %2208 = vmatmul.bf16.gmra.mxu3 %v1820_v47  ;;  %v1419_v16 = vadd.f32 %v1418_v12, %v4057_v50 }
 0x3a6   :  { %2494 = vst [vmem:[#allocation2 + $0x80] sm:$0xff] %v2430_v45  ;;  %v2000_v17 = vpop.f32.mrf.mxu2 }
 0x3a7   :  { %v2001_v3 = vadd.f32 %v2000_v17, %v4143_v48  ;;  %1457 = vmatmul.bf16.gmra.mxu0 %v4521_v32  ;;  %v1588_v28 = vadd.f32 %v1587_v56, %v1419_v16 }
 0x3a8   :  { %1626 = vmatmul.bf16.gmra.mxu1 %v4522_v51  ;;  %v2169_v4 = vpop.f32.mrf.mxu3 }
 0x3a9   :  { %v2912_v11 = vpop.eup %2911  ;;  %v2170_v34 = vadd.f32 %v2169_v4, %v2001_v3  ;;  %v1730_v19 = vmax.f32 %v1588_v28, 0.0 }
 0x3aa   :  { %v2366_v42 = vmul.f32 %v2912_v11, %v4152_v8 }
 0x3ab   :  { %2913 = vtanh.f32 %v2170_v34 }
 0x3ac   :  { %v2431_v53 = vadd.f32 %v4155_v41, %v2366_v42  ;;  %v1420_v57 = vpop.f32.mrf.mxu0 }
 0x3ad   :  { %v1421_v23 = vadd.f32 %v1420_v57, %v4057_v50  ;;  %v1589_v9 = vpop.f32.mrf.mxu1  ;;  %v4523_v57 = vld [vmem:[#allocation28_spill] sm:$0xff] }
 0x3ae   :  { %2495 = vst [vmem:[#allocation2 + $0x88] sm:$0xff] %v2431_v53  ;;  %v2002_v30 = vpop.f32.mrf.mxu2 }
 0x3af   :  { %v1590_v10 = vadd.f32 %v1589_v9, %v1421_v23  ;;  %v2003_v24 = vadd.f32 %v2002_v30, %v4143_v48 }
 0x3b0   :  { %v2171_v7 = vpop.f32.mrf.mxu3 }
 0x3b1   :  { %v2914_v37 = vpop.eup %2913  ;;  %v1732_v43 = vmax.f32 %v1590_v10, 0.0  ;;  %v2172_v52 = vadd.f32 %v2171_v7, %v2003_v24 }
 0x3b2   :  { %v2367_v44 = vmul.f32 %v2914_v37, %v4152_v8 }
 0x3b3   :  { %2915 = vtanh.f32 %v2172_v52  ;;  %2044 = vmatmul.bf16.gmra.mxu2 %v3990_v35  ;;  %v1822_v58 = vpack.c.bf16 %v1732_v43, %v1730_v19 }
 0x3b4   :  { %v2432_v61 = vadd.f32 %v4155_v41, %v2367_v44  ;;  %v1423_v27 = vpop.f32.mrf.mxu0 }
 0x3b5   :  { %v1592_v36 = vpop.f32.mrf.mxu1  ;;  %2213 = vmatmul.bf16.gmra.mxu3 %v1822_v58  ;;  %v1424_v26 = vadd.f32 %v1423_v27, %v4057_v50 }
 0x3b6   :  { %2496 = vst [vmem:[#allocation2 + $0x90] sm:$0xff] %v2432_v61  ;;  %v2005_v15 = vpop.f32.mrf.mxu2 }
 0x3b7   :  { %v2006_v18 = vadd.f32 %v2005_v15, %v4143_v48  ;;  %1462 = vmatmul.bf16.gmra.mxu0 %v3984_v13  ;;  %v1593_v29 = vadd.f32 %v1592_v36, %v1424_v26 }
 0x3b8   :  { %1631 = vmatmul.bf16.gmra.mxu1 %v3986_v60  ;;  %v2174_v2 = vpop.f32.mrf.mxu3 }
 0x3b9   :  { %v2916_v46 = vpop.eup %2915  ;;  %v2175_v59 = vadd.f32 %v2174_v2, %v2006_v18  ;;  %v1734_v17 = vmax.f32 %v1593_v29, 0.0 }
 0x3ba   :  { %v2368_v35 = vmul.f32 %v2916_v46, %v4152_v8 }
 0x3bb   :  { %2917 = vtanh.f32 %v2175_v59 }
 0x3bc   :  { %v2433_v5 = vadd.f32 %v4155_v41, %v2368_v35  ;;  %v1425_v54 = vpop.f32.mrf.mxu0 }
 0x3bd   :  { %v1426_v1 = vadd.f32 %v1425_v54, %v4057_v50  ;;  %v1594_v47 = vpop.f32.mrf.mxu1 }
 0x3be   :  { %2497 = vst [vmem:[#allocation2 + $0x98] sm:$0xff] %v2433_v5  ;;  %v2007_v45 = vpop.f32.mrf.mxu2  ;;  %v4524_v5 = vld [vmem:[#allocation29_spill] sm:$0xff] }
 0x3bf   :  { %v1595_v13 = vadd.f32 %v1594_v47, %v1426_v1  ;;  %v2008_v60 = vadd.f32 %v2007_v45, %v4143_v48 }
 0x3c0   :  { %v2176_v12 = vpop.f32.mrf.mxu3 }
 0x3c1   :  { %v2918_v56 = vpop.eup %2917  ;;  %v1736_v3 = vmax.f32 %v1595_v13, 0.0  ;;  %v2177_v32 = vadd.f32 %v2176_v12, %v2008_v60 }
 0x3c2   :  { %v2369_v51 = vmul.f32 %v2918_v56, %v4152_v8 }
 0x3c3   :  { %2919 = vtanh.f32 %v2177_v32  ;;  %2049 = vmatmul.bf16.gmra.mxu2 %v4006_v49  ;;  %v1824_v4 = vpack.c.bf16 %v1736_v3, %v1734_v17 }
 0x3c4   :  { %v2434_v11 = vadd.f32 %v4155_v41, %v2369_v51  ;;  %v1428_v16 = vpop.f32.mrf.mxu0 }
 0x3c5   :  { %v1597_v34 = vpop.f32.mrf.mxu1  ;;  %2218 = vmatmul.bf16.gmra.mxu3 %v1824_v4  ;;  %v1429_v9 = vadd.f32 %v1428_v16, %v4057_v50 }
 0x3c6   :  { %2498 = vst [vmem:[#allocation2 + $0xa0] sm:$0xff] %v2434_v11  ;;  %v2010_v42 = vpop.f32.mrf.mxu2 }
 0x3c7   :  { %v2011_v53 = vadd.f32 %v2010_v42, %v4143_v48  ;;  %1467 = vmatmul.bf16.gmra.mxu0 %v4000_v22  ;;  %v1598_v7 = vadd.f32 %v1597_v34, %v1429_v9 }
 0x3c8   :  { %1636 = vmatmul.bf16.gmra.mxu1 %v4523_v57  ;;  %v2179_v28 = vpop.f32.mrf.mxu3 }
 0x3c9   :  { %v2920_v23 = vpop.eup %2919  ;;  %v2180_v30 = vadd.f32 %v2179_v28, %v2011_v53  ;;  %v1738_v61 = vmax.f32 %v1598_v7, 0.0 }
 0x3ca   :  { %v2370_v49 = vmul.f32 %v2920_v23, %v4152_v8 }
 0x3cb   :  { %2921 = vtanh.f32 %v2180_v30  ;;  %v4525_v30 = vld [vmem:[#allocation30_spill] sm:$0xff] }
 0x3cc   :  { %v2435_v10 = vadd.f32 %v4155_v41, %v2370_v49  ;;  %v1430_v24 = vpop.f32.mrf.mxu0 }
 0x3cd   :  { %v1431_v37 = vadd.f32 %v1430_v24, %v4057_v50  ;;  %v1599_v19 = vpop.f32.mrf.mxu1 }
 0x3ce   :  { %2499 = vst [vmem:[#allocation2 + $0xa8] sm:$0xff] %v2435_v10  ;;  %v2012_v43 = vpop.f32.mrf.mxu2 }
 0x3cf   :  { %v1600_v22 = vadd.f32 %v1599_v19, %v1431_v37  ;;  %v2013_v52 = vadd.f32 %v2012_v43, %v4143_v48 }
 0x3d0   :  { %v2181_v44 = vpop.f32.mrf.mxu3 }
 0x3d1   :  { %v2922_v58 = vpop.eup %2921  ;;  %v1740_v27 = vmax.f32 %v1600_v22, 0.0  ;;  %v2182_v36 = vadd.f32 %v2181_v44, %v2013_v52 }
 0x3d2   :  { %v2371_v15 = vmul.f32 %v2922_v58, %v4152_v8 }
 0x3d3   :  { %v1826_v18 = vpack.c.bf16 %v1740_v27, %v1738_v61  ;;  %2923 = vtanh.f32 %v2182_v36  ;;  %2054 = vmatmul.bf16.gmra.mxu2 %v4022_v62 }
 0x3d4   :  { %v2436_v2 = vadd.f32 %v4155_v41, %v2371_v15  ;;  %v1433_v46 = vpop.f32.mrf.mxu0 }
 0x3d5   :  { %v1602_v26 = vpop.f32.mrf.mxu1  ;;  %2223 = vmatmul.bf16.gmra.mxu3 %v1826_v18  ;;  %v1434_v1 = vadd.f32 %v1433_v46, %v4057_v50 }
 0x3d6   :  { %2500 = vst [vmem:[#allocation2 + $0xb0] sm:$0xff] %v2436_v2  ;;  %v2015_v59 = vpop.f32.mrf.mxu2 }
 0x3d7   :  { %v2016_v35 = vadd.f32 %v2015_v59, %v4143_v48  ;;  %1472 = vmatmul.bf16.gmra.mxu0 %v4016_v6  ;;  %v1603_v60 = vadd.f32 %v1602_v26, %v1434_v1  ;;  %v4527_v1 = vld [vmem:[#allocation32_spill] sm:$0xff] }
 0x3d8   :  { %1641 = vmatmul.bf16.gmra.mxu1 %v4524_v5  ;;  %v2184_v54 = vpop.f32.mrf.mxu3 }
 0x3d9   :  { %v2924_v29 = vpop.eup %2923  ;;  %v2185_v47 = vadd.f32 %v2184_v54, %v2016_v35  ;;  %v1742_v4 = vmax.f32 %v1603_v60, 0.0 }
 0x3da   :  { %v2372_v62 = vmul.f32 %v2924_v29, %v4152_v8  ;;  %v4526_v29 = vld [vmem:[#allocation31_spill] sm:$0xff] }
 0x3db   :  { %2925 = vtanh.f32 %v2185_v47 }
 0x3dc   :  { %v2437_v45 = vadd.f32 %v4155_v41, %v2372_v62  ;;  %v1435_v13 = vpop.f32.mrf.mxu0 }
 0x3dd   :  { %v1436_v12 = vadd.f32 %v1435_v13, %v4057_v50  ;;  %v1604_v56 = vpop.f32.mrf.mxu1 }
 0x3de   :  { %2501 = vst [vmem:[#allocation2 + $0xb8] sm:$0xff] %v2437_v45  ;;  %v2017_v17 = vpop.f32.mrf.mxu2 }
 0x3df   :  { %v1605_v6 = vadd.f32 %v1604_v56, %v1436_v12  ;;  %v2018_v3 = vadd.f32 %v2017_v17, %v4143_v48 }
 0x3e0   :  { %v2186_v32 = vpop.f32.mrf.mxu3 }
 0x3e1   :  { %v2926_v51 = vpop.eup %2925  ;;  %v1744_v11 = vmax.f32 %v1605_v6, 0.0  ;;  %v2187_v16 = vadd.f32 %v2186_v32, %v2018_v3 }
 0x3e2   :  { %v2373_v34 = vmul.f32 %v2926_v51, %v4152_v8 }
 0x3e3   :  { %v1828_v42 = vpack.c.bf16 %v1744_v11, %v1742_v4  ;;  %2927 = vtanh.f32 %v2187_v16  ;;  %2059 = vmatmul.bf16.gmra.mxu2 %v4038_v21 }
 0x3e4   :  { %v2438_v53 = vadd.f32 %v4155_v41, %v2373_v34  ;;  %v1438_v57 = vpop.f32.mrf.mxu0 }
 0x3e5   :  { %v1607_v28 = vpop.f32.mrf.mxu1  ;;  %2228 = vmatmul.bf16.gmra.mxu3 %v1828_v42  ;;  %v1439_v24 = vadd.f32 %v1438_v57, %v4057_v50 }
 0x3e6   :  { %2502 = vst [vmem:[#allocation2 + $0xc0] sm:$0xff] %v2438_v53  ;;  %v2020_v23 = vpop.f32.mrf.mxu2 }
 0x3e7   :  { %v2021_v9 = vadd.f32 %v2020_v23, %v4143_v48  ;;  %1477 = vmatmul.bf16.gmra.mxu0 %v4032_v63  ;;  %v1608_v43 = vadd.f32 %v1607_v28, %v1439_v24 }
 0x3e8   :  { %1646 = vmatmul.bf16.gmra.mxu1 %v4525_v30  ;;  %v2189_v49 = vpop.f32.mrf.mxu3 }
 0x3e9   :  { %v2928_v10 = vpop.eup %2927  ;;  %v2190_v7 = vadd.f32 %v2189_v49, %v2021_v9  ;;  %v1746_v36 = vmax.f32 %v1608_v43, 0.0 }
 0x3ea   :  { %v2374_v21 = vmul.f32 %v2928_v10, %v4152_v8 }
 0x3eb   :  { %2929 = vtanh.f32 %v2190_v7 }
 0x3ec   :  { %v2439_v37 = vadd.f32 %v4155_v41, %v2374_v21  ;;  %v1440_v19 = vpop.f32.mrf.mxu0 }
 0x3ed   :  { %v1441_v22 = vadd.f32 %v1440_v19, %v4057_v50  ;;  %v1609_v52 = vpop.f32.mrf.mxu1 }
 0x3ee   :  { %2503 = vst [vmem:[#allocation2 + $0xc8] sm:$0xff] %v2439_v37  ;;  %v2022_v44 = vpop.f32.mrf.mxu2 }
 0x3ef   :  { %v1610_v63 = vadd.f32 %v1609_v52, %v1441_v22  ;;  %v2023_v58 = vadd.f32 %v2022_v44, %v4143_v48 }
 0x3f0   :  { %v2191_v61 = vpop.f32.mrf.mxu3 }
 0x3f1   :  { %v2930_v27 = vpop.eup %2929  ;;  %v1748_v15 = vmax.f32 %v1610_v63, 0.0  ;;  %v2192_v18 = vadd.f32 %v2191_v61, %v2023_v58 }
 0x3f2   :  { %v2375_v2 = vmul.f32 %v2930_v27, %v4152_v8 }
 0x3f3   :  { %v1830_v46 = vpack.c.bf16 %v1748_v15, %v1746_v36  ;;  %2931 = vtanh.f32 %v2192_v18  ;;  %2064 = vmatmul.bf16.gmra.mxu2 %v4059_v38 }
 0x3f4   :  { %v2440_v26 = vadd.f32 %v4155_v41, %v2375_v2  ;;  %v1443_v59 = vpop.f32.mrf.mxu0 }
 0x3f5   :  { %v1612_v35 = vpop.f32.mrf.mxu1  ;;  %2233 = vmatmul.bf16.gmra.mxu3 %v1830_v46  ;;  %v1444_v45 = vadd.f32 %v1443_v59, %v4057_v50 }
 0x3f6   :  { %2504 = vst [vmem:[#allocation2 + $0xd0] sm:$0xff] %v2440_v26  ;;  %v2025_v5 = vpop.f32.mrf.mxu2 }
 0x3f7   :  { %v2026_v54 = vadd.f32 %v2025_v5, %v4143_v48  ;;  %1482 = vmatmul.bf16.gmra.mxu0 %v4526_v29  ;;  %v1613_v56 = vadd.f32 %v1612_v35, %v1444_v45 }
 0x3f8   :  { %1651 = vmatmul.bf16.gmra.mxu1 %v4527_v1  ;;  %v2194_v47 = vpop.f32.mrf.mxu3 }
 0x3f9   :  { %v2932_v62 = vpop.eup %2931  ;;  %v2195_v13 = vadd.f32 %v2194_v47, %v2026_v54  ;;  %v1750_v16 = vmax.f32 %v1613_v56, 0.0 }
 0x3fa   :  { %v2376_v38 = vmul.f32 %v2932_v62, %v4152_v8 }
 0x3fb   :  { %2933 = vtanh.f32 %v2195_v13 }
 0x3fc   :  { %v2441_v60 = vadd.f32 %v4155_v41, %v2376_v38  ;;  %v1445_v12 = vpop.f32.mrf.mxu0 }
 0x3fd   :  { %v1446_v17 = vadd.f32 %v1445_v12, %v4057_v50  ;;  %v1614_v6 = vpop.f32.mrf.mxu1 }
 0x3fe   :  { %2505 = vst [vmem:[#allocation2 + $0xd8] sm:$0xff] %v2441_v60  ;;  %v2027_v3 = vpop.f32.mrf.mxu2 }
 0x3ff   :  { %v1615_v32 = vadd.f32 %v1614_v6, %v1446_v17  ;;  %v2028_v51 = vadd.f32 %v2027_v3, %v4143_v48 }
 0x400   :  { %v2196_v4 = vpop.f32.mrf.mxu3 }
 0x401   :  { %v2934_v11 = vpop.eup %2933  ;;  %v1752_v34 = vmax.f32 %v1615_v32, 0.0  ;;  %v2197_v42 = vadd.f32 %v2196_v4, %v2028_v51 }
 0x402   :  { %v2377_v53 = vmul.f32 %v2934_v11, %v4152_v8 }
 0x403   :  { %v1832_v57 = vpack.c.bf16 %v1752_v34, %v1750_v16  ;;  %2935 = vtanh.f32 %v2197_v42  ;;  %2069 = vmatmul.bf16.gmra.mxu2 %v4068_v40 }
 0x404   :  { %v2442_v28 = vadd.f32 %v4155_v41, %v2377_v53  ;;  %v1448_v23 = vpop.f32.mrf.mxu0 }
 0x405   :  { %v1617_v9 = vpop.f32.mrf.mxu1  ;;  %2238 = vmatmul.bf16.gmra.mxu3 %v1832_v57  ;;  %v1449_v7 = vadd.f32 %v1448_v23, %v4057_v50 }
 0x406   :  { %2506 = vst [vmem:[#allocation2 + $0xe0] sm:$0xff] %v2442_v28  ;;  %v2030_v30 = vpop.f32.mrf.mxu2 }
 0x407   :  { %v2031_v49 = vadd.f32 %v2030_v30, %v4143_v48  ;;  %v1618_v43 = vadd.f32 %v1617_v9, %v1449_v7 }
 0x408   :  { %v2199_v10 = vpop.f32.mrf.mxu3 }
 0x409   :  { %v2936_v24 = vpop.eup %2935  ;;  %v2200_v21 = vadd.f32 %v2199_v10, %v2031_v49  ;;  %v1754_v36 = vmax.f32 %v1618_v43, 0.0 }
 0x40a   :  { %v2378_v37 = vmul.f32 %v2936_v24, %v4152_v8 }
 0x40b   :  { %2937 = vtanh.f32 %v2200_v21 }
 0x40c   :  { %v2443_v19 = vadd.f32 %v4155_v41, %v2378_v37  ;;  %v1450_v40 = vpop.f32.mrf.mxu0 }
 0x40d   :  { %v1451_v22 = vadd.f32 %v1450_v40, %v4057_v50  ;;  %v1619_v52 = vpop.f32.mrf.mxu1 }
 0x40e   :  { %2507 = vst [vmem:[#allocation2 + $0xe8] sm:$0xff] %v2443_v19  ;;  %v2032_v44 = vpop.f32.mrf.mxu2 }
 0x40f   :  { %v1620_v63 = vadd.f32 %v1619_v52, %v1451_v22  ;;  %v2033_v58 = vadd.f32 %v2032_v44, %v4143_v48 }
 0x410   :  { %v2201_v61 = vpop.f32.mrf.mxu3 }
 0x411   :  { %v2938_v27 = vpop.eup %2937  ;;  %v1756_v15 = vmax.f32 %v1620_v63, 0.0  ;;  %v2202_v18 = vadd.f32 %v2201_v61, %v2033_v58 }
 0x412   :  { %v2379_v2 = vmul.f32 %v2938_v27, %v4152_v8 }
 0x413   :  { %v1834_v46 = vpack.c.bf16 %v1756_v15, %v1754_v36  ;;  %2939 = vtanh.f32 %v2202_v18  ;;  %2074 = vmatmul.bf16.gmra.mxu2 %v4077_v55 }
 0x414   :  { %v2444_v26 = vadd.f32 %v4155_v41, %v2379_v2  ;;  %v1453_v59 = vpop.f32.mrf.mxu0 }
 0x415   :  { %v1622_v35 = vpop.f32.mrf.mxu1  ;;  %2243 = vmatmul.bf16.gmra.mxu3 %v1834_v46  ;;  %v1454_v47 = vadd.f32 %v1453_v59, %v4057_v50 }
 0x416   :  { %2508 = vst [vmem:[#allocation2 + $0xf0] sm:$0xff] %v2444_v26  ;;  %v2035_v5 = vpop.f32.mrf.mxu2 }
 0x417   :  { %v2036_v54 = vadd.f32 %v2035_v5, %v4143_v48  ;;  %v1623_v38 = vadd.f32 %v1622_v35, %v1454_v47 }
 0x418   :  { %v2204_v29 = vpop.f32.mrf.mxu3 }
 0x419   :  { %v2940_v1 = vpop.eup %2939  ;;  %v2205_v62 = vadd.f32 %v2204_v29, %v2036_v54  ;;  %v1758_v51 = vmax.f32 %v1623_v38, 0.0 }
 0x41a   :  { %v2380_v45 = vmul.f32 %v2940_v1, %v4152_v8 }
 0x41b   :  { %2941 = vtanh.f32 %v2205_v62 }
 0x41c   :  { %v2445_v13 = vadd.f32 %v4155_v41, %v2380_v45  ;;  %v1455_v55 = vpop.f32.mrf.mxu0 }
 0x41d   :  { %v1456_v60 = vadd.f32 %v1455_v55, %v4057_v50  ;;  %v1624_v12 = vpop.f32.mrf.mxu1 }
 0x41e   :  { %2509 = vst [vmem:[#allocation2 + $0xf8] sm:$0xff] %v2445_v13  ;;  %v2037_v56 = vpop.f32.mrf.mxu2 }
 0x41f   :  { %v1625_v17 = vadd.f32 %v1624_v12, %v1456_v60  ;;  %v2038_v6 = vadd.f32 %v2037_v56, %v4143_v48 }
 0x420   :  { %v2206_v3 = vpop.f32.mrf.mxu3 }
 0x421   :  { %v2942_v32 = vpop.eup %2941  ;;  %v1760_v4 = vmax.f32 %v1625_v17, 0.0  ;;  %v2207_v11 = vadd.f32 %v2206_v3, %v2038_v6 }
 0x422   :  { %v2381_v16 = vmul.f32 %v2942_v32, %v4152_v8 }
 0x423   :  { %v1836_v34 = vpack.c.bf16 %v1760_v4, %v1758_v51  ;;  %2943 = vtanh.f32 %v2207_v11  ;;  %2079 = vmatmul.bf16.gmra.mxu2 %v4086_v25 }
 0x424   :  { %v2446_v42 = vadd.f32 %v4155_v41, %v2381_v16  ;;  %v1458_v53 = vpop.f32.mrf.mxu0 }
 0x425   :  { %v1627_v57 = vpop.f32.mrf.mxu1  ;;  %2248 = vmatmul.bf16.gmra.mxu3 %v1836_v34  ;;  %v1459_v49 = vadd.f32 %v1458_v53, %v4057_v50 }
 0x426   :  { %2510 = vst [vmem:[#allocation2 + $0x100] sm:$0xff] %v2446_v42  ;;  %v2040_v28 = vpop.f32.mrf.mxu2 }
 0x427   :  { %v2041_v23 = vadd.f32 %v2040_v28, %v4143_v48  ;;  %v1628_v21 = vadd.f32 %v1627_v57, %v1459_v49 }
 0x428   :  { %v2209_v9 = vpop.f32.mrf.mxu3 }
 0x429   :  { %v2944_v30 = vpop.eup %2943  ;;  %v2210_v10 = vadd.f32 %v2209_v9, %v2041_v23  ;;  %v1762_v63 = vmax.f32 %v1628_v21, 0.0 }
 0x42a   :  { %v2382_v24 = vmul.f32 %v2944_v30, %v4152_v8 }
 0x42b   :  { %2945 = vtanh.f32 %v2210_v10 }
 0x42c   :  { %v2447_v7 = vadd.f32 %v4155_v41, %v2382_v24  ;;  %v1460_v25 = vpop.f32.mrf.mxu0 }
 0x42d   :  { %v1461_v37 = vadd.f32 %v1460_v25, %v4057_v50  ;;  %v1629_v19 = vpop.f32.mrf.mxu1 }
 0x42e   :  { %2511 = vst [vmem:[#allocation2 + $0x108] sm:$0xff] %v2447_v7  ;;  %v2042_v40 = vpop.f32.mrf.mxu2 }
 0x42f   :  { %v1630_v43 = vadd.f32 %v1629_v19, %v1461_v37  ;;  %v2043_v22 = vadd.f32 %v2042_v40, %v4143_v48 }
 0x430   :  { %v2211_v52 = vpop.f32.mrf.mxu3 }
 0x431   :  { %v2946_v44 = vpop.eup %2945  ;;  %v1764_v58 = vmax.f32 %v1630_v43, 0.0  ;;  %v2212_v61 = vadd.f32 %v2211_v52, %v2043_v22 }
 0x432   :  { %v2383_v27 = vmul.f32 %v2946_v44, %v4152_v8 }
 0x433   :  { %v1838_v36 = vpack.c.bf16 %v1764_v58, %v1762_v63  ;;  %2947 = vtanh.f32 %v2212_v61  ;;  %2084 = vmatmul.bf16.gmra.mxu2 %v4095_v31 }
 0x434   :  { %v2448_v15 = vadd.f32 %v4155_v41, %v2383_v27  ;;  %v1463_v18 = vpop.f32.mrf.mxu0 }
 0x435   :  { %v1632_v2 = vpop.f32.mrf.mxu1  ;;  %2253 = vmatmul.bf16.gmra.mxu3 %v1838_v36  ;;  %v1464_v5 = vadd.f32 %v1463_v18, %v4057_v50 }
 0x436   :  { %2512 = vst [vmem:[#allocation2 + $0x110] sm:$0xff] %v2448_v15  ;;  %v2045_v46 = vpop.f32.mrf.mxu2 }
 0x437   :  { %v2046_v26 = vadd.f32 %v2045_v46, %v4143_v48  ;;  %v1633_v47 = vadd.f32 %v1632_v2, %v1464_v5 }
 0x438   :  { %v2214_v59 = vpop.f32.mrf.mxu3 }
 0x439   :  { %v2948_v35 = vpop.eup %2947  ;;  %v2215_v54 = vadd.f32 %v2214_v59, %v2046_v26  ;;  %v1766_v56 = vmax.f32 %v1633_v47, 0.0 }
 0x43a   :  { %v2384_v29 = vmul.f32 %v2948_v35, %v4152_v8 }
 0x43b   :  { %2949 = vtanh.f32 %v2215_v54 }
 0x43c   :  { %v2449_v1 = vadd.f32 %v4155_v41, %v2384_v29  ;;  %v1465_v31 = vpop.f32.mrf.mxu0 }
 0x43d   :  { %v1466_v62 = vadd.f32 %v1465_v31, %v4057_v50  ;;  %v1634_v45 = vpop.f32.mrf.mxu1 }
 0x43e   :  { %2513 = vst [vmem:[#allocation2 + $0x118] sm:$0xff] %v2449_v1  ;;  %v2047_v13 = vpop.f32.mrf.mxu2 }
 0x43f   :  { %v1635_v55 = vadd.f32 %v1634_v45, %v1466_v62  ;;  %v2048_v38 = vadd.f32 %v2047_v13, %v4143_v48 }
 0x440   :  { %v2216_v60 = vpop.f32.mrf.mxu3 }
 0x441   :  { %v2950_v12 = vpop.eup %2949  ;;  %v1768_v17 = vmax.f32 %v1635_v55, 0.0  ;;  %v2217_v6 = vadd.f32 %v2216_v60, %v2048_v38 }
 0x442   :  { %v2385_v3 = vmul.f32 %v2950_v12, %v4152_v8 }
 0x443   :  { %v1840_v32 = vpack.c.bf16 %v1768_v17, %v1766_v56  ;;  %2951 = vtanh.f32 %v2217_v6  ;;  %2089 = vmatmul.bf16.gmra.mxu2 %v4104_v33 }
 0x444   :  { %v2450_v51 = vadd.f32 %v4155_v41, %v2385_v3  ;;  %v1468_v4 = vpop.f32.mrf.mxu0 }
 0x445   :  { %v1637_v11 = vpop.f32.mrf.mxu1  ;;  %2258 = vmatmul.bf16.gmra.mxu3 %v1840_v32  ;;  %v1469_v57 = vadd.f32 %v1468_v4, %v4057_v50 }
 0x446   :  { %2514 = vst [vmem:[#allocation2 + $0x120] sm:$0xff] %v2450_v51  ;;  %v2050_v16 = vpop.f32.mrf.mxu2 }
 0x447   :  { %v2051_v34 = vadd.f32 %v2050_v16, %v4143_v48  ;;  %v1638_v30 = vadd.f32 %v1637_v11, %v1469_v57 }
 0x448   :  { %v2219_v42 = vpop.f32.mrf.mxu3 }
 0x449   :  { %v2952_v53 = vpop.eup %2951  ;;  %v2220_v28 = vadd.f32 %v2219_v42, %v2051_v34  ;;  %v1770_v19 = vmax.f32 %v1638_v30, 0.0 }
 0x44a   :  { %v2386_v23 = vmul.f32 %v2952_v53, %v4152_v8 }
 0x44b   :  { %2953 = vtanh.f32 %v2220_v28 }
 0x44c   :  { %v2451_v9 = vadd.f32 %v4155_v41, %v2386_v23  ;;  %v1470_v33 = vpop.f32.mrf.mxu0 }
 0x44d   :  { %v1471_v49 = vadd.f32 %v1470_v33, %v4057_v50  ;;  %v1639_v10 = vpop.f32.mrf.mxu1 }
 0x44e   :  { %2515 = vst [vmem:[#allocation2 + $0x128] sm:$0xff] %v2451_v9  ;;  %v2052_v24 = vpop.f32.mrf.mxu2 }
 0x44f   :  { %v1640_v7 = vadd.f32 %v1639_v10, %v1471_v49  ;;  %v2053_v25 = vadd.f32 %v2052_v24, %v4143_v48 }
 0x450   :  { %v2221_v21 = vpop.f32.mrf.mxu3 }
 0x451   :  { %v2954_v37 = vpop.eup %2953  ;;  %v1772_v40 = vmax.f32 %v1640_v7, 0.0  ;;  %v2222_v43 = vadd.f32 %v2221_v21, %v2053_v25 }
 0x452   :  { %v2387_v22 = vmul.f32 %v2954_v37, %v4152_v8 }
 0x453   :  { %v1842_v52 = vpack.c.bf16 %v1772_v40, %v1770_v19  ;;  %2955 = vtanh.f32 %v2222_v43  ;;  %2094 = vmatmul.bf16.gmra.mxu2 %v4113_v39 }
 0x454   :  { %v2452_v44 = vadd.f32 %v4155_v41, %v2387_v22  ;;  %v1473_v63 = vpop.f32.mrf.mxu0 }
 0x455   :  { %v1642_v58 = vpop.f32.mrf.mxu1  ;;  %2263 = vmatmul.bf16.gmra.mxu3 %v1842_v52  ;;  %v1474_v18 = vadd.f32 %v1473_v63, %v4057_v50 }
 0x456   :  { %2516 = vst [vmem:[#allocation2 + $0x130] sm:$0xff] %v2452_v44  ;;  %v2055_v61 = vpop.f32.mrf.mxu2 }
 0x457   :  { %v2056_v27 = vadd.f32 %v2055_v61, %v4143_v48  ;;  %v1643_v59 = vadd.f32 %v1642_v58, %v1474_v18 }
 0x458   :  { %v2224_v36 = vpop.f32.mrf.mxu3 }
 0x459   :  { %v2956_v15 = vpop.eup %2955  ;;  %v2225_v2 = vadd.f32 %v2224_v36, %v2056_v27  ;;  %v1774_v62 = vmax.f32 %v1643_v59, 0.0 }
 0x45a   :  { %v2388_v46 = vmul.f32 %v2956_v15, %v4152_v8 }
 0x45b   :  { %2957 = vtanh.f32 %v2225_v2 }
 0x45c   :  { %v2453_v26 = vadd.f32 %v4155_v41, %v2388_v46  ;;  %v1475_v39 = vpop.f32.mrf.mxu0 }
 0x45d   :  { %v1476_v35 = vadd.f32 %v1475_v39, %v4057_v50  ;;  %v1644_v5 = vpop.f32.mrf.mxu1 }
 0x45e   :  { %2517 = vst [vmem:[#allocation2 + $0x138] sm:$0xff] %v2453_v26  ;;  %v2057_v54 = vpop.f32.mrf.mxu2 }
 0x45f   :  { %v1645_v29 = vadd.f32 %v1644_v5, %v1476_v35  ;;  %v2058_v1 = vadd.f32 %v2057_v54, %v4143_v48 }
 0x460   :  { %v2226_v31 = vpop.f32.mrf.mxu3 }
 0x461   :  { %v2958_v47 = vpop.eup %2957  ;;  %v1776_v45 = vmax.f32 %v1645_v29, 0.0  ;;  %v2227_v13 = vadd.f32 %v2226_v31, %v2058_v1 }
 0x462   :  { %v2389_v55 = vmul.f32 %v2958_v47, %v4152_v8 }
 0x463   :  { %v1844_v38 = vpack.c.bf16 %v1776_v45, %v1774_v62  ;;  %2959 = vtanh.f32 %v2227_v13  ;;  %2099 = vmatmul.bf16.gmra.mxu2 %v4122_v14 }
 0x464   :  { %v2454_v60 = vadd.f32 %v4155_v41, %v2389_v55  ;;  %v1478_v12 = vpop.f32.mrf.mxu0 }
 0x465   :  { %v1647_v56 = vpop.f32.mrf.mxu1  ;;  %2268 = vmatmul.bf16.gmra.mxu3 %v1844_v38  ;;  %v1479_v51 = vadd.f32 %v1478_v12, %v4057_v50 }
 0x466   :  { %2518 = vst [vmem:[#allocation2 + $0x140] sm:$0xff] %v2454_v60  ;;  %v2060_v17 = vpop.f32.mrf.mxu2 }
 0x467   :  { %v2061_v6 = vadd.f32 %v2060_v17, %v4143_v48  ;;  %v1648_v34 = vadd.f32 %v1647_v56, %v1479_v51 }
 0x468   :  { %v2229_v3 = vpop.f32.mrf.mxu3 }
 0x469   :  { %v2960_v32 = vpop.eup %2959  ;;  %v2230_v4 = vadd.f32 %v2229_v3, %v2061_v6  ;;  %v1778_v30 = vmax.f32 %v1648_v34, 0.0 }
 0x46a   :  { %v2390_v11 = vmul.f32 %v2960_v32, %v4152_v8 }
 0x46b   :  { %2961 = vtanh.f32 %v2230_v4 }
 0x46c   :  { %v2455_v16 = vadd.f32 %v4155_v41, %v2390_v11  ;;  %v1480_v14 = vpop.f32.mrf.mxu0 }
 0x46d   :  { %v1481_v42 = vadd.f32 %v1480_v14, %v4057_v50  ;;  %v1649_v53 = vpop.f32.mrf.mxu1 }
 0x46e   :  { %2519 = vst [vmem:[#allocation2 + $0x148] sm:$0xff] %v2455_v16  ;;  %v2062_v57 = vpop.f32.mrf.mxu2 }
 0x46f   :  { %v1650_v28 = vadd.f32 %v1649_v53, %v1481_v42  ;;  %v2063_v23 = vadd.f32 %v2062_v57, %v4143_v48 }
 0x470   :  { %v2231_v9 = vpop.f32.mrf.mxu3 }
 0x471   :  { %v2962_v33 = vpop.eup %2961  ;;  %v1780_v49 = vmax.f32 %v1650_v28, 0.0  ;;  %v2232_v10 = vadd.f32 %v2231_v9, %v2063_v23 }
 0x472   :  { %v2391_v24 = vmul.f32 %v2962_v33, %v4152_v8 }
 0x473   :  { %v1846_v7 = vpack.c.bf16 %v1780_v49, %v1778_v30  ;;  %2963 = vtanh.f32 %v2232_v10  ;;  %2104 = vmatmul.bf16.gmra.mxu2 %v4131_v20 }
 0x474   :  { %v2456_v25 = vadd.f32 %v4155_v41, %v2391_v24  ;;  %v1483_v21 = vpop.f32.mrf.mxu0 }
 0x475   :  { %v1652_v37 = vpop.f32.mrf.mxu1  ;;  %2273 = vmatmul.bf16.gmra.mxu3 %v1846_v7  ;;  %v1484_v52 = vadd.f32 %v1483_v21, %v4057_v50 }
 0x476   :  { %2520 = vst [vmem:[#allocation2 + $0x150] sm:$0xff] %v2456_v25  ;;  %v2065_v19 = vpop.f32.mrf.mxu2 }
 0x477   :  { %v2066_v40 = vadd.f32 %v2065_v19, %v4143_v48  ;;  %v1653_v61 = vadd.f32 %v1652_v37, %v1484_v52 }
 0x478   :  { %v2234_v43 = vpop.f32.mrf.mxu3 }
 0x479   :  { %v2964_v22 = vpop.eup %2963  ;;  %v2235_v44 = vadd.f32 %v2234_v43, %v2066_v40  ;;  %v1782_v39 = vmax.f32 %v1653_v61, 0.0 }
 0x47a   :  { %v2392_v63 = vmul.f32 %v2964_v22, %v4152_v8 }
 0x47b   :  { %2965 = vtanh.f32 %v2235_v44 }
 0x47c   :  { %v2457_v58 = vadd.f32 %v4155_v41, %v2392_v63  ;;  %v1485_v20 = vpop.f32.mrf.mxu0 }
 0x47d   :  { %v1486_v27 = vadd.f32 %v1485_v20, %v4057_v50  ;;  %v1654_v36 = vpop.f32.mrf.mxu1 }
 0x47e   :  { %2521 = vst [vmem:[#allocation2 + $0x158] sm:$0xff] %v2457_v58  ;;  %v2067_v15 = vpop.f32.mrf.mxu2 }
 0x47f   :  { %v1655_v18 = vadd.f32 %v1654_v36, %v1486_v27  ;;  %v2068_v2 = vadd.f32 %v2067_v15, %v4143_v48 }
 0x480   :  { %v2236_v46 = vpop.f32.mrf.mxu3 }
 0x481   :  { %v2966_v26 = vpop.eup %2965  ;;  %v1784_v59 = vmax.f32 %v1655_v18, 0.0  ;;  %v2237_v35 = vadd.f32 %v2236_v46, %v2068_v2 }
 0x482   :  { %v2393_v5 = vmul.f32 %v2966_v26, %v4152_v8 }
 0x483   :  { %v1848_v54 = vpack.c.bf16 %v1784_v59, %v1782_v39  ;;  %2967 = vtanh.f32 %v2237_v35  ;;  %2109 = vmatmul.bf16.gmra.mxu2 %v4145_v0 }
 0x484   :  { %v2458_v29 = vadd.f32 %v4155_v41, %v2393_v5 }
 0x485   :  { %2278 = vmatmul.bf16.gmra.mxu3 %v1848_v54 }
 0x486   :  { %2522 = vst [vmem:[#allocation2 + $0x160] sm:$0xff] %v2458_v29  ;;  %v2070_v50 = vpop.f32.mrf.mxu2 }
 0x487   :  { %v2071_v1 = vadd.f32 %v2070_v50, %v4143_v48 }
 0x488   :  { %v2239_v31 = vpop.f32.mrf.mxu3 }
 0x489   :  { %v2968_v47 = vpop.eup %2967  ;;  %v2240_v62 = vadd.f32 %v2239_v31, %v2071_v1 }
 0x48a   :  { %v2394_v45 = vmul.f32 %v2968_v47, %v4152_v8 }
 0x48b   :  { %2969 = vtanh.f32 %v2240_v62 }
 0x48c   :  { %v2459_v13 = vadd.f32 %v4155_v41, %v2394_v45 }
 0x48e   :  { %2523 = vst [vmem:[#allocation2 + $0x168] sm:$0xff] %v2459_v13  ;;  %v2072_v55 = vpop.f32.mrf.mxu2 }
 0x48f   :  { %v2073_v38 = vadd.f32 %v2072_v55, %v4143_v48 }
 0x490   :  { %v2241_v0 = vpop.f32.mrf.mxu3 }
 0x491   :  { %v2970_v60 = vpop.eup %2969  ;;  %v2242_v12 = vadd.f32 %v2241_v0, %v2073_v38 }
 0x492   :  { %v2395_v56 = vmul.f32 %v2970_v60, %v4152_v8 }
 0x493   :  { %2971 = vtanh.f32 %v2242_v12 }
 0x494   :  { %v2460_v17 = vadd.f32 %v4155_v41, %v2395_v56 }
 0x496   :  { %2524 = vst [vmem:[#allocation2 + $0x170] sm:$0xff] %v2460_v17  ;;  %v2075_v6 = vpop.f32.mrf.mxu2 }
 0x497   :  { %v2076_v3 = vadd.f32 %v2075_v6, %v4143_v48 }
 0x498   :  { %v2244_v32 = vpop.f32.mrf.mxu3 }
 0x499   :  { %v2972_v51 = vpop.eup %2971  ;;  %v2245_v4 = vadd.f32 %v2244_v32, %v2076_v3 }
 0x49a   :  { %v2396_v11 = vmul.f32 %v2972_v51, %v4152_v8 }
 0x49b   :  { %2973 = vtanh.f32 %v2245_v4 }
 0x49c   :  { %v2461_v16 = vadd.f32 %v4155_v41, %v2396_v11 }
 0x49e   :  { %2525 = vst [vmem:[#allocation2 + $0x178] sm:$0xff] %v2461_v16  ;;  %v2077_v14 = vpop.f32.mrf.mxu2 }
 0x49f   :  { %v2078_v34 = vadd.f32 %v2077_v14, %v4143_v48 }
 0x4a0   :  { %v2246_v42 = vpop.f32.mrf.mxu3 }
 0x4a1   :  { %v2974_v53 = vpop.eup %2973  ;;  %v2247_v57 = vadd.f32 %v2246_v42, %v2078_v34 }
 0x4a2   :  { %v2397_v28 = vmul.f32 %v2974_v53, %v4152_v8 }
 0x4a3   :  { %2975 = vtanh.f32 %v2247_v57 }
 0x4a4   :  { %v2462_v23 = vadd.f32 %v4155_v41, %v2397_v28 }
 0x4a6   :  { %2526 = vst [vmem:[#allocation2 + $0x180] sm:$0xff] %v2462_v23  ;;  %v2080_v9 = vpop.f32.mrf.mxu2 }
 0x4a7   :  { %v2081_v33 = vadd.f32 %v2080_v9, %v4143_v48 }
 0x4a8   :  { %v2249_v30 = vpop.f32.mrf.mxu3 }
 0x4a9   :  { %v2976_v49 = vpop.eup %2975  ;;  %v2250_v10 = vadd.f32 %v2249_v30, %v2081_v33 }
 0x4aa   :  { %v2398_v24 = vmul.f32 %v2976_v49, %v4152_v8 }
 0x4ab   :  { %2977 = vtanh.f32 %v2250_v10 }
 0x4ac   :  { %v2463_v7 = vadd.f32 %v4155_v41, %v2398_v24 }
 0x4ae   :  { %2527 = vst [vmem:[#allocation2 + $0x188] sm:$0xff] %v2463_v7  ;;  %v2082_v25 = vpop.f32.mrf.mxu2 }
 0x4af   :  { %v2083_v21 = vadd.f32 %v2082_v25, %v4143_v48 }
 0x4b0   :  { %v2251_v37 = vpop.f32.mrf.mxu3 }
 0x4b1   :  { %v2978_v19 = vpop.eup %2977  ;;  %v2252_v40 = vadd.f32 %v2251_v37, %v2083_v21 }
 0x4b2   :  { %v2399_v43 = vmul.f32 %v2978_v19, %v4152_v8 }
 0x4b3   :  { %2979 = vtanh.f32 %v2252_v40 }
 0x4b4   :  { %v2464_v22 = vadd.f32 %v4155_v41, %v2399_v43 }
 0x4b6   :  { %2528 = vst [vmem:[#allocation2 + $0x190] sm:$0xff] %v2464_v22  ;;  %v2085_v52 = vpop.f32.mrf.mxu2 }
 0x4b7   :  { %v2086_v44 = vadd.f32 %v2085_v52, %v4143_v48 }
 0x4b8   :  { %v2254_v63 = vpop.f32.mrf.mxu3 }
 0x4b9   :  { %v2980_v58 = vpop.eup %2979  ;;  %v2255_v20 = vadd.f32 %v2254_v63, %v2086_v44 }
 0x4ba   :  { %v2400_v61 = vmul.f32 %v2980_v58, %v4152_v8 }
 0x4bb   :  { %2981 = vtanh.f32 %v2255_v20 }
 0x4bc   :  { %v2465_v27 = vadd.f32 %v4155_v41, %v2400_v61 }
 0x4be   :  { %2529 = vst [vmem:[#allocation2 + $0x198] sm:$0xff] %v2465_v27  ;;  %v2087_v36 = vpop.f32.mrf.mxu2 }
 0x4bf   :  { %v2088_v15 = vadd.f32 %v2087_v36, %v4143_v48 }
 0x4c0   :  { %v2256_v18 = vpop.f32.mrf.mxu3 }
 0x4c1   :  { %v2982_v2 = vpop.eup %2981  ;;  %v2257_v46 = vadd.f32 %v2256_v18, %v2088_v15 }
 0x4c2   :  { %v2401_v26 = vmul.f32 %v2982_v2, %v4152_v8 }
 0x4c3   :  { %2983 = vtanh.f32 %v2257_v46 }
 0x4c4   :  { %v2466_v39 = vadd.f32 %v4155_v41, %v2401_v26 }
 0x4c6   :  { %2530 = vst [vmem:[#allocation2 + $0x1a0] sm:$0xff] %v2466_v39  ;;  %v2090_v59 = vpop.f32.mrf.mxu2 }
 0x4c7   :  { %v2091_v35 = vadd.f32 %v2090_v59, %v4143_v48 }
 0x4c8   :  { %v2259_v5 = vpop.f32.mrf.mxu3 }
 0x4c9   :  { %v2984_v54 = vpop.eup %2983  ;;  %v2260_v29 = vadd.f32 %v2259_v5, %v2091_v35 }
 0x4ca   :  { %v2402_v50 = vmul.f32 %v2984_v54, %v4152_v8 }
 0x4cb   :  { %2985 = vtanh.f32 %v2260_v29 }
 0x4cc   :  { %v2467_v1 = vadd.f32 %v4155_v41, %v2402_v50 }
 0x4ce   :  { %2531 = vst [vmem:[#allocation2 + $0x1a8] sm:$0xff] %v2467_v1  ;;  %v2092_v31 = vpop.f32.mrf.mxu2 }
 0x4cf   :  { %v2093_v47 = vadd.f32 %v2092_v31, %v4143_v48 }
 0x4d0   :  { %v2261_v62 = vpop.f32.mrf.mxu3 }
 0x4d1   :  { %v2986_v45 = vpop.eup %2985  ;;  %v2262_v13 = vadd.f32 %v2261_v62, %v2093_v47 }
 0x4d2   :  { %v2403_v55 = vmul.f32 %v2986_v45, %v4152_v8 }
 0x4d3   :  { %2987 = vtanh.f32 %v2262_v13 }
 0x4d4   :  { %v2468_v38 = vadd.f32 %v4155_v41, %v2403_v55 }
 0x4d6   :  { %2532 = vst [vmem:[#allocation2 + $0x1b0] sm:$0xff] %v2468_v38  ;;  %v2095_v0 = vpop.f32.mrf.mxu2 }
 0x4d7   :  { %v2096_v60 = vadd.f32 %v2095_v0, %v4143_v48 }
 0x4d8   :  { %v2264_v12 = vpop.f32.mrf.mxu3 }
 0x4d9   :  { %v2988_v56 = vpop.eup %2987  ;;  %v2265_v17 = vadd.f32 %v2264_v12, %v2096_v60 }
 0x4da   :  { %v2404_v6 = vmul.f32 %v2988_v56, %v4152_v8 }
 0x4db   :  { %2989 = vtanh.f32 %v2265_v17 }
 0x4dc   :  { %v2469_v3 = vadd.f32 %v4155_v41, %v2404_v6 }
 0x4de   :  { %2533 = vst [vmem:[#allocation2 + $0x1b8] sm:$0xff] %v2469_v3  ;;  %v2097_v32 = vpop.f32.mrf.mxu2 }
 0x4df   :  { %v2098_v51 = vadd.f32 %v2097_v32, %v4143_v48 }
 0x4e0   :  { %v2266_v4 = vpop.f32.mrf.mxu3 }
 0x4e1   :  { %v2990_v11 = vpop.eup %2989  ;;  %v2267_v16 = vadd.f32 %v2266_v4, %v2098_v51 }
 0x4e2   :  { %v2405_v14 = vmul.f32 %v2990_v11, %v4152_v8 }
 0x4e3   :  { %2991 = vtanh.f32 %v2267_v16 }
 0x4e4   :  { %v2470_v34 = vadd.f32 %v4155_v41, %v2405_v14 }
 0x4e6   :  { %2534 = vst [vmem:[#allocation2 + $0x1c0] sm:$0xff] %v2470_v34  ;;  %v2100_v42 = vpop.f32.mrf.mxu2 }
 0x4e7   :  { %v2101_v53 = vadd.f32 %v2100_v42, %v4143_v48 }
 0x4e8   :  { %v2269_v57 = vpop.f32.mrf.mxu3 }
 0x4e9   :  { %v2992_v28 = vpop.eup %2991  ;;  %v2270_v23 = vadd.f32 %v2269_v57, %v2101_v53 }
 0x4ea   :  { %v2406_v9 = vmul.f32 %v2992_v28, %v4152_v8 }
 0x4eb   :  { %2993 = vtanh.f32 %v2270_v23 }
 0x4ec   :  { %v2471_v33 = vadd.f32 %v4155_v41, %v2406_v9 }
 0x4ee   :  { %2535 = vst [vmem:[#allocation2 + $0x1c8] sm:$0xff] %v2471_v33  ;;  %v2102_v30 = vpop.f32.mrf.mxu2 }
 0x4ef   :  { %v2103_v49 = vadd.f32 %v2102_v30, %v4143_v48 }
 0x4f0   :  { %v2271_v10 = vpop.f32.mrf.mxu3 }
 0x4f1   :  { %v2994_v24 = vpop.eup %2993  ;;  %v2272_v7 = vadd.f32 %v2271_v10, %v2103_v49 }
 0x4f2   :  { %v2407_v25 = vmul.f32 %v2994_v24, %v4152_v8 }
 0x4f3   :  { %2995 = vtanh.f32 %v2272_v7 }
 0x4f4   :  { %v2472_v21 = vadd.f32 %v4155_v41, %v2407_v25 }
 0x4f6   :  { %2536 = vst [vmem:[#allocation2 + $0x1d0] sm:$0xff] %v2472_v21  ;;  %v2105_v37 = vpop.f32.mrf.mxu2 }
 0x4f7   :  { %v2106_v19 = vadd.f32 %v2105_v37, %v4143_v48 }
 0x4f8   :  { %v2274_v40 = vpop.f32.mrf.mxu3 }
 0x4f9   :  { %v2996_v43 = vpop.eup %2995  ;;  %v2275_v22 = vadd.f32 %v2274_v40, %v2106_v19 }
 0x4fa   :  { %v2408_v52 = vmul.f32 %v2996_v43, %v4152_v8 }
 0x4fb   :  { %2997 = vtanh.f32 %v2275_v22 }
 0x4fc   :  { %v2473_v44 = vadd.f32 %v4155_v41, %v2408_v52 }
 0x4fe   :  { %2537 = vst [vmem:[#allocation2 + $0x1d8] sm:$0xff] %v2473_v44  ;;  %v2107_v63 = vpop.f32.mrf.mxu2 }
 0x4ff   :  { %v2108_v58 = vadd.f32 %v2107_v63, %v4143_v48 }
 0x500   :  { %v2276_v20 = vpop.f32.mrf.mxu3 }
 0x501   :  { %v2998_v61 = vpop.eup %2997  ;;  %v2277_v27 = vadd.f32 %v2276_v20, %v2108_v58 }
 0x502   :  { %v2409_v36 = vmul.f32 %v2998_v61, %v4152_v8 }
 0x503   :  { %2999 = vtanh.f32 %v2277_v27 }
 0x504   :  { %v2474_v15 = vadd.f32 %v4155_v41, %v2409_v36 }
 0x506   :  { %2538 = vst [vmem:[#allocation2 + $0x1e0] sm:$0xff] %v2474_v15  ;;  %v2110_v18 = vpop.f32.mrf.mxu2 }
 0x507   :  { %v2111_v2 = vadd.f32 %v2110_v18, %v4143_v48 }
 0x508   :  { %v2279_v46 = vpop.f32.mrf.mxu3 }
 0x509   :  { %v3000_v26 = vpop.eup %2999  ;;  %v2280_v39 = vadd.f32 %v2279_v46, %v2111_v2 }
 0x50a   :  { %v2410_v59 = vmul.f32 %v3000_v26, %v4152_v8 }
 0x50b   :  { %3001 = vtanh.f32 %v2280_v39 }
 0x50c   :  { %v2475_v35 = vadd.f32 %v4155_v41, %v2410_v59 }
 0x50e   :  { %2539 = vst [vmem:[#allocation2 + $0x1e8] sm:$0xff] %v2475_v35  ;;  %v2112_v5 = vpop.f32.mrf.mxu2 }
 0x50f   :  { %v2113_v54 = vadd.f32 %v2112_v5, %v4143_v48 }
 0x510   :  { %v2281_v29 = vpop.f32.mrf.mxu3 }
 0x511   :  { %v3002_v50 = vpop.eup %3001  ;;  %v2282_v1 = vadd.f32 %v2281_v29, %v2113_v54 }
 0x512   :  { %v2411_v31 = vmul.f32 %v3002_v50, %v4152_v8 }
 0x513   :  { %3003 = vtanh.f32 %v2282_v1 }
 0x514   :  { %v2476_v47 = vadd.f32 %v4155_v41, %v2411_v31 }
 0x516   :  { %2540 = vst [vmem:[#allocation2 + $0x1f0] sm:$0xff] %v2476_v47 }
 0x519   :  { %v3004_v62 = vpop.eup %3003 }
 0x51a   :  { %v2412_v45 = vmul.f32 %v3004_v62, %v4152_v8 }
 0x51c   :  { %v2477_v48 = vadd.f32 %v4155_v41, %v2412_v45 }
 0x51e   :  { %2541 = vst [vmem:[#allocation2 + $0x1f8] sm:$0xff] %v2477_v48 }
 0x51f   :  { %2554 = dma.vmem_to_hbm [thread:$0]  %s2547_s22, 8192, %s2549_s25, [#allocation3], %s3034_s26, %s3034_s26, %s3035_s27  }
 0x520   :  { %3031 = dma.done.wait [#allocation3], 8192  }
 0x521   :  { %3032 = vsyncadd [#allocation3], 4294959104 }
 0x522   :  { %2559 = vsyncpa [#allocation3], 1 }

</bundles_post_ra>
